<compile_context>
chip_gen: v7x
topology: tpu7x:2x2x1
jax: 0.10.0
libtpu: 0.0.40
codegen_flags: <defaults>
</compile_context>

<pallas_src>
import jax
import jax.numpy as jnp
from jax.experimental import pallas as pl
from jax.experimental.pallas import tpu as pltpu


def _hardswish(x):
    return x * jnp.clip(x + 3.0, 0.0, 6.0) / 6.0


def _hardsigmoid(x):
    return jnp.clip(x + 3.0, 0.0, 6.0) / 6.0


# ---------------------------------------------------------------------------
# Fused kernel: dw-conv+BN+hswish -> SE -> pw-conv+BN+hswish, one image / step
# ---------------------------------------------------------------------------
def depthwise_separable(x, p, stride, use_se=True):
    N, H, W, C = x.shape
    dw_w = p["dw_w"]
    KH, KW, _ = dw_w.shape
    pad = (KH - 1) // 2
    Ho = (H + 2 * pad - KH) // stride + 1
    Wo = (W + 2 * pad - KW) // stride + 1
    F = p["pw_w"].shape[1]
    Cr = p["se_w1"].shape[1] if use_se else 0

    # ---- fold BN scale into conv weights (bias stays a per-channel add) ----
    dw_wf = (dw_w * p["dw_scale"].reshape(1, 1, C)).astype(jnp.float32)
    dw_b = p["dw_bias"].reshape(1, C).astype(jnp.float32)
    # bf16 MXU operand for the pointwise matmul (f32 accumulation in-kernel)
    pw_wf = (p["pw_w"] * p["pw_scale"].reshape(1, F)).astype(jnp.bfloat16)
    pw_b = p["pw_bias"].reshape(1, F).astype(jnp.float32)

    # Spatial halo (small vs. the fused savings; see TODO above).
    xp = jnp.pad(x, ((0, 0), (pad, pad), (pad, pad), (0, 0)))
    Hp, Wp = H + 2 * pad, W + 2 * pad

    def kernel(*refs):
        if use_se:
            (xp_ref, dw_w_ref, dw_b_ref,
             se_w1_ref, se_b1_ref, se_w2_ref, se_b2_ref,
             pw_w_ref, pw_b_ref, o_ref) = refs
        else:
            (xp_ref, dw_w_ref, dw_b_ref, pw_w_ref, pw_b_ref, o_ref) = refs

        # ---- depthwise conv (groups=C), statically unrolled KHxKW taps ----
        xpad = xp_ref[0].astype(jnp.float32)                  # (Hp, Wp, C)
        acc = jnp.zeros((Ho, Wo, C), jnp.float32)
        for kh in range(KH):
            for kw in range(KW):
                patch = xpad[kh:kh + (Ho - 1) * stride + 1:stride,
                             kw:kw + (Wo - 1) * stride + 1:stride, :]
                acc = acc + patch * dw_w_ref[kh, kw, :].astype(jnp.float32)
        y = _hardswish(acc + dw_b_ref[0])                     # BN bias + act

        # ---- SE: the full dw output is already resident in VMEM ----
        if use_se:
            m = jnp.mean(y, axis=(0, 1)).reshape(1, C)        # global avg pool
            s1 = jnp.maximum(
                jnp.dot(m, se_w1_ref[...].astype(jnp.float32),
                        preferred_element_type=jnp.float32) + se_b1_ref[...],
                0.0)                                          # 1x1 conv + relu
            s2 = (jnp.dot(s1, se_w2_ref[...].astype(jnp.float32),
                          preferred_element_type=jnp.float32)
                  + se_b2_ref[...])                           # 1x1 conv
            y = y * _hardsigmoid(s2)[0]                       # gate (broadcast)

        # ---- pointwise 1x1 conv on MXU: bf16 operands, f32 accumulate ----
        yb = y.reshape(Ho * Wo, C).astype(jnp.bfloat16)
        z = jnp.dot(yb, pw_w_ref[...], preferred_element_type=jnp.float32)
        z = _hardswish(z + pw_b_ref[...])                     # BN bias + act
        o_ref[0] = z.astype(o_ref.dtype)                      # flat (HW, F) out

    # ---- specs / args ----
    args = [xp, dw_wf, dw_b]
    in_specs = [
        pl.BlockSpec((1, Hp, Wp, C), lambda n: (n, 0, 0, 0)),
        pl.BlockSpec((KH, KW, C), lambda n: (0, 0, 0)),
        pl.BlockSpec((1, C), lambda n: (0, 0)),
    ]
    if use_se:
        args += [p["se_w1"].astype(jnp.float32), p["se_b1"].reshape(1, Cr),
                 p["se_w2"].astype(jnp.float32), p["se_b2"].reshape(1, C)]
        in_specs += [
            pl.BlockSpec((C, Cr), lambda n: (0, 0)),
            pl.BlockSpec((1, Cr), lambda n: (0, 0)),
            pl.BlockSpec((Cr, C), lambda n: (0, 0)),
            pl.BlockSpec((1, C), lambda n: (0, 0)),
        ]
    args += [pw_wf, pw_b]
    in_specs += [
        pl.BlockSpec((C, F), lambda n: (0, 0)),
        pl.BlockSpec((1, F), lambda n: (0, 0)),
    ]

    # Advisory cost estimate so XLA schedules neighbors around the custom call.
    dw_flops = N * Ho * Wo * C * KH * KW * 2
    pw_flops = N * Ho * Wo * C * F * 2
    ew_flops = N * Ho * Wo * (8 * C + 6 * F)
    se_flops = N * (Ho * Wo * C + 4 * C * Cr) if use_se else 0
    bytes_accessed = int(
        xp.size * xp.dtype.itemsize               # input (padded) read
        + N * Ho * Wo * F * x.dtype.itemsize      # output write
        + dw_wf.size * 4 + pw_wf.size * 2
        + dw_b.size * 4 + pw_b.size * 4
        + (p["se_w1"].size + p["se_w2"].size + C + Cr) * 4 * (1 if use_se else 0))
    cost = pl.CostEstimate(flops=int(dw_flops + pw_flops + ew_flops + se_flops),
                           transcendentals=0,
                           bytes_accessed=bytes_accessed)

    flat = pl.pallas_call(
        kernel,
        out_shape=jax.ShapeDtypeStruct((N, Ho * Wo, F), x.dtype),
        grid=(N,),
        in_specs=in_specs,
        out_specs=pl.BlockSpec((1, Ho * Wo, F), lambda n: (n, 0, 0)),
        compiler_params=pltpu.CompilerParams(
            dimension_semantics=("parallel",),
            vmem_limit_bytes=32 * 1024 * 1024),   # safe on v5e/v6e/v7x
        cost_estimate=cost,
    )(*args)

    return flat.reshape(N, Ho, Wo, F)


# ---------------------------------------------------------------------------
# Pure-JAX reference (PyTorch semantics, f32) for correctness check
# ---------------------------------------------------------------------------
def ref_forward(x, p, stride, use_se=True):
    KH, KW, C = p["dw_w"].shape
    pad = (KH - 1) // 2
    N, H, W, _ = x.shape
    Ho = (H + 2 * pad - KH) // stride + 1
    Wo = (W + 2 * pad - KW) // stride + 1
    F = p["pw_w"].shape[1]

    xp = jnp.pad(x, ((0, 0), (pad, pad), (pad, pad), (0, 0)))
    acc = jnp.zeros((N, Ho, Wo, C), jnp.float32)
    for kh in range(KH):
        for kw in range(KW):
            acc = acc + xp[:, kh:kh + (Ho - 1) * stride + 1:stride,
                           kw:kw + (Wo - 1) * stride + 1:stride, :] * p["dw_w"][kh, kw]
    y = _hardswish(acc * p["dw_scale"].reshape(1, 1, 1, C)
                   + p["dw_bias"].reshape(1, 1, 1, C))
    if use_se:
        m = jnp.mean(y, axis=(1, 2))                          # (N, C)
        s1 = jnp.maximum(m @ p["se_w1"] + p["se_b1"].reshape(1, -1), 0.0)
        s2 = s1 @ p["se_w2"] + p["se_b2"].reshape(1, -1)
        y = y * _hardsigmoid(s2)[:, None, None, :]
    z = jnp.einsum("nhwc,cf->nhwf", y, p["pw_w"])
    return _hardswish(z * p["pw_scale"].reshape(1, 1, 1, F)
                      + p["pw_bias"].reshape(1, 1, 1, F)).astype(x.dtype)


def fold_bn(gamma, beta, rmean, rvar, eps=1e-5):
    scale = gamma / jnp.sqrt(rvar + eps)
    bias = beta - rmean * scale
    return scale.reshape(1, -1), bias.reshape(1, -1)


if __name__ == "__main__":
    # NHWC shapes; PyTorch NCHW equivalent input would be (2, 8, 16, 16).
    N, H, W, C = 2, 16, 16, 8
    F_OUT = 16
    STRIDE = 1
    DW_SIZE = 3
    REDUCTION = 4
    Cr = C // REDUCTION

    key = jax.random.PRNGKey(0)
    ks = jax.random.split(key, 16)

    x = jax.random.normal(ks[0], (N, H, W, C), jnp.float32)

    # depthwise conv weight + BN params
    dw_w = 0.2 * jax.random.normal(ks[1], (DW_SIZE, DW_SIZE, C), jnp.float32)
    dw_scale, dw_bias = fold_bn(
        jax.random.uniform(ks[2], (C,), minval=0.5, maxval=1.5),
        0.1 * jax.random.normal(ks[3], (C,)),
        0.1 * jax.random.normal(ks[4], (C,)),
        jax.random.uniform(ks[5], (C,), minval=0.5, maxval=1.5))

    # SE module params (1x1 convs with bias)
    se_w1 = 0.2 * jax.random.normal(ks[6], (C, Cr), jnp.float32)
    se_b1 = 0.1 * jax.random.normal(ks[7], (1, Cr), jnp.float32)
    se_w2 = 0.2 * jax.random.normal(ks[8], (Cr, C), jnp.float32)
    se_b2 = 0.1 * jax.random.normal(ks[9], (1, C), jnp.float32)

    # pointwise conv weight + BN params
    pw_w = 0.2 * jax.random.normal(ks[10], (C, F_OUT), jnp.float32)
    pw_scale, pw_bias = fold_bn(
        jax.random.uniform(ks[11], (F_OUT,), minval=0.5, maxval=1.5),
        0.1 * jax.random.normal(ks[12], (F_OUT,)),
        0.1 * jax.random.normal(ks[13], (F_OUT,)),
        jax.random.uniform(ks[14], (F_OUT,), minval=0.5, maxval=1.5))

    params = dict(dw_w=dw_w, dw_scale=dw_scale, dw_bias=dw_bias,
                  se_w1=se_w1, se_b1=se_b1, se_w2=se_w2, se_b2=se_b2,
                  pw_w=pw_w, pw_scale=pw_scale, pw_bias=pw_bias)

    # use_se=True path (exercises dw + SE + pw fusion)
    out = jax.block_until_ready(
        depthwise_separable(x, params, STRIDE, use_se=True))
    ref = ref_forward(x, params, STRIDE, use_se=True)
    assert out.shape == (N, H // STRIDE, W // STRIDE, F_OUT), out.shape
    # tolerance covers the bf16 MXU operands in the kernel vs f32 reference
    assert jnp.allclose(out, ref, atol=2e-2, rtol=2e-2), "mismatch (use_se=True)"

    # use_se=False path (module default)
    out2 = jax.block_until_ready(
        depthwise_separable(x, params, STRIDE, use_se=False))
    ref2 = ref_forward(x, params, STRIDE, use_se=False)
    assert out2.shape == (N, H // STRIDE, W // STRIDE, F_OUT), out2.shape
    assert jnp.allclose(out2, ref2, atol=2e-2, rtol=2e-2), "mismatch (use_se=False)"

    print("KERNEL_OK")
</pallas_src>

<mosaic_0001>
module attributes {stable_mosaic.version = 11 : i64} {
  func.func @kernel(%arg0: i32, %arg1: memref<1x18x18x8xf32, #tpu.memory_space<vmem>>, %arg2: memref<3x3x8xf32, #tpu.memory_space<vmem>>, %arg3: memref<1x8xf32, #tpu.memory_space<vmem>>, %arg4: memref<8x2xf32, #tpu.memory_space<vmem>>, %arg5: memref<1x2xf32, #tpu.memory_space<vmem>>, %arg6: memref<2x8xf32, #tpu.memory_space<vmem>>, %arg7: memref<1x8xf32, #tpu.memory_space<vmem>>, %arg8: memref<8x16xbf16, #tpu.memory_space<vmem>>, %arg9: memref<1x16xf32, #tpu.memory_space<vmem>>, %arg10: memref<1x256x16xf32, #tpu.memory_space<vmem>>) attributes {dimension_semantics = [#tpu.dimension_semantics<parallel>], iteration_bounds = array<i64: 2>, scalar_prefetch = 0 : i64, scratch_operands = 0 : i64, tpu.core_type = #tpu.core_type<tc>, window_params = [{transform_indices = @transform_0, window_bounds = array<i64: 1, 18, 18, 8>}, {pipeline_mode = #tpu.pipeline_mode<synchronous>, transform_indices = @transform_1, window_bounds = array<i64: 3, 3, 8>}, {pipeline_mode = #tpu.pipeline_mode<synchronous>, transform_indices = @transform_2, window_bounds = array<i64: 1, 8>}, {pipeline_mode = #tpu.pipeline_mode<synchronous>, transform_indices = @transform_3, window_bounds = array<i64: 8, 2>}, {pipeline_mode = #tpu.pipeline_mode<synchronous>, transform_indices = @transform_4, window_bounds = array<i64: 1, 2>}, {pipeline_mode = #tpu.pipeline_mode<synchronous>, transform_indices = @transform_5, window_bounds = array<i64: 2, 8>}, {pipeline_mode = #tpu.pipeline_mode<synchronous>, transform_indices = @transform_6, window_bounds = array<i64: 1, 8>}, {pipeline_mode = #tpu.pipeline_mode<synchronous>, transform_indices = @transform_7, window_bounds = array<i64: 8, 16>}, {pipeline_mode = #tpu.pipeline_mode<synchronous>, transform_indices = @transform_8, window_bounds = array<i64: 1, 16>}, {transform_indices = @transform_9, window_bounds = array<i64: 1, 256, 16>}]} {
    %c0 = arith.constant 0 : index
    %c0_0 = arith.constant 0 : index
    %c0_1 = arith.constant 0 : index
    %c0_2 = arith.constant 0 : index
    %0 = vector.load %arg1[%c0, %c0_0, %c0_1, %c0_2] : memref<1x18x18x8xf32, #tpu.memory_space<vmem>>, vector<1x18x18x8xf32>
    %1 = vector.shape_cast %0 : vector<1x18x18x8xf32> to vector<18x18x8xf32>
    %cst = arith.constant 0.000000e+00 : f32
    %2 = vector.broadcast %cst : f32 to vector<16x16x8xf32>
    %3 = vector.extract_strided_slice %1 {offsets = [0, 0, 0], sizes = [16, 16, 8], strides = [1, 1, 1]} : vector<18x18x8xf32> to vector<16x16x8xf32>
    %c0_3 = arith.constant 0 : index
    %c0_4 = arith.constant 0 : index
    %c0_5 = arith.constant 0 : index
    %4 = vector.load %arg2[%c0_3, %c0_4, %c0_5] : memref<3x3x8xf32, #tpu.memory_space<vmem>>, vector<1x1x8xf32>
    %5 = vector.shape_cast %4 : vector<1x1x8xf32> to vector<8xf32>
    %6 = vector.shape_cast %5 : vector<8xf32> to vector<1x1x8xf32>
    %7 = vector.broadcast %6 : vector<1x1x8xf32> to vector<16x16x8xf32>
    %8 = arith.mulf %3, %7 : vector<16x16x8xf32>
    %9 = arith.addf %2, %8 : vector<16x16x8xf32>
    %10 = vector.extract_strided_slice %1 {offsets = [0, 1, 0], sizes = [16, 16, 8], strides = [1, 1, 1]} : vector<18x18x8xf32> to vector<16x16x8xf32>
    %c0_6 = arith.constant 0 : index
    %c1 = arith.constant 1 : index
    %c0_7 = arith.constant 0 : index
    %11 = vector.load %arg2[%c0_6, %c1, %c0_7] : memref<3x3x8xf32, #tpu.memory_space<vmem>>, vector<1x1x8xf32>
    %12 = vector.shape_cast %11 : vector<1x1x8xf32> to vector<8xf32>
    %13 = vector.shape_cast %12 : vector<8xf32> to vector<1x1x8xf32>
    %14 = vector.broadcast %13 : vector<1x1x8xf32> to vector<16x16x8xf32>
    %15 = arith.mulf %10, %14 : vector<16x16x8xf32>
    %16 = arith.addf %9, %15 : vector<16x16x8xf32>
    %17 = vector.extract_strided_slice %1 {offsets = [0, 2, 0], sizes = [16, 16, 8], strides = [1, 1, 1]} : vector<18x18x8xf32> to vector<16x16x8xf32>
    %c0_8 = arith.constant 0 : index
    %c2 = arith.constant 2 : index
    %c0_9 = arith.constant 0 : index
    %18 = vector.load %arg2[%c0_8, %c2, %c0_9] : memref<3x3x8xf32, #tpu.memory_space<vmem>>, vector<1x1x8xf32>
    %19 = vector.shape_cast %18 : vector<1x1x8xf32> to vector<8xf32>
    %20 = vector.shape_cast %19 : vector<8xf32> to vector<1x1x8xf32>
    %21 = vector.broadcast %20 : vector<1x1x8xf32> to vector<16x16x8xf32>
    %22 = arith.mulf %17, %21 : vector<16x16x8xf32>
    %23 = arith.addf %16, %22 : vector<16x16x8xf32>
    %24 = vector.extract_strided_slice %1 {offsets = [1, 0, 0], sizes = [16, 16, 8], strides = [1, 1, 1]} : vector<18x18x8xf32> to vector<16x16x8xf32>
    %c1_10 = arith.constant 1 : index
    %c0_11 = arith.constant 0 : index
    %c0_12 = arith.constant 0 : index
    %25 = vector.load %arg2[%c1_10, %c0_11, %c0_12] : memref<3x3x8xf32, #tpu.memory_space<vmem>>, vector<1x1x8xf32>
    %26 = vector.shape_cast %25 : vector<1x1x8xf32> to vector<8xf32>
    %27 = vector.shape_cast %26 : vector<8xf32> to vector<1x1x8xf32>
    %28 = vector.broadcast %27 : vector<1x1x8xf32> to vector<16x16x8xf32>
    %29 = arith.mulf %24, %28 : vector<16x16x8xf32>
    %30 = arith.addf %23, %29 : vector<16x16x8xf32>
    %31 = vector.extract_strided_slice %1 {offsets = [1, 1, 0], sizes = [16, 16, 8], strides = [1, 1, 1]} : vector<18x18x8xf32> to vector<16x16x8xf32>
    %c1_13 = arith.constant 1 : index
    %c1_14 = arith.constant 1 : index
    %c0_15 = arith.constant 0 : index
    %32 = vector.load %arg2[%c1_13, %c1_14, %c0_15] : memref<3x3x8xf32, #tpu.memory_space<vmem>>, vector<1x1x8xf32>
    %33 = vector.shape_cast %32 : vector<1x1x8xf32> to vector<8xf32>
    %34 = vector.shape_cast %33 : vector<8xf32> to vector<1x1x8xf32>
    %35 = vector.broadcast %34 : vector<1x1x8xf32> to vector<16x16x8xf32>
    %36 = arith.mulf %31, %35 : vector<16x16x8xf32>
    %37 = arith.addf %30, %36 : vector<16x16x8xf32>
    %38 = vector.extract_strided_slice %1 {offsets = [1, 2, 0], sizes = [16, 16, 8], strides = [1, 1, 1]} : vector<18x18x8xf32> to vector<16x16x8xf32>
    %c1_16 = arith.constant 1 : index
    %c2_17 = arith.constant 2 : index
    %c0_18 = arith.constant 0 : index
    %39 = vector.load %arg2[%c1_16, %c2_17, %c0_18] : memref<3x3x8xf32, #tpu.memory_space<vmem>>, vector<1x1x8xf32>
    %40 = vector.shape_cast %39 : vector<1x1x8xf32> to vector<8xf32>
    %41 = vector.shape_cast %40 : vector<8xf32> to vector<1x1x8xf32>
    %42 = vector.broadcast %41 : vector<1x1x8xf32> to vector<16x16x8xf32>
    %43 = arith.mulf %38, %42 : vector<16x16x8xf32>
    %44 = arith.addf %37, %43 : vector<16x16x8xf32>
    %45 = vector.extract_strided_slice %1 {offsets = [2, 0, 0], sizes = [16, 16, 8], strides = [1, 1, 1]} : vector<18x18x8xf32> to vector<16x16x8xf32>
    %c2_19 = arith.constant 2 : index
    %c0_20 = arith.constant 0 : index
    %c0_21 = arith.constant 0 : index
    %46 = vector.load %arg2[%c2_19, %c0_20, %c0_21] : memref<3x3x8xf32, #tpu.memory_space<vmem>>, vector<1x1x8xf32>
    %47 = vector.shape_cast %46 : vector<1x1x8xf32> to vector<8xf32>
    %48 = vector.shape_cast %47 : vector<8xf32> to vector<1x1x8xf32>
    %49 = vector.broadcast %48 : vector<1x1x8xf32> to vector<16x16x8xf32>
    %50 = arith.mulf %45, %49 : vector<16x16x8xf32>
    %51 = arith.addf %44, %50 : vector<16x16x8xf32>
    %52 = vector.extract_strided_slice %1 {offsets = [2, 1, 0], sizes = [16, 16, 8], strides = [1, 1, 1]} : vector<18x18x8xf32> to vector<16x16x8xf32>
    %c2_22 = arith.constant 2 : index
    %c1_23 = arith.constant 1 : index
    %c0_24 = arith.constant 0 : index
    %53 = vector.load %arg2[%c2_22, %c1_23, %c0_24] : memref<3x3x8xf32, #tpu.memory_space<vmem>>, vector<1x1x8xf32>
    %54 = vector.shape_cast %53 : vector<1x1x8xf32> to vector<8xf32>
    %55 = vector.shape_cast %54 : vector<8xf32> to vector<1x1x8xf32>
    %56 = vector.broadcast %55 : vector<1x1x8xf32> to vector<16x16x8xf32>
    %57 = arith.mulf %52, %56 : vector<16x16x8xf32>
    %58 = arith.addf %51, %57 : vector<16x16x8xf32>
    %59 = vector.extract_strided_slice %1 {offsets = [2, 2, 0], sizes = [16, 16, 8], strides = [1, 1, 1]} : vector<18x18x8xf32> to vector<16x16x8xf32>
    %c2_25 = arith.constant 2 : index
    %c2_26 = arith.constant 2 : index
    %c0_27 = arith.constant 0 : index
    %60 = vector.load %arg2[%c2_25, %c2_26, %c0_27] : memref<3x3x8xf32, #tpu.memory_space<vmem>>, vector<1x1x8xf32>
    %61 = vector.shape_cast %60 : vector<1x1x8xf32> to vector<8xf32>
    %62 = vector.shape_cast %61 : vector<8xf32> to vector<1x1x8xf32>
    %63 = vector.broadcast %62 : vector<1x1x8xf32> to vector<16x16x8xf32>
    %64 = arith.mulf %59, %63 : vector<16x16x8xf32>
    %65 = arith.addf %58, %64 : vector<16x16x8xf32>
    %c0_28 = arith.constant 0 : index
    %c0_29 = arith.constant 0 : index
    %66 = vector.load %arg3[%c0_28, %c0_29] : memref<1x8xf32, #tpu.memory_space<vmem>>, vector<1x8xf32>
    %67 = vector.shape_cast %66 : vector<1x8xf32> to vector<8xf32>
    %68 = vector.shape_cast %67 : vector<8xf32> to vector<1x1x8xf32>
    %69 = vector.broadcast %68 : vector<1x1x8xf32> to vector<16x16x8xf32>
    %70 = arith.addf %65, %69 : vector<16x16x8xf32>
    %cst_30 = arith.constant 3.000000e+00 : f32
    %71 = vector.broadcast %cst_30 : f32 to vector<16x16x8xf32>
    %72 = arith.addf %70, %71 : vector<16x16x8xf32>
    %cst_31 = arith.constant 0.000000e+00 : f32
    %cst_32 = arith.constant 6.000000e+00 : f32
    %73 = vector.broadcast %cst_31 : f32 to vector<16x16x8xf32>
    %74 = arith.maximumf %73, %72 : vector<16x16x8xf32>
    %75 = vector.broadcast %cst_32 : f32 to vector<16x16x8xf32>
    %76 = arith.minimumf %75, %74 : vector<16x16x8xf32>
    %77 = arith.mulf %70, %76 : vector<16x16x8xf32>
    %cst_33 = arith.constant 6.000000e+00 : f32
    %78 = vector.broadcast %cst_33 : f32 to vector<16x16x8xf32>
    %79 = arith.divf %77, %78 : vector<16x16x8xf32>
    %cst_34 = arith.constant dense<0.000000e+00> : vector<8xf32>
    %80 = vector.multi_reduction <add>, %79, %cst_34 [0, 1] : vector<16x16x8xf32> to vector<8xf32>
    %cst_35 = arith.constant 2.560000e+02 : f32
    %81 = vector.broadcast %cst_35 : f32 to vector<8xf32>
    %82 = arith.divf %80, %81 : vector<8xf32>
    %83 = vector.shape_cast %82 : vector<8xf32> to vector<1x8xf32>
    %c0_36 = arith.constant 0 : index
    %c0_37 = arith.constant 0 : index
    %84 = vector.load %arg4[%c0_36, %c0_37] : memref<8x2xf32, #tpu.memory_space<vmem>>, vector<8x2xf32>
    %cst_38 = arith.constant dense<0.000000e+00> : vector<1x2xf32>
    %85 = tpu.matmul %83, %84, %cst_38 {dimension_numbers = #tpu.dot_dimension_numbers<[1], [0], [0], [1], [0, 0, 1, 1], [], []>} : vector<1x8xf32>, vector<8x2xf32>, vector<1x2xf32> -> vector<1x2xf32>
    %c0_39 = arith.constant 0 : index
    %c0_40 = arith.constant 0 : index
    %86 = vector.load %arg5[%c0_39, %c0_40] : memref<1x2xf32, #tpu.memory_space<vmem>>, vector<1x2xf32>
    %87 = arith.addf %85, %86 : vector<1x2xf32>
    %cst_41 = arith.constant 0.000000e+00 : f32
    %88 = vector.broadcast %cst_41 : f32 to vector<1x2xf32>
    %89 = arith.maximumf %87, %88 : vector<1x2xf32>
    %c0_42 = arith.constant 0 : index
    %c0_43 = arith.constant 0 : index
    %90 = vector.load %arg6[%c0_42, %c0_43] : memref<2x8xf32, #tpu.memory_space<vmem>>, vector<2x8xf32>
    %cst_44 = arith.constant dense<0.000000e+00> : vector<1x8xf32>
    %91 = tpu.matmul %89, %90, %cst_44 {dimension_numbers = #tpu.dot_dimension_numbers<[1], [0], [0], [1], [0, 0, 1, 1], [], []>} : vector<1x2xf32>, vector<2x8xf32>, vector<1x8xf32> -> vector<1x8xf32>
    %c0_45 = arith.constant 0 : index
    %c0_46 = arith.constant 0 : index
    %92 = vector.load %arg7[%c0_45, %c0_46] : memref<1x8xf32, #tpu.memory_space<vmem>>, vector<1x8xf32>
    %93 = arith.addf %91, %92 : vector<1x8xf32>
    %cst_47 = arith.constant 3.000000e+00 : f32
    %94 = vector.broadcast %cst_47 : f32 to vector<1x8xf32>
    %95 = arith.addf %93, %94 : vector<1x8xf32>
    %cst_48 = arith.constant 0.000000e+00 : f32
    %cst_49 = arith.constant 6.000000e+00 : f32
    %96 = vector.broadcast %cst_48 : f32 to vector<1x8xf32>
    %97 = arith.maximumf %96, %95 : vector<1x8xf32>
    %98 = vector.broadcast %cst_49 : f32 to vector<1x8xf32>
    %99 = arith.minimumf %98, %97 : vector<1x8xf32>
    %cst_50 = arith.constant 6.000000e+00 : f32
    %100 = vector.broadcast %cst_50 : f32 to vector<1x8xf32>
    %101 = arith.divf %99, %100 : vector<1x8xf32>
    %102 = vector.shape_cast %101 : vector<1x8xf32> to vector<8xf32>
    %103 = vector.shape_cast %102 : vector<8xf32> to vector<1x1x8xf32>
    %104 = vector.broadcast %103 : vector<1x1x8xf32> to vector<16x16x8xf32>
    %105 = arith.mulf %79, %104 : vector<16x16x8xf32>
    %106 = vector.shape_cast %105 : vector<16x16x8xf32> to vector<256x8xf32>
    %107 = arith.truncf %106 : vector<256x8xf32> to vector<256x8xbf16>
    %c0_51 = arith.constant 0 : index
    %c0_52 = arith.constant 0 : index
    %108 = vector.load %arg8[%c0_51, %c0_52] : memref<8x16xbf16, #tpu.memory_space<vmem>>, vector<8x16xbf16>
    %cst_53 = arith.constant dense<0.000000e+00> : vector<256x16xf32>
    %109 = tpu.matmul %107, %108, %cst_53 {dimension_numbers = #tpu.dot_dimension_numbers<[1], [0], [0], [1], [0, 0, 1, 1], [], []>} : vector<256x8xbf16>, vector<8x16xbf16>, vector<256x16xf32> -> vector<256x16xf32>
    %c0_54 = arith.constant 0 : index
    %c0_55 = arith.constant 0 : index
    %110 = vector.load %arg9[%c0_54, %c0_55] : memref<1x16xf32, #tpu.memory_space<vmem>>, vector<1x16xf32>
    %111 = vector.broadcast %110 : vector<1x16xf32> to vector<256x16xf32>
    %112 = arith.addf %109, %111 : vector<256x16xf32>
    %cst_56 = arith.constant 3.000000e+00 : f32
    %113 = vector.broadcast %cst_56 : f32 to vector<256x16xf32>
    %114 = arith.addf %112, %113 : vector<256x16xf32>
    %cst_57 = arith.constant 0.000000e+00 : f32
    %cst_58 = arith.constant 6.000000e+00 : f32
    %115 = vector.broadcast %cst_57 : f32 to vector<256x16xf32>
    %116 = arith.maximumf %115, %114 : vector<256x16xf32>
    %117 = vector.broadcast %cst_58 : f32 to vector<256x16xf32>
    %118 = arith.minimumf %117, %116 : vector<256x16xf32>
    %119 = arith.mulf %112, %118 : vector<256x16xf32>
    %cst_59 = arith.constant 6.000000e+00 : f32
    %120 = vector.broadcast %cst_59 : f32 to vector<256x16xf32>
    %121 = arith.divf %119, %120 : vector<256x16xf32>
    %c0_60 = arith.constant 0 : index
    %c0_61 = arith.constant 0 : index
    %c0_62 = arith.constant 0 : index
    %122 = vector.load %arg10[%c0_60, %c0_61, %c0_62] : memref<1x256x16xf32, #tpu.memory_space<vmem>>, vector<1x256x16xf32>
    %123 = vector.shape_cast %122 : vector<1x256x16xf32> to vector<256x16xf32>
    %124 = vector.shape_cast %121 : vector<256x16xf32> to vector<1x256x16xf32>
    tpu.vector_store %arg10[%c0_60, %c0_61, %c0_62], %124 {strides = array<i32>} : memref<1x256x16xf32, #tpu.memory_space<vmem>>, vector<1x256x16xf32>,
    return
  }
  func.func @transform_0(%arg0: i32) -> (i32, i32, i32, i32) {
    %c0_i32 = arith.constant 0 : i32
    %c0_i32_0 = arith.constant 0 : i32
    %c0_i32_1 = arith.constant 0 : i32
    %c0_i32_2 = arith.constant 0 : i32
    return %arg0, %c0_i32, %c0_i32_0, %c0_i32_1 : i32, i32, i32, i32
  }
  func.func @transform_1(%arg0: i32) -> (i32, i32, i32) {
    %c0_i32 = arith.constant 0 : i32
    %c0_i32_0 = arith.constant 0 : i32
    %c0_i32_1 = arith.constant 0 : i32
    %c0_i32_2 = arith.constant 0 : i32
    return %c0_i32, %c0_i32_0, %c0_i32_1 : i32, i32, i32
  }
  func.func @transform_2(%arg0: i32) -> (i32, i32) {
    %c0_i32 = arith.constant 0 : i32
    %c0_i32_0 = arith.constant 0 : i32
    %c0_i32_1 = arith.constant 0 : i32
    return %c0_i32, %c0_i32_0 : i32, i32
  }
  func.func @transform_3(%arg0: i32) -> (i32, i32) {
    %c0_i32 = arith.constant 0 : i32
    %c0_i32_0 = arith.constant 0 : i32
    %c0_i32_1 = arith.constant 0 : i32
    return %c0_i32, %c0_i32_0 : i32, i32
  }
  func.func @transform_4(%arg0: i32) -> (i32, i32) {
    %c0_i32 = arith.constant 0 : i32
    %c0_i32_0 = arith.constant 0 : i32
    %c0_i32_1 = arith.constant 0 : i32
    return %c0_i32, %c0_i32_0 : i32, i32
  }
  func.func @transform_5(%arg0: i32) -> (i32, i32) {
    %c0_i32 = arith.constant 0 : i32
    %c0_i32_0 = arith.constant 0 : i32
    %c0_i32_1 = arith.constant 0 : i32
    return %c0_i32, %c0_i32_0 : i32, i32
  }
  func.func @transform_6(%arg0: i32) -> (i32, i32) {
    %c0_i32 = arith.constant 0 : i32
    %c0_i32_0 = arith.constant 0 : i32
    %c0_i32_1 = arith.constant 0 : i32
    return %c0_i32, %c0_i32_0 : i32, i32
  }
  func.func @transform_7(%arg0: i32) -> (i32, i32) {
    %c0_i32 = arith.constant 0 : i32
    %c0_i32_0 = arith.constant 0 : i32
    %c0_i32_1 = arith.constant 0 : i32
    return %c0_i32, %c0_i32_0 : i32, i32
  }
  func.func @transform_8(%arg0: i32) -> (i32, i32) {
    %c0_i32 = arith.constant 0 : i32
    %c0_i32_0 = arith.constant 0 : i32
    %c0_i32_1 = arith.constant 0 : i32
    return %c0_i32, %c0_i32_0 : i32, i32
  }
  func.func @transform_9(%arg0: i32) -> (i32, i32, i32) {
    %c0_i32 = arith.constant 0 : i32
    %c0_i32_0 = arith.constant 0 : i32
    %c0_i32_1 = arith.constant 0 : i32
    return %arg0, %c0_i32, %c0_i32_0 : i32, i32, i32
  }
}

</mosaic_0001>

<bundles_post_ra>
// kernel: tpu_custom_call.1
= control target key start
LH: loop header
LB: loop body
LE: loop exit
PB: predicated region body
PF: predicated region fallthrough
CT: control target
= control target key end

     0   :  { %s3257_s30 = smov 0   ;;  %s6674_s0 = inlined_call_operand.vmem [shape: f32[2,18,18,8], index: 0, kind: input, shape index: {}]   ;;  %s6675_s1 = inlined_call_operand.vmem [shape: f32[3,3,8], index: 1, kind: input, shape index: {}]   ;;  %s6676_s2 = inlined_call_operand.vmem [shape: f32[1,8], index: 2, kind: input, shape index: {}]   ;;  %s6677_s3 = inlined_call_operand.vmem [shape: f32[8,2], index: 3, kind: input, shape index: {}]   ;;  %s6678_s4 = inlined_call_operand.vmem [shape: f32[1,2], index: 4, kind: input, shape index: {}]   ;;  %s6679_s5 = inlined_call_operand.vmem [shape: f32[2,8], index: 5, kind: input, shape index: {}]   ;;  %s6680_s6 = inlined_call_operand.vmem [shape: f32[1,8], index: 6, kind: input, shape index: {}]   ;;  %s6681_s7 = inlined_call_operand.vmem [shape: bf16[8,16], index: 7, kind: input, shape index: {}]   ;;  %s6682_s8 = inlined_call_operand.vmem [shape: f32[1,16], index: 8, kind: input, shape index: {}]   ;;  %s6683_s9 = inlined_call_operand.vmem [shape: f32[2,256,16], index: 9, kind: output, shape index: {}]  }
   0x1 LB: > { %s3022_s10 = sadd.s32 4294967295, %s3203_s30   ;;  %p3026_p0 = scmp.ge.s32.totalorder %s3203_s30, 1  ;;  %s3203_s30 = sphi %s3257_s30, %s19_s30  }
   0x2   : > { %p287_p1 = scmp.lt.s32.totalorder %s3203_s30, 3 }
   0x4   : > { %p288_p2 = pnand %p3026_p0, %p287_p1 }
   0x6   : > { %291 = sbr.rel (%p288_p2) target bundleno = 1150 (0x47e), region = 56 }
   0xd   : > { %v2341_v0 = vld [vmem:[%s6677_s3] sm:$0xff]  ;;  %v3205_v1 = vmov 0.0   ;;  %vm3206_vm0 = vmmov 0   ;;  %p323_p3 = scmp.lt.s32.totalorder %s3022_s10, 1  ;;  %vm558_vm1 = vcmask 1046528   ;;  %vm804_vm2 = vcmask 1045504  }
   0xe   : > { %3090 = vmatprep.subr.mxu0 %v3205_v1  ;;  %3092 = vmatprep.mubr.msk.f32.mxu0 %vm3206_vm0, %v3205_v1  ;;  %v3279_v2 = vld [vmem:[%s6675_s1] ss:$0 sm:$0xff]  ;;  %v3290_v5 = vld [vmem:[%s6675_s1 + $0x1] ss:$0 sm:$0xff]  ;;  %vm2269_vm3 = vcmask 64512   ;;  %vm2423_vm4 = vcmask 1041408  }
   0xf   : > { %3091 = vmatpush3.msra.mxu0 %v2341_v0  ;;  %3095 = vmatprep.subr.mxu1 %v3205_v1  ;;  %s7559_s10 = smov (!%p323_p3, %s3022_s10), 1  ;;  %vm2419_vm5 = vcmask 15360   ;;  %vm2609_vm6 = vcmask 1043456   ;;  %vm2934_vm7 = vcmask 130048  }
  0x10   : > { %3097 = vmatprep.mubr.msk.f32.mxu1 %vm3206_vm0, %v3205_v1  ;;  %s3138_s13 = smul.u32 432, %s7559_s10  ;;  %s3068_s28 = sshll.u32 %s7559_s10, 8 }
  0x11   : > { %s6563_s10 = scalar_lea.vmem %s6683_s9, %s3068_s28 }
  0x12   : > { %s3274_s16 = scalar_lea.vmem %s6674_s0, %s3138_s13 }
  0x13   : > { %v3282_v3 = vld [vmem:[%s3274_s16] sm:$0xff]  ;;  %v3285_v4 = vld [vmem:[%s3274_s16 + $0x8] sm:$0xff]  ;;  %v3293_v6 = vld [vmem:[%s3274_s16 + $0x10] sm:$0x3] }
  0x14   : > { %6872 = vst [vmem:[#allocation2_spill] sm:$0xff] %v3282_v3  ;;  %6873 = vst [vmem:[#allocation3_spill] sm:$0xff] %v3285_v4  ;;  %v3296_v7 = vld [vmem:[%s3274_s16 + $0x18] sm:$0xff]  ;;  %v3299_v8 = vld [vmem:[%s3274_s16 + $0x20] sm:$0xff]  ;;  %v3312_v12 = vmul.f32 %v3279_v2, %v3282_v3  ;;  %v3316_v13 = vmul.f32 %v3279_v2, %v3285_v4  ;;  %v3320_v14 = vmul.f32 %v3290_v5, %v3282_v3 }
  0x15   : > { %6874 = vst [vmem:[#allocation4_spill] sm:$0xff] %v3293_v6  ;;  %6875 = vst [vmem:[#allocation5_spill] sm:$0xff] %v3296_v7  ;;  %v3302_v9 = vld [vmem:[%s3274_s16 + $0x28] sm:$0x3]  ;;  %v3305_v10 = vld [vmem:[%s3274_s16 + $0x30] sm:$0xff]  ;;  %v3324_v15 = vmul.f32 %v3290_v5, %v3285_v4  ;;  %v3334_v18 = vmul.f32 %v3279_v2, %v3296_v7  ;;  %v3338_v19 = vmul.f32 %v3279_v2, %v3299_v8 }
  0x16   : > { %6876 = vst [vmem:[#allocation6_spill] sm:$0xff] %v3299_v8  ;;  %6877 = vst [vmem:[#allocation7_spill] sm:$0xff] %v3302_v9  ;;  %v3308_v11 = vld [vmem:[%s3274_s16 + $0x38] sm:$0xff]  ;;  %v3327_v16 = vld [vmem:[%s3274_s16 + $0x40] sm:$0x3]  ;;  %v3342_v20 = vmul.f32 %v3290_v5, %v3293_v6  ;;  %v3346_v21 = vmul.f32 %v3290_v5, %v3296_v7  ;;  %v3356_v24 = vmul.f32 %v3279_v2, %v3305_v10 }
  0x17   : > { %6878 = vst [vmem:[#allocation8_spill] sm:$0xff] %v3305_v10  ;;  %6879 = vst [vmem:[#allocation9_spill] sm:$0xff] %v3308_v11  ;;  %v3330_v17 = vld [vmem:[%s3274_s16 + $0x48] sm:$0xff]  ;;  %v3349_v22 = vld [vmem:[%s3274_s16 + $0x50] sm:$0xff]  ;;  %v3360_v25 = vmul.f32 %v3279_v2, %v3308_v11  ;;  %v3364_v26 = vmul.f32 %v3290_v5, %v3299_v8  ;;  %v3368_v27 = vmul.f32 %v3290_v5, %v3302_v9 }
  0x18   : > { %6880 = vst [vmem:[#allocation10_spill] sm:$0xff] %v3327_v16  ;;  %6881 = vst [vmem:[#allocation11_spill] sm:$0xff] %v3330_v17  ;;  %v3352_v23 = vld [vmem:[%s3274_s16 + $0x58] sm:$0x3]  ;;  %v3371_v28 = vld [vmem:[%s3274_s16 + $0x60] sm:$0xff]  ;;  %v3378_v30 = vmul.f32 %v3279_v2, %v3330_v17  ;;  %v3382_v31 = vmul.f32 %v3279_v2, %v3349_v22  ;;  %v3386_v32 = vmul.f32 %v3290_v5, %v3305_v10 }
  0x19   : > { %6882 = vst [vmem:[#allocation12_spill] sm:$0xff] %v3349_v22  ;;  %6883 = vst [vmem:[#allocation13_spill] sm:$0xff] %v3352_v23  ;;  %v3374_v29 = vld [vmem:[%s3274_s16 + $0x68] sm:$0xff]  ;;  %v3390_v33 = vmul.f32 %v3290_v5, %v3308_v11  ;;  %v3393_v34 = vld [vmem:[%s3274_s16 + $0x70] sm:$0x3]  ;;  %v3403_v37 = vmul.f32 %v3279_v2, %v3371_v28  ;;  %v3411_v39 = vmul.f32 %v3290_v5, %v3327_v16 }
  0x1a   : > { %6884 = vst [vmem:[#allocation14_spill] sm:$0xff] %v3371_v28  ;;  %6885 = vst [vmem:[#allocation15_spill] sm:$0xff] %v3374_v29  ;;  %v3396_v35 = vld [vmem:[%s3274_s16 + $0x78] sm:$0xff]  ;;  %v3399_v36 = vld [vmem:[%s3274_s16 + $0x80] sm:$0xff]  ;;  %v3407_v38 = vmul.f32 %v3279_v2, %v3374_v29  ;;  %v3415_v40 = vmul.f32 %v3290_v5, %v3330_v17  ;;  %v3436_v46 = vmul.f32 %v3290_v5, %v3349_v22 }
  0x1b   : > { %6886 = vst [vmem:[#allocation16_spill] sm:$0xff] %v3382_v31  ;;  %6887 = vst [vmem:[#allocation17_spill] sm:$0xff] %v3393_v34  ;;  %v3418_v41 = vld [vmem:[%s3274_s16 + $0x88] sm:$0x3]  ;;  %v3421_v42 = vld [vmem:[%s3274_s16 + $0x90] sm:$0xff]  ;;  %v3428_v44 = vmul.f32 %v3279_v2, %v3396_v35  ;;  %v3432_v45 = vmul.f32 %v3279_v2, %v3399_v36  ;;  %v3440_v47 = vmul.f32 %v3290_v5, %v3352_v23  ;;  %v567_v31 = vrot.slane %v3368_v27, 1 }
  0x1c   : > { %6888 = vst [vmem:[#allocation18_spill] sm:$0xff] %v3396_v35  ;;  %6889 = vst [vmem:[#allocation19_spill] sm:$0xff] %v3399_v36  ;;  %v3424_v43 = vld [vmem:[%s3274_s16 + $0x98] sm:$0xff]  ;;  %v3443_v48 = vld [vmem:[%s3274_s16 + $0xa8] sm:$0xff]  ;;  %v3450_v50 = vmul.f32 %v3279_v2, %v3421_v42  ;;  %v3458_v52 = vmul.f32 %v3290_v5, %v3371_v28  ;;  %v3462_v53 = vmul.f32 %v3290_v5, %v3374_v29  ;;  %v569_v27 = vrot.slane %v3386_v32, 1 }
  0x1d   : > { %6890 = vst [vmem:[#allocation20_spill] sm:$0xff] %v3403_v37  ;;  %6891 = vst [vmem:[#allocation21_spill] sm:$0xff] %v3407_v38  ;;  %v3446_v49 = vld [vmem:[%s3274_s16 + $0xb0] sm:$0xff]  ;;  %v3454_v51 = vmul.f32 %v3279_v2, %v3424_v43  ;;  %v3465_v54 = vld [vmem:[%s3274_s16 + $0xa0] sm:$0x3]  ;;  %v3475_v57 = vmul.f32 %v3279_v2, %v3443_v48  ;;  %v3483_v59 = vmul.f32 %v3290_v5, %v3393_v34  ;;  %v560_v38 = vrot.slane %v3324_v15, 1 }
  0x1e   : > { %6892 = vst [vmem:[#allocation22_spill] sm:$0xff] %v3418_v41  ;;  %6893 = vst [vmem:[#allocation23_spill] sm:$0xff] %v3421_v42  ;;  %v3468_v55 = vld [vmem:[%s3274_s16 + $0xc0] sm:$0xff]  ;;  %v3471_v56 = vld [vmem:[%s3274_s16 + $0xc8] sm:$0xff]  ;;  %v3479_v58 = vmul.f32 %v3279_v2, %v3446_v49  ;;  %v3487_v60 = vmul.f32 %v3290_v5, %v3396_v35  ;;  %v3508_v35 = vmul.f32 %v3290_v5, %v3399_v36  ;;  %v564_v37 = vrot.slane %v3346_v21, 1 }
  0x1f   : > { %6894 = vst [vmem:[#allocation24_spill] sm:$0xff] %v3424_v43  ;;  %6895 = vst [vmem:[#allocation25_spill] sm:$0xff] %v3428_v44  ;;  %v3490_v61 = vld [vmem:[%s3274_s16 + $0xb8] sm:$0x3]  ;;  %v3496_v63 = vld [vmem:[%s3274_s16 + $0xe0] sm:$0xff]  ;;  %v3500_v0 = vmul.f32 %v3279_v2, %v3468_v55  ;;  %v3504_v1 = vmul.f32 %v3279_v2, %v3471_v56  ;;  %v3512_v34 = vmul.f32 %v3290_v5, %v3418_v41  ;;  %v575_v32 = vrot.slane %v3436_v46, 1 }
  0x20   : > { %6896 = vst [vmem:[#allocation26_spill] sm:$0xff] %v3432_v45  ;;  %6897 = vst [vmem:[#allocation27_spill] sm:$0xff] %v3443_v48  ;;  %v3493_v62 = vld [vmem:[%s3274_s16 + $0xd8] sm:$0xff]  ;;  %v3515_v29 = vld [vmem:[%s3274_s16 + $0xf0] sm:$0xff]  ;;  %v3526_v22 = vmul.f32 %v3279_v2, %v3496_v63  ;;  %v3530_v36 = vmul.f32 %v3290_v5, %v3421_v42  ;;  %v3534_v41 = vmul.f32 %v3290_v5, %v3424_v43 }
  0x21   : > { %6898 = vst [vmem:[#allocation28_spill] sm:$0xff] %v3446_v49  ;;  %6899 = vst [vmem:[#allocation29_spill] sm:$0xff] %v3450_v50  ;;  %v3518_v28 = vld [vmem:[%s3274_s16 + $0xf8] sm:$0xff]  ;;  %v3522_v23 = vmul.f32 %v3279_v2, %v3493_v62  ;;  %v3537_v17 = vld [vmem:[%s3274_s16 + $0xd0] sm:$0x3]  ;;  %v3547_v10 = vmul.f32 %v3279_v2, %v3515_v29  ;;  %v3555_v43 = vmul.f32 %v3290_v5, %v3465_v54 }
  0x22   : > { %6900 = vst [vmem:[#allocation30_spill] sm:$0xff] %v3454_v51  ;;  %6901 = vst [vmem:[#allocation31_spill] sm:$0xff] %v3465_v54  ;;  %v3540_v16 = vld [vmem:[%s3274_s16 + $0x108] sm:$0xff]  ;;  %v3543_v11 = vld [vmem:[%s3274_s16 + $0x110] sm:$0xff]  ;;  %v3551_v42 = vmul.f32 %v3279_v2, %v3518_v28  ;;  %v3559_v9 = vmul.f32 %v3290_v5, %v3443_v48  ;;  %v3580_v48 = vmul.f32 %v3290_v5, %v3446_v49 }
  0x23   : > { %6902 = vst [vmem:[#allocation32_spill] sm:$0xff] %v3468_v55  ;;  %6903 = vst [vmem:[#allocation33_spill] sm:$0xff] %v3471_v56  ;;  %v3562_v8 = vld [vmem:[%s3274_s16 + $0xe8] sm:$0x3]  ;;  %v3565_v7 = vld [vmem:[%s3274_s16 + $0x120] sm:$0xff]  ;;  %v3572_v4 = vmul.f32 %v3279_v2, %v3540_v16  ;;  %v3576_v54 = vmul.f32 %v3279_v2, %v3543_v11  ;;  %v3584_v3 = vmul.f32 %v3290_v5, %v3490_v61 }
  0x24   : > { %6904 = vst [vmem:[#allocation34_spill] sm:$0xff] %v3475_v57  ;;  %6905 = vst [vmem:[#allocation35_spill] sm:$0xff] %v3479_v58  ;;  %v3568_v6 = vld [vmem:[%s3274_s16 + $0x128] sm:$0xff]  ;;  %v3637_v58 = vld [vmem:[%s3274_s16 + $0x130] sm:$0x3]  ;;  %v594_v46 = vrot.slane %v3559_v9, 1 }
  0x25   : > { %6906 = vst [vmem:[#allocation36_spill] sm:$0xff] %v3490_v61  ;;  %6907 = vst [vmem:[#allocation37_spill] sm:$0xff] %v3493_v62  ;;  %v3601_v49 = vmul.f32 %v3279_v2, %v3568_v6  ;;  %v3605_v61 = vmul.f32 %v3290_v5, %v3468_v55  ;;  %v3630_v55 = vmul.f32 %v3290_v5, %v3537_v17  ;;  %v3640_v57 = vld [vmem:[%s3274_s16 + $0x168] sm:$0xff]  ;;  %v3643_v51 = vld [vmem:[%s3274_s16 + $0x170] sm:$0xff] }
  0x26   : > { %6908 = vst [vmem:[#allocation38_spill] sm:$0xff] %v3496_v63  ;;  %6909 = vst [vmem:[#allocation39_spill] sm:$0xff] %v3500_v0  ;;  %v3618_v0 = vld [vmem:[%s3274_s16 + $0x158] sm:$0xff]  ;;  %v3663_v50 = vmul.f32 %v3279_v2, %v3640_v57  ;;  %v3678_v45 = vld [vmem:[%s3274_s16 + $0x148] sm:$0x3]  ;;  %v3750_v21 = vmul.f32 %v3290_v5, %v3643_v51 }
  0x27   : > { %6910 = vst [vmem:[#allocation40_spill] sm:$0xff] %v3504_v1  ;;  %6911 = vst [vmem:[#allocation41_spill] sm:$0xff] %v3515_v29  ;;  %v3615_v1 = vld [vmem:[%s3274_s16 + $0x150] sm:$0xff]  ;;  %v602_v9 = vrot.slane %v3630_v55, 1 }
  0x28   : > { %6912 = vst [vmem:[#allocation42_spill] sm:$0xff] %v3518_v28  ;;  %6913 = vst [vmem:[#allocation43_spill] sm:$0xff] %v3522_v23  ;;  %v3612_v23 = vld [vmem:[%s3274_s16 + $0x118] sm:$0x3] }
  0x29   : > { %6914 = vst [vmem:[#allocation44_spill] sm:$0xff] %v3526_v22  ;;  %6915 = vst [vmem:[#allocation45_spill] sm:$0xff] %v3537_v17  ;;  %v3609_v22 = vmul.f32 %v3290_v5, %v3471_v56  ;;  %v3634_v56 = vmul.f32 %v3290_v5, %v3493_v62  ;;  %v3655_v17 = vmul.f32 %v3290_v5, %v3496_v63 }
  0x2a   : > { %6916 = vst [vmem:[#allocation46_spill] sm:$0xff] %v3540_v16  ;;  %6917 = vst [vmem:[#allocation47_spill] sm:$0xff] %v3543_v11  ;;  %v3659_v62 = vmul.f32 %v3290_v5, %v3562_v8  ;;  %v3675_v63 = vmul.f32 %v3290_v5, %v3518_v28  ;;  %v3697_v28 = vld [vmem:[%s3274_s16 + $0x160] sm:$0x3] }
  0x2b   : > { %6918 = vst [vmem:[#allocation48_spill] sm:$0xff] %v3547_v10  ;;  %6919 = vst [vmem:[#allocation49_spill] sm:$0xff] %v3551_v42  ;;  %v3587_v42 = vld [vmem:[%s3274_s16 + $0x100] sm:$0x3]  ;;  %v3590_v10 = vld [vmem:[%s3274_s16 + $0x138] sm:$0xff]  ;;  %v3742_v15 = vmul.f32 %v3290_v5, %v3697_v28  ;;  %v605_v55 = vrot.slane %v3655_v17, 1 }
  0x2c   : > { %6920 = vst [vmem:[#allocation50_spill] sm:$0xff] %v3562_v8  ;;  %6921 = vst [vmem:[#allocation51_spill] sm:$0xff] %v3565_v7  ;;  %v3682_v8 = vmul.f32 %v3290_v5, %v3587_v42 }
  0x2d   : > { %6922 = vst [vmem:[#allocation52_spill] sm:$0xff] %v3568_v6  ;;  %6923 = vst [vmem:[#allocation53_spill] sm:$0xff] %v3572_v4  ;;  %v3593_v4 = vld [vmem:[%s3274_s16 + $0x140] sm:$0xff] }
  0x2e   : > { %6924 = vst [vmem:[#allocation54_spill] sm:$0xff] %v3576_v54  ;;  %6925 = vst [vmem:[#allocation55_spill] sm:$0xff] %v3587_v42  ;;  %v3597_v54 = vmul.f32 %v3279_v2, %v3565_v7  ;;  %v3705_v42 = vmul.f32 %v3290_v5, %v3568_v6  ;;  %v3720_v44 = vmul.f32 %v3290_v5, %v3593_v4  ;;  %v562_v6 = vrot.slane %v3342_v20, 1 }
  0x2f   : > { %6926 = vst [vmem:[#allocation56_spill] sm:$0xff] %v3590_v10  ;;  %6927 = vst [vmem:[#allocation57_spill] sm:$0xff] %v3593_v4  ;;  %v3746_v20 = vmul.f32 %v3290_v5, %v3640_v57 }
  0x30   : > { %6928 = vst [vmem:[#allocation58_spill] sm:$0xff] %v3597_v54  ;;  %6929 = vst [vmem:[#allocation59_spill] sm:$0xff] %v3601_v49  ;;  %v3622_v54 = vmul.f32 %v3279_v2, %v3590_v10  ;;  %v3626_v49 = vmul.f32 %v3279_v2, %v3593_v4  ;;  %v3734_v4 = vmul.f32 %v3290_v5, %v3615_v1  ;;  %v620_v17 = vrot.slane %v3705_v42, 1 }
  0x31   : > { %6930 = vst [vmem:[#allocation60_spill] sm:$0xff] %v3612_v23  ;;  %6931 = vst [vmem:[#allocation61_spill] sm:$0xff] %v3615_v1  ;;  %v634_v42 = vrot.slane %v3746_v20, 1 }
  0x32   : > { %6932 = vst [vmem:[#allocation62_spill] sm:$0xff] %v3618_v0  ;;  %6933 = vst [vmem:[#allocation63_spill] sm:$0xff] %v3622_v54  ;;  %v3647_v54 = vmul.f32 %v3279_v2, %v3615_v1 }
  0x33   : > { %6934 = vst [vmem:[#allocation64_spill] sm:$0xff] %v3626_v49  ;;  %6935 = vst [vmem:[#allocation65_spill] sm:$0xff] %v3637_v58  ;;  %v3651_v49 = vmul.f32 %v3279_v2, %v3618_v0 }
  0x34   : > { %6936 = vst [vmem:[#allocation66_spill] sm:$0xff] %v3640_v57  ;;  %6937 = vst [vmem:[#allocation67_spill] sm:$0xff] %v3643_v51  ;;  %v572_v57 = vrot.slane %v3411_v39, 1  ;;  %v585_v39 = vrot.slane %v3508_v35, 1  ;;  %v599_v35 = vrot.slane %v3605_v61, 1 }
  0x35   : > { %6938 = vst [vmem:[#allocation68_spill] sm:$0xff] %v3647_v54  ;;  %6939 = vst [vmem:[#allocation69_spill] sm:$0xff] %v3651_v49  ;;  %v3667_v54 = vmul.f32 %v3279_v2, %v3643_v51  ;;  %v3671_v49 = vmul.f32 %v3290_v5, %v3515_v29  ;;  %v3690_v2 = vmul.f32 %v3290_v5, %v3543_v11 }
  0x36   : > { %6940 = vst [vmem:[#allocation70_spill] sm:$0xff] %v3663_v50  ;;  %6942 = vst [vmem:[#allocation72_spill] sm:$0xff] %v3678_v45  ;;  %v3686_v50 = vmul.f32 %v3290_v5, %v3540_v16  ;;  %v3694_v29 = vmul.f32 %v3290_v5, %v3612_v23  ;;  %v3709_v16 = vmul.f32 %v3290_v5, %v3637_v58  ;;  %v3716_v23 = vld [vmem:[%s3274_s16 + $0x178] sm:$0x3] }
  0x37   : > { %6941 = vst [vmem:[#allocation71_spill] sm:$0xff] %v3667_v54  ;;  %6943 = vst [vmem:[#allocation73_spill] sm:$0xff] %v3697_v28  ;;  %v3701_v54 = vmul.f32 %v3290_v5, %v3565_v7  ;;  %v3713_v11 = vmul.f32 %v3290_v5, %v3590_v10  ;;  %v559_v7 = vrot.slane %v3320_v14, 1  ;;  %v3727_v58 = vmul.f32 %v3290_v5, %v3678_v45 }
  0x38   : > { %6944 = vst [vmem:[#allocation74_spill] sm:$0xff] %v3716_v23  ;;  %v565_v10 = vrot.slane %v3364_v26, 1  ;;  %v3738_v14 = vmul.f32 %v3290_v5, %v3618_v0  ;;  %v3754_v26 = vmul.f32 %v3290_v5, %v3716_v23  ;;  %v570_v0 = vrot.slane %v3390_v33, 1 }
  0x39   : > { %v3759_v1 = vsel %vm558_vm1, %v559_v7, %v560_v38  ;;  %v3762_v28 = vsel %vm558_vm1, %v560_v38, %v562_v6  ;;  %v574_v45 = vrot.slane %v3415_v40, 1  ;;  %v577_v33 = vrot.slane %v3440_v47, 1 }
  0x3a   : > { %v3767_v51 = vsel %vm558_vm1, %v564_v37, %v565_v10  ;;  %v3770_v5 = vsel %vm558_vm1, %v565_v10, %v567_v31  ;;  %v579_v7 = vrot.slane %v3458_v52, 1  ;;  %v580_v23 = vrot.slane %v3462_v53, 1 }
  0x3b   : > { %v582_v6 = vrot.slane %v3483_v59, 1  ;;  %v584_v38 = vrot.slane %v3487_v60, 1  ;;  %v587_v37 = vrot.slane %v3512_v34, 1  ;;  %v589_v40 = vrot.slane %v3530_v36, 1 }
  0x3c   : > { %v590_v10 = vrot.slane %v3534_v41, 1  ;;  %v592_v31 = vrot.slane %v3555_v43, 1  ;;  %v595_v47 = vrot.slane %v3580_v48, 1  ;;  %v597_v52 = vrot.slane %v3584_v3, 1 }
  0x3d   : > { %v571_v53 = vsel %vm558_vm1, %v569_v27, %v570_v0  ;;  %v573_v59 = vsel %vm558_vm1, %v570_v0, %v572_v57  ;;  %v600_v34 = vrot.slane %v3609_v22, 1  ;;  %v576_v36 = vsel %vm558_vm1, %v574_v45, %v575_v32 }
  0x3e   : > { %v578_v41 = vsel %vm558_vm1, %v575_v32, %v577_v33  ;;  %v581_v43 = vsel %vm558_vm1, %v579_v7, %v580_v23  ;;  %v583_v48 = vsel %vm558_vm1, %v580_v23, %v582_v6  ;;  %v586_v3 = vsel %vm558_vm1, %v584_v38, %v585_v39 }
  0x3f   : > { %v588_v60 = vsel %vm558_vm1, %v585_v39, %v587_v37  ;;  %v591_v57 = vsel %vm558_vm1, %v589_v40, %v590_v10  ;;  %v593_v61 = vsel %vm558_vm1, %v590_v10, %v592_v31  ;;  %v596_v22 = vsel %vm558_vm1, %v594_v46, %v595_v47 }
  0x40   : > { %v598_v45 = vsel %vm558_vm1, %v595_v47, %v597_v52  ;;  %v604_v0 = vrot.slane %v3634_v56, 1  ;;  %v601_v27 = vsel %vm558_vm1, %v599_v35, %v600_v34  ;;  %v607_v23 = vrot.slane %v3659_v62, 1 }
  0x41   : > { %v609_v32 = vrot.slane %v3671_v49, 1  ;;  %v603_v33 = vsel %vm558_vm1, %v600_v34, %v602_v9  ;;  %v610_v7 = vrot.slane %v3675_v63, 1  ;;  %v612_v6 = vrot.slane %v3682_v8, 1 }
  0x42   : > { %v614_v38 = vrot.slane %v3686_v50, 1  ;;  %v615_v39 = vrot.slane %v3690_v2, 1  ;;  %v617_v56 = vrot.slane %v3694_v29, 1  ;;  %v619_v37 = vrot.slane %v3701_v54, 1 }
  0x43   : > { %v622_v62 = vrot.slane %v3709_v16, 1  ;;  %v624_v49 = vrot.slane %v3713_v11, 1  ;;  %v625_v40 = vrot.slane %v3720_v44, 1  ;;  %v627_v63 = vrot.slane %v3727_v58, 1 }
  0x44   : > { %v606_v8 = vsel %vm558_vm1, %v604_v0, %v605_v55  ;;  %v629_v50 = vrot.slane %v3734_v4, 1  ;;  %v630_v2 = vrot.slane %v3738_v14, 1  ;;  %v632_v29 = vrot.slane %v3742_v15, 1 }
  0x45   : > { %v608_v54 = vsel %vm558_vm1, %v605_v55, %v607_v23  ;;  %v635_v16 = vrot.slane %v3750_v21, 1  ;;  %v637_v11 = vrot.slane %v3754_v26, 1  ;;  %v611_v44 = vsel %vm558_vm1, %v609_v32, %v610_v7  ;;  %v6947_v55 = vld [vmem:[#allocation20_spill] sm:$0xff] }
  0x46   : > { %v613_v58 = vsel %vm558_vm1, %v610_v7, %v612_v6  ;;  %v616_v10 = vsel %vm558_vm1, %v614_v38, %v615_v39  ;;  %v618_v4 = vsel %vm558_vm1, %v615_v39, %v617_v56  ;;  %v621_v14 = vsel %vm558_vm1, %v619_v37, %v620_v17 }
  0x47   : > { %v623_v15 = vsel %vm558_vm1, %v620_v17, %v622_v62  ;;  %v626_v31 = vsel %vm558_vm1, %v624_v49, %v625_v40  ;;  %v628_v20 = vsel %vm558_vm1, %v625_v40, %v627_v63  ;;  %v631_v21 = vsel %vm558_vm1, %v629_v50, %v630_v2  ;;  %v6979_v40 = vld [vmem:[#allocation58_spill] sm:$0xff] }
  0x48   : > { %v633_v26 = vsel %vm558_vm1, %v630_v2, %v632_v29  ;;  %v3838_v46 = vadd.f32 %v3759_v1, %v3312_v12  ;;  %v3842_v47 = vadd.f32 %v3762_v28, %v3316_v13  ;;  %v636_v52 = vsel %vm558_vm1, %v634_v42, %v635_v16  ;;  %v6945_v28 = vld [vmem:[#allocation16_spill] sm:$0xff]  ;;  %v6983_v2 = vld [vmem:[#allocation63_spill] sm:$0xff] }
  0x49   : > { %v638_v35 = vsel %vm558_vm1, %v635_v16, %v637_v11  ;;  %v3848_v34 = vadd.f32 %v3767_v51, %v3334_v18  ;;  %v3852_v9 = vadd.f32 %v3770_v5, %v3338_v19  ;;  %v3855_v0 = vadd.f32 %v571_v53, %v3356_v24  ;;  %v6949_v18 = vld [vmem:[#allocation21_spill] sm:$0xff]  ;;  %v6953_v24 = vld [vmem:[#allocation26_spill] sm:$0xff]  ;;  %v6987_v16 = vld [vmem:[#allocation68_spill] sm:$0xff] }
  0x4a   : > { %v3858_v12 = vadd.f32 %v573_v59, %v3360_v25  ;;  %v3861_v13 = vadd.f32 %v576_v36, %v3378_v30  ;;  %v3864_v1 = vadd.f32 %v578_v41, %v6945_v28  ;;  %v3867_v23 = vadd.f32 %v581_v43, %v6947_v55  ;;  %v6951_v19 = vld [vmem:[#allocation25_spill] sm:$0xff]  ;;  %v6957_v30 = vld [vmem:[#allocation30_spill] sm:$0xff]  ;;  %v6961_v43 = vld [vmem:[#allocation35_spill] sm:$0xff] }
  0x4b   : > { %v3870_v51 = vadd.f32 %v583_v48, %v6949_v18  ;;  %v3873_v5 = vadd.f32 %v586_v3, %v6951_v19  ;;  %v3876_v53 = vadd.f32 %v588_v60, %v6953_v24  ;;  %v6955_v25 = vld [vmem:[#allocation29_spill] sm:$0xff]  ;;  %v3882_v36 = vadd.f32 %v593_v61, %v6957_v30  ;;  %v6959_v41 = vld [vmem:[#allocation34_spill] sm:$0xff]  ;;  %v6963_v48 = vld [vmem:[#allocation39_spill] sm:$0xff] }
  0x4c   : > { %6946 = vst [vmem:[#allocation16_spill] sm:$0xff] %v3864_v1  ;;  %6948 = vst [vmem:[#allocation20_spill] sm:$0xff] %v3867_v23  ;;  %v3879_v59 = vadd.f32 %v591_v57, %v6955_v25  ;;  %v3885_v32 = vadd.f32 %v596_v22, %v6959_v41  ;;  %v3888_v7 = vadd.f32 %v598_v45, %v6961_v43  ;;  %v6965_v3 = vld [vmem:[#allocation40_spill] sm:$0xff]  ;;  %v6967_v60 = vld [vmem:[#allocation43_spill] sm:$0xff] }
  0x4d   : > { %6950 = vst [vmem:[#allocation21_spill] sm:$0xff] %v3870_v51  ;;  %6952 = vst [vmem:[#allocation25_spill] sm:$0xff] %v3873_v5  ;;  %v3891_v6 = vadd.f32 %v601_v27, %v6963_v48  ;;  %v3894_v38 = vadd.f32 %v603_v33, %v6965_v3  ;;  %v3897_v39 = vadd.f32 %v606_v8, %v6967_v60  ;;  %v6969_v57 = vld [vmem:[#allocation44_spill] sm:$0xff]  ;;  %v6973_v22 = vld [vmem:[#allocation49_spill] sm:$0xff] }
  0x4e   : > { %6954 = vst [vmem:[#allocation26_spill] sm:$0xff] %v3876_v53  ;;  %6956 = vst [vmem:[#allocation29_spill] sm:$0xff] %v3879_v59  ;;  %v3900_v56 = vadd.f32 %v608_v54, %v6969_v57  ;;  %v6971_v61 = vld [vmem:[#allocation48_spill] sm:$0xff]  ;;  %v3906_v17 = vadd.f32 %v613_v58, %v6973_v22  ;;  %v6975_v45 = vld [vmem:[#allocation53_spill] sm:$0xff]  ;;  %v3920_v63 = vadd.f32 %v621_v14, %v6979_v40 }
  0x4f   : > { %6958 = vst [vmem:[#allocation30_spill] sm:$0xff] %v3882_v36  ;;  %6960 = vst [vmem:[#allocation34_spill] sm:$0xff] %v3885_v32  ;;  %v3903_v37 = vadd.f32 %v611_v44, %v6971_v61  ;;  %v3909_v62 = vadd.f32 %v616_v10, %v6975_v45  ;;  %v6977_v27 = vld [vmem:[#allocation54_spill] sm:$0xff]  ;;  %v6981_v8 = vld [vmem:[#allocation59_spill] sm:$0xff]  ;;  %v3926_v29 = vadd.f32 %v626_v31, %v6983_v2 }
  0x50   : > { %6962 = vst [vmem:[#allocation35_spill] sm:$0xff] %v3888_v7  ;;  %6964 = vst [vmem:[#allocation39_spill] sm:$0xff] %v3891_v6  ;;  %v3912_v49 = vadd.f32 %v618_v4, %v6977_v27  ;;  %v3917_v33 = vld [vmem:[%s6675_s1 + $0x2] ss:$0 sm:$0xff]  ;;  %v3923_v50 = vadd.f32 %v623_v15, %v6981_v8  ;;  %v6985_v54 = vld [vmem:[#allocation64_spill] sm:$0xff]  ;;  %v3932_v11 = vadd.f32 %v631_v21, %v6987_v16 }
  0x51   : > { %6966 = vst [vmem:[#allocation40_spill] sm:$0xff] %v3894_v38  ;;  %6968 = vst [vmem:[#allocation43_spill] sm:$0xff] %v3897_v39  ;;  %v3929_v42 = vadd.f32 %v628_v20, %v6985_v54  ;;  %v6989_v44 = vld [vmem:[#allocation69_spill] sm:$0xff]  ;;  %v6991_v10 = vld [vmem:[#allocation70_spill] sm:$0xff] }
  0x52   : > { %6970 = vst [vmem:[#allocation44_spill] sm:$0xff] %v3900_v56  ;;  %6972 = vst [vmem:[#allocation48_spill] sm:$0xff] %v3903_v37  ;;  %v3935_v58 = vadd.f32 %v633_v26, %v6989_v44  ;;  %v3938_v4 = vadd.f32 %v636_v52, %v6991_v10  ;;  %v6993_v14 = vld [vmem:[#allocation71_spill] sm:$0xff]  ;;  %v6995_v15 = vld [vmem:[#allocation2_spill] sm:$0xff] }
  0x53   : > { %6974 = vst [vmem:[#allocation49_spill] sm:$0xff] %v3906_v17  ;;  %6976 = vst [vmem:[#allocation53_spill] sm:$0xff] %v3909_v62  ;;  %v3941_v28 = vadd.f32 %v638_v35, %v6993_v14  ;;  %v708_v55 = vmul.f32 %v3917_v33, %v6995_v15  ;;  %v6996_v31 = vld [vmem:[#allocation3_spill] sm:$0xff]  ;;  %v6997_v20 = vld [vmem:[#allocation4_spill] sm:$0xff] }
  0x54   : > { %6978 = vst [vmem:[#allocation54_spill] sm:$0xff] %v3912_v49  ;;  %6980 = vst [vmem:[#allocation58_spill] sm:$0xff] %v3920_v63  ;;  %v709_v18 = vmul.f32 %v3917_v33, %v6996_v31  ;;  %v710_v19 = vmul.f32 %v3917_v33, %v6997_v20  ;;  %v6998_v21 = vld [vmem:[#allocation5_spill] sm:$0xff]  ;;  %v6999_v26 = vld [vmem:[#allocation6_spill] sm:$0xff] }
  0x55   : > { %6982 = vst [vmem:[#allocation59_spill] sm:$0xff] %v3923_v50  ;;  %6984 = vst [vmem:[#allocation63_spill] sm:$0xff] %v3926_v29  ;;  %v711_v24 = vmul.f32 %v3917_v33, %v6998_v21  ;;  %v712_v25 = vmul.f32 %v3917_v33, %v6999_v26  ;;  %v7000_v52 = vld [vmem:[#allocation7_spill] sm:$0xff]  ;;  %v7001_v35 = vld [vmem:[#allocation8_spill] sm:$0xff]  ;;  %v805_v6 = vrot.slane %v708_v55, 2 }
  0x56   : > { %6986 = vst [vmem:[#allocation64_spill] sm:$0xff] %v3929_v42  ;;  %6988 = vst [vmem:[#allocation68_spill] sm:$0xff] %v3932_v11  ;;  %v713_v30 = vmul.f32 %v3917_v33, %v7000_v52  ;;  %v3957_v41 = vmul.f32 %v3917_v33, %v7001_v35  ;;  %v7002_v43 = vld [vmem:[#allocation9_spill] sm:$0xff]  ;;  %v7003_v3 = vld [vmem:[#allocation10_spill] sm:$0xff]  ;;  %v806_v7 = vrot.slane %v709_v18, 2 }
  0x57   : > { %6990 = vst [vmem:[#allocation69_spill] sm:$0xff] %v3935_v58  ;;  %6992 = vst [vmem:[#allocation70_spill] sm:$0xff] %v3938_v4  ;;  %v3961_v48 = vmul.f32 %v3917_v33, %v7002_v43  ;;  %v3965_v60 = vmul.f32 %v3917_v33, %v7003_v3  ;;  %v7004_v57 = vld [vmem:[#allocation11_spill] sm:$0xff]  ;;  %v7005_v22 = vld [vmem:[#allocation12_spill] sm:$0xff]  ;;  %v811_v59 = vrot.slane %v712_v25, 2 }
  0x58   : > { %6994 = vst [vmem:[#allocation71_spill] sm:$0xff] %v3941_v28  ;;  %v3969_v61 = vmul.f32 %v3917_v33, %v7004_v57  ;;  %v3973_v45 = vmul.f32 %v3917_v33, %v7005_v22  ;;  %v7006_v27 = vld [vmem:[#allocation13_spill] sm:$0xff]  ;;  %v7007_v8 = vld [vmem:[#allocation14_spill] sm:$0xff]  ;;  %v7008_v54 = vld [vmem:[#allocation15_spill] sm:$0xff]  ;;  %v813_v53 = vrot.slane %v713_v30, 2  ;;  %v4126_v23 = vsel %vm804_vm2, %v805_v6, %v806_v7 }
  0x59   : > { %v3977_v40 = vmul.f32 %v3917_v33, %v7006_v27  ;;  %v3981_v2 = vmul.f32 %v3917_v33, %v7007_v8  ;;  %v3985_v16 = vmul.f32 %v3917_v33, %v7008_v54  ;;  %v7009_v44 = vld [vmem:[#allocation17_spill] sm:$0xff]  ;;  %v7010_v14 = vld [vmem:[#allocation18_spill] sm:$0xff]  ;;  %v7011_v31 = vld [vmem:[#allocation19_spill] sm:$0xff] }
  0x5a   : > { %v3989_v10 = vmul.f32 %v3917_v33, %v7009_v44  ;;  %v3993_v15 = vmul.f32 %v3917_v33, %v7010_v14  ;;  %v3997_v20 = vmul.f32 %v3917_v33, %v7011_v31  ;;  %v7012_v27 = vld [vmem:[#allocation22_spill] sm:$0xff]  ;;  %v7013_v52 = vld [vmem:[#allocation23_spill] sm:$0xff]  ;;  %v7014_v8 = vld [vmem:[#allocation24_spill] sm:$0xff]  ;;  %v820_v1 = vrot.slane %v3969_v61, 2 }
  0x5b   : > { %v4001_v3 = vmul.f32 %v3917_v33, %v7012_v27  ;;  %v4005_v54 = vmul.f32 %v3917_v33, %v7013_v52  ;;  %v4009_v44 = vmul.f32 %v3917_v33, %v7014_v8  ;;  %v7015_v22 = vld [vmem:[#allocation31_spill] sm:$0xff]  ;;  %v7017_v43 = vld [vmem:[#allocation28_spill] sm:$0xff]  ;;  %v7020_v21 = vld [vmem:[#allocation33_spill] sm:$0xff]  ;;  %v825_v6 = vrot.slane %v3981_v2, 2 }
  0x5c   : > { %v4013_v14 = vmul.f32 %v3917_v33, %v7015_v22  ;;  %v7016_v57 = vld [vmem:[#allocation27_spill] sm:$0xff]  ;;  %v4021_v27 = vmul.f32 %v3917_v33, %v7017_v43  ;;  %v7018_v35 = vld [vmem:[#allocation36_spill] sm:$0xff]  ;;  %v4033_v22 = vmul.f32 %v3917_v33, %v7020_v21  ;;  %v7021_v28 = vld [vmem:[#allocation45_spill] sm:$0xff] }
  0x5d   : > { %v4017_v31 = vmul.f32 %v3917_v33, %v7016_v57  ;;  %v4025_v52 = vmul.f32 %v3917_v33, %v7018_v35  ;;  %v7019_v26 = vld [vmem:[#allocation32_spill] sm:$0xff]  ;;  %v4037_v57 = vmul.f32 %v3917_v33, %v7021_v28  ;;  %v7022_v4 = vld [vmem:[#allocation37_spill] sm:$0xff]  ;;  %v7023_v58 = vld [vmem:[#allocation38_spill] sm:$0xff]  ;;  %v835_v61 = vrot.slane %v4005_v54, 2 }
  0x5e   : > { %v4029_v8 = vmul.f32 %v3917_v33, %v7019_v26  ;;  %v4041_v43 = vmul.f32 %v3917_v33, %v7022_v4  ;;  %v4045_v35 = vmul.f32 %v3917_v33, %v7023_v58  ;;  %v7024_v11 = vld [vmem:[#allocation50_spill] sm:$0xff]  ;;  %v7025_v42 = vld [vmem:[#allocation41_spill] sm:$0xff]  ;;  %v7027_v50 = vld [vmem:[#allocation55_spill] sm:$0xff] }
  0x5f   : > { %v4049_v26 = vmul.f32 %v3917_v33, %v7024_v11  ;;  %v4053_v21 = vmul.f32 %v3917_v33, %v7025_v42  ;;  %v7026_v29 = vld [vmem:[#allocation42_spill] sm:$0xff]  ;;  %v4061_v4 = vmul.f32 %v3917_v33, %v7027_v50  ;;  %v7029_v49 = vld [vmem:[#allocation47_spill] sm:$0xff]  ;;  %v7030_v62 = vld [vmem:[#allocation60_spill] sm:$0xff]  ;;  %v843_v2 = vrot.slane %v4025_v52, 2 }
  0x60   : > { %v4057_v28 = vmul.f32 %v3917_v33, %v7026_v29  ;;  %v7028_v63 = vld [vmem:[#allocation46_spill] sm:$0xff]  ;;  %v4069_v11 = vmul.f32 %v3917_v33, %v7029_v49  ;;  %v4073_v42 = vmul.f32 %v3917_v33, %v7030_v62  ;;  %v7031_v17 = vld [vmem:[#allocation51_spill] sm:$0xff]  ;;  %v7032_v37 = vld [vmem:[#allocation52_spill] sm:$0xff] }
  0x61   : > { %v4065_v58 = vmul.f32 %v3917_v33, %v7028_v63  ;;  %v4077_v29 = vmul.f32 %v3917_v33, %v7031_v17  ;;  %v4081_v50 = vmul.f32 %v3917_v33, %v7032_v37  ;;  %v7033_v56 = vld [vmem:[#allocation65_spill] sm:$0xff]  ;;  %v7034_v39 = vld [vmem:[#allocation56_spill] sm:$0xff]  ;;  %v808_v17 = vrot.slane %v710_v19, 2  ;;  %v7040_v18 = vld [vmem:[#allocation66_spill] sm:$0xff] }
  0x62   : > { %v4085_v63 = vmul.f32 %v3917_v33, %v7033_v56  ;;  %v4089_v49 = vmul.f32 %v3917_v33, %v7034_v39  ;;  %v7035_v38 = vld [vmem:[#allocation57_spill] sm:$0xff]  ;;  %v7036_v32 = vld [vmem:[#allocation72_spill] sm:$0xff]  ;;  %v810_v37 = vrot.slane %v711_v24, 2  ;;  %v7038_v39 = vld [vmem:[#allocation62_spill] sm:$0xff]  ;;  %v4113_v19 = vmul.f32 %v3917_v33, %v7040_v18 }
  0x63   : > { %v4093_v62 = vmul.f32 %v3917_v33, %v7035_v38  ;;  %v4097_v36 = vmul.f32 %v3917_v33, %v7036_v32  ;;  %v7037_v56 = vld [vmem:[#allocation61_spill] sm:$0xff]  ;;  %v4105_v51 = vmul.f32 %v3917_v33, %v7038_v39  ;;  %v7041_v32 = vld [vmem:[#allocation67_spill] sm:$0xff]  ;;  %v7042_v25 = vld [vmem:[#allocation74_spill] sm:$0xff]  ;;  %v816_v39 = vrot.slane %v3961_v48, 2 }
  0x64   : > { %v4101_v5 = vmul.f32 %v3917_v33, %v7037_v56  ;;  %v7039_v38 = vld [vmem:[#allocation73_spill] sm:$0xff]  ;;  %v4117_v24 = vmul.f32 %v3917_v33, %v7041_v32  ;;  %v4121_v30 = vmul.f32 %v3917_v33, %v7042_v25  ;;  %v815_v56 = vrot.slane %v3957_v41, 2 }
  0x65   : > { %v4109_v55 = vmul.f32 %v3917_v33, %v7039_v38  ;;  %v4129_v38 = vsel %vm804_vm2, %v806_v7, %v808_v17  ;;  %v818_v18 = vrot.slane %v3965_v60, 2  ;;  %v4134_v32 = vsel %vm804_vm2, %v810_v37, %v811_v59 }
  0x66   : > { %v4137_v33 = vsel %vm804_vm2, %v811_v59, %v813_v53  ;;  %v821_v41 = vrot.slane %v3973_v45, 2  ;;  %v823_v48 = vrot.slane %v3977_v40, 2  ;;  %v826_v25 = vrot.slane %v3985_v16, 2 }
  0x67   : > { %v828_v7 = vrot.slane %v3989_v10, 2  ;;  %v830_v17 = vrot.slane %v3993_v15, 2  ;;  %v831_v60 = vrot.slane %v3997_v20, 2  ;;  %v833_v37 = vrot.slane %v4001_v3, 2 }
  0x68   : > { %v836_v53 = vrot.slane %v4009_v44, 2  ;;  %v838_v59 = vrot.slane %v4013_v14, 2  ;;  %v840_v45 = vrot.slane %v4017_v31, 2  ;;  %v841_v40 = vrot.slane %v4021_v27, 2 }
  0x69   : > { %v817_v16 = vsel %vm804_vm2, %v815_v56, %v816_v39  ;;  %v819_v10 = vsel %vm804_vm2, %v816_v39, %v818_v18  ;;  %v845_v15 = vrot.slane %v4029_v8, 2  ;;  %v846_v3 = vrot.slane %v4033_v22, 2 }
  0x6a   : > { %v822_v54 = vsel %vm804_vm2, %v820_v1, %v821_v41  ;;  %v824_v44 = vsel %vm804_vm2, %v821_v41, %v823_v48  ;;  %v827_v14 = vsel %vm804_vm2, %v825_v6, %v826_v25  ;;  %v848_v31 = vrot.slane %v4037_v57, 2 }
  0x6b   : > { %v829_v27 = vsel %vm804_vm2, %v826_v25, %v828_v7  ;;  %v832_v52 = vsel %vm804_vm2, %v830_v17, %v831_v60  ;;  %v834_v56 = vsel %vm804_vm2, %v831_v60, %v833_v37  ;;  %v837_v39 = vsel %vm804_vm2, %v835_v61, %v836_v53 }
  0x6c   : > { %v839_v8 = vsel %vm804_vm2, %v836_v53, %v838_v59  ;;  %v842_v22 = vsel %vm804_vm2, %v840_v45, %v841_v40  ;;  %v844_v1 = vsel %vm804_vm2, %v841_v40, %v843_v2  ;;  %v850_v20 = vrot.slane %v4041_v43, 2 }
  0x6d   : > { %v847_v18 = vsel %vm804_vm2, %v845_v15, %v846_v3  ;;  %v851_v57 = vrot.slane %v4045_v35, 2  ;;  %v853_v25 = vrot.slane %v4049_v26, 2  ;;  %v855_v41 = vrot.slane %v4053_v21, 2 }
  0x6e   : > { %v849_v48 = vsel %vm804_vm2, %v846_v3, %v848_v31  ;;  %v856_v6 = vrot.slane %v4057_v28, 2  ;;  %v858_v7 = vrot.slane %v4061_v4, 2  ;;  %v860_v17 = vrot.slane %v4065_v58, 2 }
  0x6f   : > { %v861_v60 = vrot.slane %v4069_v11, 2  ;;  %v863_v43 = vrot.slane %v4073_v42, 2  ;;  %v865_v37 = vrot.slane %v4077_v29, 2  ;;  %v866_v35 = vrot.slane %v4081_v50, 2 }
  0x70   : > { %v868_v26 = vrot.slane %v4085_v63, 2  ;;  %v870_v21 = vrot.slane %v4089_v49, 2  ;;  %v871_v61 = vrot.slane %v4093_v62, 2  ;;  %v873_v28 = vrot.slane %v4097_v36, 2 }
  0x71   : > { %v852_v4 = vsel %vm804_vm2, %v850_v20, %v851_v57  ;;  %v875_v58 = vrot.slane %v4101_v5, 2  ;;  %v876_v11 = vrot.slane %v4105_v51, 2  ;;  %v878_v42 = vrot.slane %v4109_v55, 2 }
  0x72   : > { %v854_v29 = vsel %vm804_vm2, %v851_v57, %v853_v25  ;;  %v880_v50 = vrot.slane %v4113_v19, 2  ;;  %v881_v63 = vrot.slane %v4117_v24, 2  ;;  %v883_v49 = vrot.slane %v4121_v30, 2  ;;  %v7044_v57 = vld [vmem:[#allocation20_spill] sm:$0xff] }
  0x73   : > { %v857_v62 = vsel %vm804_vm2, %v855_v41, %v856_v6  ;;  %v859_v36 = vsel %vm804_vm2, %v856_v6, %v858_v7  ;;  %v862_v53 = vsel %vm804_vm2, %v860_v17, %v861_v60  ;;  %v864_v5 = vsel %vm804_vm2, %v861_v60, %v863_v43 }
  0x74   : > { %v867_v51 = vsel %vm804_vm2, %v865_v37, %v866_v35  ;;  %v869_v55 = vsel %vm804_vm2, %v866_v35, %v868_v26  ;;  %v872_v59 = vsel %vm804_vm2, %v870_v21, %v871_v61  ;;  %v874_v19 = vsel %vm804_vm2, %v871_v61, %v873_v28  ;;  %v7063_v61 = vld [vmem:[#allocation58_spill] sm:$0xff] }
  0x75   : > { %v877_v24 = vsel %vm804_vm2, %v875_v58, %v876_v11  ;;  %v879_v30 = vsel %vm804_vm2, %v876_v11, %v878_v42  ;;  %v4205_v45 = vadd.f32 %v4126_v23, %v3838_v46  ;;  %v4209_v40 = vadd.f32 %v4129_v38, %v3842_v47  ;;  %v7043_v23 = vld [vmem:[#allocation16_spill] sm:$0xff]  ;;  %v7067_v11 = vld [vmem:[#allocation63_spill] sm:$0xff] }
  0x76   : > { %v882_v2 = vsel %vm804_vm2, %v880_v50, %v881_v63  ;;  %v884_v15 = vsel %vm804_vm2, %v881_v63, %v883_v49  ;;  %v4215_v3 = vadd.f32 %v4134_v32, %v3848_v34  ;;  %v4219_v31 = vadd.f32 %v4137_v33, %v3852_v9  ;;  %v7045_v34 = vld [vmem:[#allocation21_spill] sm:$0xff]  ;;  %v7071_v63 = vld [vmem:[#allocation68_spill] sm:$0xff] }
  0x77   : > { %v4222_v20 = vadd.f32 %v817_v16, %v3855_v0  ;;  %v4225_v46 = vadd.f32 %v819_v10, %v3858_v12  ;;  %v4228_v47 = vadd.f32 %v822_v54, %v3861_v13  ;;  %v4231_v38 = vadd.f32 %v824_v44, %v7043_v23  ;;  %v7046_v9 = vld [vmem:[#allocation25_spill] sm:$0xff]  ;;  %v7047_v0 = vld [vmem:[#allocation26_spill] sm:$0xff] }
  0x78   : > { %v4234_v25 = vadd.f32 %v827_v14, %v7044_v57  ;;  %v4237_v32 = vadd.f32 %v829_v27, %v7045_v34  ;;  %v4240_v33 = vadd.f32 %v832_v52, %v7046_v9  ;;  %v4243_v16 = vadd.f32 %v834_v56, %v7047_v0  ;;  %v7048_v12 = vld [vmem:[#allocation29_spill] sm:$0xff]  ;;  %v7049_v13 = vld [vmem:[#allocation30_spill] sm:$0xff]  ;;  %v7051_v14 = vld [vmem:[#allocation35_spill] sm:$0xff] }
  0x79   : > { %v4246_v10 = vadd.f32 %v837_v39, %v7048_v12  ;;  %v4249_v54 = vadd.f32 %v839_v8, %v7049_v13  ;;  %v7050_v44 = vld [vmem:[#allocation34_spill] sm:$0xff]  ;;  %v4255_v6 = vadd.f32 %v844_v1, %v7051_v14  ;;  %v7052_v27 = vld [vmem:[#allocation39_spill] sm:$0xff]  ;;  %v7053_v52 = vld [vmem:[#allocation40_spill] sm:$0xff]  ;;  %v4285_v28 = vadd.f32 %v867_v51, %v7063_v61 }
  0x7a   : > { %v4252_v41 = vadd.f32 %v842_v22, %v7050_v44  ;;  %v4258_v7 = vadd.f32 %v847_v18, %v7052_v27  ;;  %v4261_v17 = vadd.f32 %v849_v48, %v7053_v52  ;;  %v7054_v56 = vld [vmem:[#allocation43_spill] sm:$0xff]  ;;  %v7055_v39 = vld [vmem:[#allocation44_spill] sm:$0xff]  ;;  %v7057_v22 = vld [vmem:[#allocation49_spill] sm:$0xff]  ;;  %v4291_v42 = vadd.f32 %v872_v59, %v7067_v11 }
  0x7b   : > { %v4264_v60 = vadd.f32 %v852_v4, %v7054_v56  ;;  %v4267_v43 = vadd.f32 %v854_v29, %v7055_v39  ;;  %v7056_v8 = vld [vmem:[#allocation48_spill] sm:$0xff]  ;;  %v4273_v35 = vadd.f32 %v859_v36, %v7057_v22  ;;  %v7059_v1 = vld [vmem:[#allocation53_spill] sm:$0xff]  ;;  %v7061_v18 = vld [vmem:[#allocation54_spill] sm:$0xff]  ;;  %7064 = vst [vmem:[#allocation16_spill] sm:$0xff] %v4285_v28  ;;  %v4297_v49 = vadd.f32 %v877_v24, %v7071_v63 }
  0x7c   : > { %v4270_v37 = vadd.f32 %v857_v62, %v7056_v8  ;;  %v4276_v26 = vadd.f32 %v862_v53, %v7059_v1  ;;  %v4279_v21 = vadd.f32 %v864_v5, %v7061_v18  ;;  %v3034_v48 = vld [vmem:[%s6675_s1 + $0x4] ss:$0 sm:$0xff]  ;;  %v7065_v4 = vld [vmem:[#allocation59_spill] sm:$0xff]  ;;  %7068 = vst [vmem:[#allocation21_spill] sm:$0xff] %v4291_v42  ;;  %v7069_v29 = vld [vmem:[#allocation64_spill] sm:$0xff] }
  0x7d   : > { %7058 = vst [vmem:[#allocation2_spill] sm:$0xff] %v4273_v35  ;;  %v4288_v58 = vadd.f32 %v869_v55, %v7065_v4  ;;  %v4294_v50 = vadd.f32 %v874_v19, %v7069_v29  ;;  %7072 = vst [vmem:[#allocation26_spill] sm:$0xff] %v4297_v49  ;;  %v7073_v62 = vld [vmem:[#allocation69_spill] sm:$0xff]  ;;  %v7075_v53 = vld [vmem:[#allocation70_spill] sm:$0xff] }
  0x7e   : > { %7060 = vst [vmem:[#allocation3_spill] sm:$0xff] %v4276_v26  ;;  %7062 = vst [vmem:[#allocation4_spill] sm:$0xff] %v4279_v21  ;;  %v4300_v36 = vadd.f32 %v879_v30, %v7073_v62  ;;  %v4303_v5 = vadd.f32 %v882_v2, %v7075_v53  ;;  %v7077_v51 = vld [vmem:[#allocation71_spill] sm:$0xff]  ;;  %v7079_v55 = vld [vmem:[#allocation5_spill] sm:$0xff] }
  0x7f   : > { %7066 = vst [vmem:[#allocation20_spill] sm:$0xff] %v4288_v58  ;;  %7070 = vst [vmem:[#allocation25_spill] sm:$0xff] %v4294_v50  ;;  %v4306_v23 = vadd.f32 %v884_v15, %v7077_v51  ;;  %v955_v57 = vmul.f32 %v3034_v48, %v7079_v55  ;;  %v7080_v34 = vld [vmem:[#allocation6_spill] sm:$0xff]  ;;  %v7081_v9 = vld [vmem:[#allocation8_spill] sm:$0xff] }
  0x80   : > { %7074 = vst [vmem:[#allocation29_spill] sm:$0xff] %v4300_v36  ;;  %7076 = vst [vmem:[#allocation30_spill] sm:$0xff] %v4303_v5  ;;  %v956_v59 = vmul.f32 %v3034_v48, %v7080_v34  ;;  %v957_v19 = vmul.f32 %v3034_v48, %v7081_v9  ;;  %v7082_v0 = vld [vmem:[#allocation9_spill] sm:$0xff]  ;;  %v7083_v24 = vld [vmem:[#allocation11_spill] sm:$0xff] }
  0x81   : > { %7078 = vst [vmem:[#allocation34_spill] sm:$0xff] %v4306_v23  ;;  %v958_v12 = vmul.f32 %v3034_v48, %v7082_v0  ;;  %v959_v13 = vmul.f32 %v3034_v48, %v7083_v24  ;;  %v7084_v44 = vld [vmem:[#allocation12_spill] sm:$0xff]  ;;  %v7085_v14 = vld [vmem:[#allocation14_spill] sm:$0xff]  ;;  %v7086_v2 = vld [vmem:[#allocation15_spill] sm:$0xff] }
  0x82   : > { %v960_v30 = vmul.f32 %v3034_v48, %v7084_v44  ;;  %v961_v27 = vmul.f32 %v3034_v48, %v7085_v14  ;;  %v962_v52 = vmul.f32 %v3034_v48, %v7086_v2  ;;  %v7087_v56 = vld [vmem:[#allocation18_spill] sm:$0xff]  ;;  %v7088_v39 = vld [vmem:[#allocation19_spill] sm:$0xff]  ;;  %v7090_v18 = vld [vmem:[#allocation24_spill] sm:$0xff]  ;;  %v4350_v35 = vadd.f32 %v956_v59, %v4209_v40 }
  0x83   : > { %v963_v15 = vmul.f32 %v3034_v48, %v7087_v56  ;;  %v964_v8 = vmul.f32 %v3034_v48, %v7088_v39  ;;  %v7089_v22 = vld [vmem:[#allocation23_spill] sm:$0xff]  ;;  %v966_v61 = vmul.f32 %v3034_v48, %v7090_v18  ;;  %v7092_v29 = vld [vmem:[#allocation28_spill] sm:$0xff]  ;;  %v7094_v51 = vld [vmem:[#allocation33_spill] sm:$0xff] }
  0x84   : > { %v965_v1 = vmul.f32 %v3034_v48, %v7089_v22  ;;  %v7091_v4 = vld [vmem:[#allocation27_spill] sm:$0xff]  ;;  %v968_v63 = vmul.f32 %v3034_v48, %v7092_v29  ;;  %v7093_v62 = vld [vmem:[#allocation32_spill] sm:$0xff]  ;;  %v970_v44 = vmul.f32 %v3034_v48, %v7094_v51  ;;  %v4325_v14 = vld [vmem:[%s3274_s16 + $0x180] sm:$0xff] }
  0x85   : > { %v967_v11 = vmul.f32 %v3034_v48, %v7091_v4  ;;  %v969_v53 = vmul.f32 %v3034_v48, %v7093_v62  ;;  %7095 = vst [vmem:[#allocation35_spill] sm:$0xff] %v4325_v14  ;;  %v7096_v2 = vld [vmem:[#allocation37_spill] sm:$0xff]  ;;  %v7097_v56 = vld [vmem:[#allocation38_spill] sm:$0xff]  ;;  %v7101_v23 = vld [vmem:[#allocation47_spill] sm:$0xff]  ;;  %v4371_v40 = vadd.f32 %v963_v15, %v4234_v25 }
  0x86   : > { %v971_v24 = vmul.f32 %v3034_v48, %v7096_v2  ;;  %v972_v0 = vmul.f32 %v3034_v48, %v7097_v56  ;;  %v7098_v39 = vld [vmem:[#allocation41_spill] sm:$0xff]  ;;  %v7099_v34 = vld [vmem:[#allocation42_spill] sm:$0xff]  ;;  %v976_v4 = vmul.f32 %v3034_v48, %v7101_v23  ;;  %v7102_v5 = vld [vmem:[#allocation51_spill] sm:$0xff]  ;;  %v985_v23 = vmul.f32 %v3034_v48, %v4325_v14 }
  0x87   : > { %v973_v9 = vmul.f32 %v3034_v48, %v7098_v39  ;;  %v974_v22 = vmul.f32 %v3034_v48, %v7099_v34  ;;  %v7100_v55 = vld [vmem:[#allocation46_spill] sm:$0xff]  ;;  %v977_v29 = vmul.f32 %v3034_v48, %v7102_v5  ;;  %v7103_v36 = vld [vmem:[#allocation52_spill] sm:$0xff]  ;;  %v4336_v49 = vld [vmem:[%s3274_s16 + $0x188] sm:$0xff]  ;;  %7113 = vst [vmem:[#allocation44_spill] sm:$0xff] %v4371_v40  ;;  %v4392_v25 = vadd.f32 %v970_v44, %v4255_v6 }
  0x88   : > { %v975_v18 = vmul.f32 %v3034_v48, %v7100_v55  ;;  %v978_v62 = vmul.f32 %v3034_v48, %v7103_v36  ;;  %7104 = vst [vmem:[#allocation39_spill] sm:$0xff] %v4336_v49  ;;  %v7105_v51 = vld [vmem:[#allocation56_spill] sm:$0xff]  ;;  %v7106_v42 = vld [vmem:[#allocation57_spill] sm:$0xff]  ;;  %v7108_v28 = vld [vmem:[#allocation62_spill] sm:$0xff]  ;;  %v986_v5 = vmul.f32 %v3034_v48, %v4336_v49  ;;  %v4347_v36 = vadd.f32 %v955_v57, %v4205_v45 }
  0x89   : > { %v979_v50 = vmul.f32 %v3034_v48, %v7105_v51  ;;  %v980_v2 = vmul.f32 %v3034_v48, %v7106_v42  ;;  %v7107_v58 = vld [vmem:[#allocation61_spill] sm:$0xff]  ;;  %v982_v39 = vmul.f32 %v3034_v48, %v7108_v28  ;;  %v7109_v21 = vld [vmem:[#allocation66_spill] sm:$0xff]  ;;  %v7110_v26 = vld [vmem:[#allocation67_spill] sm:$0xff]  ;;  %v4353_v42 = vadd.f32 %v957_v19, %v4215_v3  ;;  %7120 = vst [vmem:[#allocation63_spill] sm:$0xff] %v4392_v25 }
  0x8a   : > { %v981_v56 = vmul.f32 %v3034_v48, %v7107_v58  ;;  %v983_v34 = vmul.f32 %v3034_v48, %v7109_v21  ;;  %v984_v55 = vmul.f32 %v3034_v48, %v7110_v26  ;;  %v4356_v58 = vadd.f32 %v958_v12, %v4219_v31  ;;  %v7128_v6 = vld [vmem:[#allocation3_spill] sm:$0xff]  ;;  %v7140_v44 = vld [vmem:[#allocation26_spill] sm:$0xff]  ;;  %v7186_v25 = vld [vmem:[#allocation61_spill] sm:$0xff] }
  0x8b   : > { %v4359_v21 = vadd.f32 %v959_v13, %v4222_v20  ;;  %v4362_v26 = vadd.f32 %v960_v30, %v4225_v46  ;;  %v4365_v48 = vadd.f32 %v961_v27, %v4228_v47  ;;  %v4368_v45 = vadd.f32 %v962_v52, %v4231_v38  ;;  %v7142_v27 = vld [vmem:[#allocation29_spill] sm:$0xff]  ;;  %v7144_v15 = vld [vmem:[#allocation30_spill] sm:$0xff] }
  0x8c   : > { %v4374_v3 = vadd.f32 %v964_v8, %v4237_v32  ;;  %v4377_v31 = vadd.f32 %v965_v1, %v4240_v33  ;;  %v4380_v20 = vadd.f32 %v966_v61, %v4243_v16  ;;  %v4383_v46 = vadd.f32 %v967_v11, %v4246_v10  ;;  %v7189_v40 = vld [vmem:[#allocation66_spill] sm:$0xff] }
  0x8d   : > { %7111 = vst [vmem:[#allocation40_spill] sm:$0xff] %v4365_v48  ;;  %7112 = vst [vmem:[#allocation43_spill] sm:$0xff] %v4368_v45  ;;  %v4386_v47 = vadd.f32 %v968_v63, %v4249_v54  ;;  %v4389_v38 = vadd.f32 %v969_v53, %v4252_v41  ;;  %v4395_v32 = vadd.f32 %v971_v24, %v4258_v7  ;;  %v7126_v41 = vld [vmem:[#allocation2_spill] sm:$0xff]  ;;  %v7130_v7 = vld [vmem:[#allocation4_spill] sm:$0xff] }
  0x8e   : > { %7114 = vst [vmem:[#allocation48_spill] sm:$0xff] %v4374_v3  ;;  %7115 = vst [vmem:[#allocation49_spill] sm:$0xff] %v4377_v31  ;;  %v4398_v33 = vadd.f32 %v972_v0, %v4261_v17  ;;  %v4401_v16 = vadd.f32 %v973_v9, %v4264_v60  ;;  %v4404_v10 = vadd.f32 %v974_v22, %v4267_v43  ;;  %v4421_v17 = vld [vmem:[%s6675_s1 + $0x5] ss:$0 sm:$0xff]  ;;  %v7132_v60 = vld [vmem:[#allocation16_spill] sm:$0xff] }
  0x8f   : > { %7116 = vst [vmem:[#allocation53_spill] sm:$0xff] %v4380_v20  ;;  %7117 = vst [vmem:[#allocation54_spill] sm:$0xff] %v4383_v46  ;;  %v4407_v54 = vadd.f32 %v975_v18, %v4270_v37  ;;  %v4410_v57 = vadd.f32 %v976_v4, %v7126_v41  ;;  %v4413_v59 = vadd.f32 %v977_v29, %v7128_v6  ;;  %v7134_v9 = vld [vmem:[#allocation20_spill] sm:$0xff]  ;;  %v7136_v0 = vld [vmem:[#allocation21_spill] sm:$0xff] }
  0x90   : > { %7118 = vst [vmem:[#allocation58_spill] sm:$0xff] %v4386_v47  ;;  %7119 = vst [vmem:[#allocation59_spill] sm:$0xff] %v4389_v38  ;;  %v4416_v19 = vadd.f32 %v978_v62, %v7130_v7  ;;  %v4424_v43 = vadd.f32 %v979_v50, %v7132_v60  ;;  %v4427_v37 = vadd.f32 %v980_v2, %v7134_v9  ;;  %v7138_v24 = vld [vmem:[#allocation25_spill] sm:$0xff]  ;;  %v7146_v50 = vld [vmem:[#allocation34_spill] sm:$0xff] }
  0x91   : > { %7121 = vst [vmem:[#allocation64_spill] sm:$0xff] %v4395_v32  ;;  %7122 = vst [vmem:[#allocation68_spill] sm:$0xff] %v4398_v33  ;;  %v4430_v12 = vadd.f32 %v981_v56, %v7136_v0  ;;  %v4433_v13 = vadd.f32 %v982_v39, %v7138_v24  ;;  %v4436_v30 = vadd.f32 %v983_v34, %v7140_v44  ;;  %v7148_v2 = vld [vmem:[#allocation5_spill] sm:$0xff]  ;;  %v7149_v56 = vld [vmem:[#allocation6_spill] sm:$0xff] }
  0x92   : > { %7123 = vst [vmem:[#allocation69_spill] sm:$0xff] %v4401_v16  ;;  %7124 = vst [vmem:[#allocation70_spill] sm:$0xff] %v4404_v10  ;;  %v4439_v52 = vadd.f32 %v984_v55, %v7142_v27  ;;  %v4442_v8 = vadd.f32 %v985_v23, %v7144_v15  ;;  %v4445_v22 = vadd.f32 %v986_v5, %v7146_v50  ;;  %v7150_v39 = vld [vmem:[#allocation7_spill] sm:$0xff]  ;;  %v7151_v34 = vld [vmem:[#allocation8_spill] sm:$0xff] }
  0x93   : > { %7125 = vst [vmem:[#allocation71_spill] sm:$0xff] %v4407_v54  ;;  %7127 = vst [vmem:[#allocation56_spill] sm:$0xff] %v4410_v57  ;;  %v1024_v1 = vmul.f32 %v4421_v17, %v7148_v2  ;;  %v1025_v18 = vmul.f32 %v4421_v17, %v7149_v56  ;;  %v1026_v61 = vmul.f32 %v4421_v17, %v7150_v39  ;;  %v7152_v55 = vld [vmem:[#allocation9_spill] sm:$0xff]  ;;  %v7153_v23 = vld [vmem:[#allocation10_spill] sm:$0xff] }
  0x94   : > { %7129 = vst [vmem:[#allocation62_spill] sm:$0xff] %v4413_v59  ;;  %7131 = vst [vmem:[#allocation2_spill] sm:$0xff] %v4416_v19  ;;  %v1027_v4 = vmul.f32 %v4421_v17, %v7151_v34  ;;  %v1028_v11 = vmul.f32 %v4421_v17, %v7152_v55  ;;  %v1029_v29 = vmul.f32 %v4421_v17, %v7153_v23  ;;  %v7154_v5 = vld [vmem:[#allocation11_spill] sm:$0xff]  ;;  %v7155_v62 = vld [vmem:[#allocation12_spill] sm:$0xff] }
  0x95   : > { %7133 = vst [vmem:[#allocation3_spill] sm:$0xff] %v4424_v43  ;;  %7135 = vst [vmem:[#allocation4_spill] sm:$0xff] %v4427_v37  ;;  %v4461_v63 = vmul.f32 %v4421_v17, %v7154_v5  ;;  %v4465_v53 = vmul.f32 %v4421_v17, %v7155_v62  ;;  %v7156_v41 = vld [vmem:[#allocation13_spill] sm:$0xff]  ;;  %v7157_v7 = vld [vmem:[#allocation14_spill] sm:$0xff]  ;;  %v1121_v47 = vrot.slane %v1025_v18, 1  ;;  %v1123_v46 = vrot.slane %v1026_v61, 1 }
  0x96   : > { %7137 = vst [vmem:[#allocation16_spill] sm:$0xff] %v4430_v12  ;;  %7139 = vst [vmem:[#allocation20_spill] sm:$0xff] %v4433_v13  ;;  %v4469_v6 = vmul.f32 %v4421_v17, %v7156_v41  ;;  %v4473_v60 = vmul.f32 %v4421_v17, %v7157_v7  ;;  %v7158_v9 = vld [vmem:[#allocation15_spill] sm:$0xff]  ;;  %v7159_v24 = vld [vmem:[#allocation17_spill] sm:$0xff]  ;;  %v1125_v31 = vrot.slane %v1027_v4, 1  ;;  %v1128_v3 = vrot.slane %v1029_v29, 1 }
  0x97   : > { %7141 = vst [vmem:[#allocation21_spill] sm:$0xff] %v4436_v30  ;;  %7143 = vst [vmem:[#allocation25_spill] sm:$0xff] %v4439_v52  ;;  %v4477_v0 = vmul.f32 %v4421_v17, %v7158_v9  ;;  %v4481_v44 = vmul.f32 %v4421_v17, %v7159_v24  ;;  %v7160_v27 = vld [vmem:[#allocation18_spill] sm:$0xff]  ;;  %v7161_v50 = vld [vmem:[#allocation19_spill] sm:$0xff]  ;;  %v4620_v18 = vmul.f32 %v4421_v17, %v4325_v14  ;;  %v1130_v61 = vrot.slane %v4461_v63, 1 }
  0x98   : > { %7145 = vst [vmem:[#allocation26_spill] sm:$0xff] %v4442_v8  ;;  %7147 = vst [vmem:[#allocation29_spill] sm:$0xff] %v4445_v22  ;;  %v4485_v15 = vmul.f32 %v4421_v17, %v7160_v27  ;;  %v4489_v2 = vmul.f32 %v4421_v17, %v7161_v50  ;;  %v7162_v56 = vld [vmem:[#allocation22_spill] sm:$0xff]  ;;  %v7163_v34 = vld [vmem:[#allocation23_spill] sm:$0xff]  ;;  %v1133_v29 = vrot.slane %v4469_v6, 1 }
  0x99   : > { %v4493_v39 = vmul.f32 %v4421_v17, %v7162_v56  ;;  %v4497_v55 = vmul.f32 %v4421_v17, %v7163_v34  ;;  %v7164_v23 = vld [vmem:[#allocation24_spill] sm:$0xff]  ;;  %v7165_v62 = vld [vmem:[#allocation31_spill] sm:$0xff]  ;;  %v7170_v22 = vld [vmem:[#allocation33_spill] sm:$0xff]  ;;  %v1136_v63 = vrot.slane %v4477_v0, 1 }
  0x9a   : > { %v4501_v5 = vmul.f32 %v4421_v17, %v7164_v23  ;;  %v4505_v41 = vmul.f32 %v4421_v17, %v7165_v62  ;;  %v7166_v7 = vld [vmem:[#allocation27_spill] sm:$0xff]  ;;  %v7167_v24 = vld [vmem:[#allocation28_spill] sm:$0xff]  ;;  %v4525_v62 = vmul.f32 %v4421_v17, %v7170_v22  ;;  %v7171_v8 = vld [vmem:[#allocation45_spill] sm:$0xff] }
  0x9b   : > { %v4509_v9 = vmul.f32 %v4421_v17, %v7166_v7  ;;  %v4513_v27 = vmul.f32 %v4421_v17, %v7167_v24  ;;  %v7168_v50 = vld [vmem:[#allocation36_spill] sm:$0xff]  ;;  %v4529_v7 = vmul.f32 %v4421_v17, %v7171_v8  ;;  %v7172_v52 = vld [vmem:[#allocation37_spill] sm:$0xff]  ;;  %v7173_v30 = vld [vmem:[#allocation38_spill] sm:$0xff] }
  0x9c   : > { %v4517_v56 = vmul.f32 %v4421_v17, %v7168_v50  ;;  %v7169_v34 = vld [vmem:[#allocation32_spill] sm:$0xff]  ;;  %v4533_v24 = vmul.f32 %v4421_v17, %v7172_v52  ;;  %v4537_v50 = vmul.f32 %v4421_v17, %v7173_v30  ;;  %v7174_v13 = vld [vmem:[#allocation50_spill] sm:$0xff]  ;;  %v7175_v12 = vld [vmem:[#allocation41_spill] sm:$0xff]  ;;  %v1146_v6 = vrot.slane %v4501_v5, 1 }
  0x9d   : > { %v4521_v23 = vmul.f32 %v4421_v17, %v7169_v34  ;;  %v4541_v34 = vmul.f32 %v4421_v17, %v7174_v13  ;;  %v4545_v22 = vmul.f32 %v4421_v17, %v7175_v12  ;;  %v7176_v37 = vld [vmem:[#allocation42_spill] sm:$0xff]  ;;  %v7177_v43 = vld [vmem:[#allocation55_spill] sm:$0xff]  ;;  %v7180_v57 = vld [vmem:[#allocation60_spill] sm:$0xff] }
  0x9e   : > { %v4549_v8 = vmul.f32 %v4421_v17, %v7176_v37  ;;  %v4553_v52 = vmul.f32 %v4421_v17, %v7177_v43  ;;  %v7178_v19 = vld [vmem:[#allocation46_spill] sm:$0xff]  ;;  %v7179_v59 = vld [vmem:[#allocation47_spill] sm:$0xff]  ;;  %v4565_v12 = vmul.f32 %v4421_v17, %v7180_v57  ;;  %v7182_v10 = vld [vmem:[#allocation52_spill] sm:$0xff]  ;;  %v1153_v0 = vrot.slane %v4517_v56, 1 }
  0x9f   : > { %v4557_v30 = vmul.f32 %v4421_v17, %v7178_v19  ;;  %v4561_v13 = vmul.f32 %v4421_v17, %v7179_v59  ;;  %v7181_v54 = vld [vmem:[#allocation51_spill] sm:$0xff]  ;;  %v4573_v43 = vmul.f32 %v4421_v17, %v7182_v10  ;;  %v7183_v16 = vld [vmem:[#allocation65_spill] sm:$0xff]  ;;  %v4581_v59 = vmul.f32 %v4421_v17, %v7105_v51  ;;  %v7185_v32 = vld [vmem:[#allocation72_spill] sm:$0xff] }
  0xa0   : > { %v4569_v37 = vmul.f32 %v4421_v17, %v7181_v54  ;;  %v4577_v19 = vmul.f32 %v4421_v17, %v7183_v16  ;;  %v7184_v33 = vld [vmem:[#allocation57_spill] sm:$0xff]  ;;  %v4589_v54 = vmul.f32 %v4421_v17, %v7185_v32  ;;  %v4593_v10 = vmul.f32 %v4421_v17, %v7186_v25  ;;  %v4596_v38 = vld [vmem:[%s3274_s16 + $0x190] sm:$0x3]  ;;  %v7190_v45 = vld [vmem:[#allocation67_spill] sm:$0xff] }
  0xa1   : > { %v4585_v57 = vmul.f32 %v4421_v17, %v7184_v33  ;;  %7187 = vst [vmem:[#allocation30_spill] sm:$0xff] %v4596_v38  ;;  %v4600_v16 = vmul.f32 %v4421_v17, %v7108_v28  ;;  %v1120_v51 = vrot.slane %v1024_v1, 1  ;;  %v7188_v20 = vld [vmem:[#allocation73_spill] sm:$0xff]  ;;  %v1126_v32 = vrot.slane %v1028_v11, 1  ;;  %v7191_v28 = vld [vmem:[#allocation74_spill] sm:$0xff] }
  0xa2   : > { %v4604_v33 = vmul.f32 %v4421_v17, %v7188_v20  ;;  %v4608_v25 = vmul.f32 %v4421_v17, %v7189_v40  ;;  %v4612_v48 = vmul.f32 %v4421_v17, %v7190_v45  ;;  %v4616_v1 = vmul.f32 %v4421_v17, %v7191_v28 }
  0xa3   : > { %v4624_v20 = vmul.f32 %v4421_v17, %v4336_v49  ;;  %v4628_v40 = vmul.f32 %v4421_v17, %v4596_v38  ;;  %v1131_v45 = vrot.slane %v4465_v53, 1  ;;  %v4633_v4 = vsel %vm558_vm1, %v1120_v51, %v1121_v47 }
  0xa4   : > { %v4636_v11 = vsel %vm558_vm1, %v1121_v47, %v1123_v46  ;;  %v1135_v28 = vrot.slane %v4473_v60, 1  ;;  %v4641_v49 = vsel %vm558_vm1, %v1125_v31, %v1126_v32  ;;  %v4644_v17 = vsel %vm558_vm1, %v1126_v32, %v1128_v3 }
  0xa5   : > { %v1138_v53 = vrot.slane %v4481_v44, 1  ;;  %v1140_v51 = vrot.slane %v4485_v15, 1  ;;  %v1141_v38 = vrot.slane %v4489_v2, 1  ;;  %v1143_v46 = vrot.slane %v4493_v39, 1 }
  0xa6   : > { %v1145_v47 = vrot.slane %v4497_v55, 1  ;;  %v1148_v31 = vrot.slane %v4505_v41, 1  ;;  %v1150_v60 = vrot.slane %v4509_v9, 1  ;;  %v1151_v3 = vrot.slane %v4513_v27, 1 }
  0xa7   : > { %v1155_v44 = vrot.slane %v4521_v23, 1  ;;  %v1156_v15 = vrot.slane %v4525_v62, 1  ;;  %v1158_v2 = vrot.slane %v4529_v7, 1  ;;  %v1132_v39 = vsel %vm558_vm1, %v1130_v61, %v1131_v45 }
  0xa8   : > { %v1134_v55 = vsel %vm558_vm1, %v1131_v45, %v1133_v29  ;;  %v1160_v5 = vrot.slane %v4533_v24, 1  ;;  %v1161_v41 = vrot.slane %v4537_v50, 1  ;;  %v1137_v9 = vsel %vm558_vm1, %v1135_v28, %v1136_v63 }
  0xa9   : > { %v1139_v27 = vsel %vm558_vm1, %v1136_v63, %v1138_v53  ;;  %v1142_v56 = vsel %vm558_vm1, %v1140_v51, %v1141_v38  ;;  %v1163_v23 = vrot.slane %v4541_v34, 1  ;;  %v1144_v62 = vsel %vm558_vm1, %v1141_v38, %v1143_v46 }
  0xaa   : > { %v1147_v7 = vsel %vm558_vm1, %v1145_v47, %v1146_v6  ;;  %v1149_v32 = vsel %vm558_vm1, %v1146_v6, %v1148_v31  ;;  %v1152_v61 = vsel %vm558_vm1, %v1150_v60, %v1151_v3  ;;  %v1154_v24 = vsel %vm558_vm1, %v1151_v3, %v1153_v0 }
  0xab   : > { %v1157_v50 = vsel %vm558_vm1, %v1155_v44, %v1156_v15  ;;  %v1159_v45 = vsel %vm558_vm1, %v1156_v15, %v1158_v2  ;;  %v1165_v29 = vrot.slane %v4545_v22, 1  ;;  %v1162_v28 = vsel %vm558_vm1, %v1160_v5, %v1161_v41 }
  0xac   : > { %v1166_v34 = vrot.slane %v4549_v8, 1  ;;  %v1168_v38 = vrot.slane %v4553_v52, 1  ;;  %v1170_v63 = vrot.slane %v4557_v30, 1  ;;  %v1164_v53 = vsel %vm558_vm1, %v1161_v41, %v1163_v23 }
  0xad   : > { %v1171_v51 = vrot.slane %v4561_v13, 1  ;;  %v1173_v46 = vrot.slane %v4565_v12, 1  ;;  %v1175_v47 = vrot.slane %v4569_v37, 1  ;;  %v1176_v6 = vrot.slane %v4573_v43, 1 }
  0xae   : > { %v1178_v22 = vrot.slane %v4577_v19, 1  ;;  %v1180_v31 = vrot.slane %v4581_v59, 1  ;;  %v1181_v8 = vrot.slane %v4585_v57, 1  ;;  %v1183_v52 = vrot.slane %v4589_v54, 1 }
  0xaf   : > { %v1185_v30 = vrot.slane %v4593_v10, 1  ;;  %v1186_v60 = vrot.slane %v4600_v16, 1  ;;  %v1188_v13 = vrot.slane %v4604_v33, 1  ;;  %v1167_v12 = vsel %vm558_vm1, %v1165_v29, %v1166_v34 }
  0xb0   : > { %v1190_v37 = vrot.slane %v4608_v25, 1  ;;  %v1191_v43 = vrot.slane %v4612_v48, 1  ;;  %v1193_v19 = vrot.slane %v4616_v1, 1  ;;  %v1169_v59 = vsel %vm558_vm1, %v1166_v34, %v1168_v38  ;;  %v7195_v38 = vld [vmem:[#allocation44_spill] sm:$0xff] }
  0xb1   : > { %v1195_v57 = vrot.slane %v4620_v18, 1  ;;  %v1196_v54 = vrot.slane %v4624_v20, 1  ;;  %v1198_v10 = vrot.slane %v4628_v40, 1  ;;  %v1172_v16 = vsel %vm558_vm1, %v1170_v63, %v1171_v51 }
  0xb2   : > { %v1174_v33 = vsel %vm558_vm1, %v1171_v51, %v1173_v46  ;;  %v1177_v3 = vsel %vm558_vm1, %v1175_v47, %v1176_v6  ;;  %v1179_v25 = vsel %vm558_vm1, %v1176_v6, %v1178_v22  ;;  %v1182_v48 = vsel %vm558_vm1, %v1180_v31, %v1181_v8 }
  0xb3   : > { %v1184_v1 = vsel %vm558_vm1, %v1181_v8, %v1183_v52  ;;  %v1187_v0 = vsel %vm558_vm1, %v1185_v30, %v1186_v60  ;;  %v1189_v18 = vsel %vm558_vm1, %v1186_v60, %v1188_v13  ;;  %v1192_v20 = vsel %vm558_vm1, %v1190_v37, %v1191_v43  ;;  %v7221_v52 = vld [vmem:[#allocation56_spill] sm:$0xff]  ;;  %v7223_v30 = vld [vmem:[#allocation62_spill] sm:$0xff] }
  0xb4   : > { %v1194_v40 = vsel %vm558_vm1, %v1191_v43, %v1193_v19  ;;  %v4712_v44 = vadd.f32 %v4633_v4, %v4347_v36  ;;  %v4716_v15 = vadd.f32 %v4636_v11, %v4350_v35  ;;  %v1197_v2 = vsel %vm558_vm1, %v1195_v57, %v1196_v54  ;;  %v7192_v35 = vld [vmem:[#allocation40_spill] sm:$0xff]  ;;  %v7193_v11 = vld [vmem:[#allocation43_spill] sm:$0xff]  ;;  %v4791_v13 = vld [vmem:[%s6675_s1 + $0x6] ss:$0 sm:$0xff] }
  0xb5   : > { %v1199_v5 = vsel %vm558_vm1, %v1196_v54, %v1198_v10  ;;  %v4722_v41 = vadd.f32 %v4641_v49, %v4353_v42  ;;  %v4726_v23 = vadd.f32 %v4644_v17, %v4356_v58  ;;  %v4729_v29 = vadd.f32 %v1132_v39, %v4359_v21  ;;  %v7197_v42 = vld [vmem:[#allocation48_spill] sm:$0xff]  ;;  %v7199_v58 = vld [vmem:[#allocation49_spill] sm:$0xff] }
  0xb6   : > { %v4732_v36 = vadd.f32 %v1134_v55, %v4362_v26  ;;  %v4735_v4 = vadd.f32 %v1137_v9, %v7192_v35  ;;  %v4738_v34 = vadd.f32 %v1139_v27, %v7193_v11  ;;  %v4741_v63 = vadd.f32 %v1142_v56, %v7195_v38  ;;  %v7201_v21 = vld [vmem:[#allocation53_spill] sm:$0xff]  ;;  %v7203_v26 = vld [vmem:[#allocation54_spill] sm:$0xff]  ;;  %v7207_v27 = vld [vmem:[#allocation59_spill] sm:$0xff] }
  0xb7   : > { %v4744_v49 = vadd.f32 %v1144_v62, %v7197_v42  ;;  %v4747_v17 = vadd.f32 %v1147_v7, %v7199_v58  ;;  %v4750_v39 = vadd.f32 %v1149_v32, %v7201_v21  ;;  %v4753_v55 = vadd.f32 %v1152_v61, %v7203_v26  ;;  %v7205_v9 = vld [vmem:[#allocation58_spill] sm:$0xff]  ;;  %v7209_v56 = vld [vmem:[#allocation63_spill] sm:$0xff]  ;;  %v7211_v62 = vld [vmem:[#allocation64_spill] sm:$0xff] }
  0xb8   : > { %7194 = vst [vmem:[#allocation34_spill] sm:$0xff] %v4738_v34  ;;  %7196 = vst [vmem:[#allocation5_spill] sm:$0xff] %v4741_v63  ;;  %v4756_v51 = vadd.f32 %v1154_v24, %v7205_v9  ;;  %v4759_v46 = vadd.f32 %v1157_v50, %v7207_v27  ;;  %v4762_v47 = vadd.f32 %v1159_v45, %v7209_v56  ;;  %v7213_v7 = vld [vmem:[#allocation68_spill] sm:$0xff]  ;;  %v7215_v32 = vld [vmem:[#allocation69_spill] sm:$0xff] }
  0xb9   : > { %7198 = vst [vmem:[#allocation6_spill] sm:$0xff] %v4744_v49  ;;  %7200 = vst [vmem:[#allocation7_spill] sm:$0xff] %v4747_v17  ;;  %v4765_v6 = vadd.f32 %v1162_v28, %v7211_v62  ;;  %v4768_v22 = vadd.f32 %v1164_v53, %v7213_v7  ;;  %v4771_v31 = vadd.f32 %v1167_v12, %v7215_v32  ;;  %v7217_v61 = vld [vmem:[#allocation70_spill] sm:$0xff]  ;;  %v7219_v24 = vld [vmem:[#allocation71_spill] sm:$0xff] }
  0xba   : > { %7202 = vst [vmem:[#allocation8_spill] sm:$0xff] %v4750_v39  ;;  %7204 = vst [vmem:[#allocation9_spill] sm:$0xff] %v4753_v55  ;;  %v4774_v8 = vadd.f32 %v1169_v59, %v7217_v61  ;;  %v4777_v50 = vadd.f32 %v1172_v16, %v7219_v24  ;;  %v4780_v45 = vadd.f32 %v1174_v33, %v7221_v52  ;;  %v7225_v53 = vld [vmem:[#allocation2_spill] sm:$0xff]  ;;  %v7227_v12 = vld [vmem:[#allocation3_spill] sm:$0xff] }
  0xbb   : > { %7206 = vst [vmem:[#allocation10_spill] sm:$0xff] %v4756_v51  ;;  %7208 = vst [vmem:[#allocation11_spill] sm:$0xff] %v4759_v46  ;;  %v4783_v28 = vadd.f32 %v1177_v3, %v7223_v30  ;;  %v4786_v60 = vadd.f32 %v1179_v25, %v7225_v53  ;;  %v4794_v37 = vadd.f32 %v1182_v48, %v7227_v12  ;;  %v7229_v43 = vld [vmem:[#allocation4_spill] sm:$0xff]  ;;  %v7235_v16 = vld [vmem:[#allocation21_spill] sm:$0xff] }
  0xbc   : > { %7210 = vst [vmem:[#allocation12_spill] sm:$0xff] %v4762_v47  ;;  %7212 = vst [vmem:[#allocation13_spill] sm:$0xff] %v4765_v6  ;;  %v4797_v19 = vadd.f32 %v1184_v1, %v7229_v43  ;;  %v7231_v59 = vld [vmem:[#allocation16_spill] sm:$0xff]  ;;  %v4806_v33 = vadd.f32 %v1192_v20, %v7235_v16  ;;  %v7237_v3 = vld [vmem:[#allocation25_spill] sm:$0xff] }
  0xbd   : > { %7214 = vst [vmem:[#allocation14_spill] sm:$0xff] %v4768_v22  ;;  %7216 = vst [vmem:[#allocation15_spill] sm:$0xff] %v4771_v31  ;;  %v4800_v57 = vadd.f32 %v1187_v0, %v7231_v59  ;;  %v7233_v54 = vld [vmem:[#allocation20_spill] sm:$0xff]  ;;  %v4809_v25 = vadd.f32 %v1194_v40, %v7237_v3  ;;  %v7239_v48 = vld [vmem:[#allocation26_spill] sm:$0xff] }
  0xbe   : > { %7218 = vst [vmem:[#allocation17_spill] sm:$0xff] %v4774_v8  ;;  %7220 = vst [vmem:[#allocation18_spill] sm:$0xff] %v4777_v50  ;;  %v4803_v10 = vadd.f32 %v1189_v18, %v7233_v54  ;;  %v4812_v35 = vadd.f32 %v1197_v2, %v7239_v48  ;;  %v7241_v11 = vld [vmem:[#allocation29_spill] sm:$0xff]  ;;  %v3150_v18 = vld [vmem:[%s3274_s16 + $0x20] sm:$0xff] }
  0xbf   : > { %7222 = vst [vmem:[#allocation19_spill] sm:$0xff] %v4780_v45  ;;  %7224 = vst [vmem:[#allocation22_spill] sm:$0xff] %v4783_v28  ;;  %v4815_v1 = vadd.f32 %v1199_v5, %v7241_v11  ;;  %v3149_v0 = vld [vmem:[%s3274_s16 + $0x18] sm:$0xff]  ;;  %v4823_v20 = vmul.f32 %v3150_v18, %v4791_v13  ;;  %v3151_v42 = vld [vmem:[%s3274_s16 + $0x28] sm:$0x3] }
  0xc0   : > { %7226 = vst [vmem:[#allocation23_spill] sm:$0xff] %v4786_v60  ;;  %7228 = vst [vmem:[#allocation24_spill] sm:$0xff] %v4794_v37  ;;  %v4819_v38 = vmul.f32 %v3149_v0, %v4791_v13  ;;  %v4827_v40 = vmul.f32 %v3151_v42, %v4791_v13  ;;  %v4830_v2 = vld [vmem:[%s3274_s16 + $0x30] sm:$0xff]  ;;  %v4837_v58 = vld [vmem:[%s3274_s16 + $0x38] sm:$0xff] }
  0xc1   : > { %7230 = vst [vmem:[#allocation31_spill] sm:$0xff] %v4797_v19  ;;  %7232 = vst [vmem:[#allocation27_spill] sm:$0xff] %v4800_v57  ;;  %v4834_v5 = vmul.f32 %v4830_v2, %v4791_v13  ;;  %v4841_v21 = vmul.f32 %v4837_v58, %v4791_v13  ;;  %v4844_v26 = vld [vmem:[%s3274_s16 + $0x40] sm:$0x3]  ;;  %v4851_v27 = vld [vmem:[%s3274_s16 + $0x48] sm:$0xff]  ;;  %v1366_v6 = vrot.slane %v4823_v20, 2 }
  0xc2   : > { %7234 = vst [vmem:[#allocation28_spill] sm:$0xff] %v4803_v10  ;;  %7236 = vst [vmem:[#allocation36_spill] sm:$0xff] %v4806_v33  ;;  %v4848_v9 = vmul.f32 %v4844_v26, %v4791_v13  ;;  %v4855_v56 = vmul.f32 %v4851_v27, %v4791_v13  ;;  %v4858_v62 = vld [vmem:[%s3274_s16 + $0x50] sm:$0xff]  ;;  %v4865_v32 = vld [vmem:[%s3274_s16 + $0x58] sm:$0x3]  ;;  %v1365_v22 = vrot.slane %v4819_v38, 2 }
  0xc3   : > { %7238 = vst [vmem:[#allocation32_spill] sm:$0xff] %v4809_v25  ;;  %7240 = vst [vmem:[#allocation33_spill] sm:$0xff] %v4812_v35  ;;  %v4862_v7 = vmul.f32 %v4858_v62, %v4791_v13  ;;  %v4869_v61 = vmul.f32 %v4865_v32, %v4791_v13  ;;  %v4872_v24 = vld [vmem:[%s3274_s16 + $0x60] sm:$0xff]  ;;  %v4879_v30 = vld [vmem:[%s3274_s16 + $0x68] sm:$0xff]  ;;  %v1371_v51 = vrot.slane %v4841_v21, 2  ;;  %v5131_v21 = vmul.f32 %v4791_v13, %v4325_v14 }
  0xc4   : > { %7242 = vst [vmem:[#allocation45_spill] sm:$0xff] %v4815_v1  ;;  %7243 = vst [vmem:[#allocation37_spill] sm:$0xff] %v4830_v2  ;;  %v4876_v52 = vmul.f32 %v4872_v24, %v4791_v13  ;;  %v4883_v53 = vmul.f32 %v4879_v30, %v4791_v13  ;;  %v4886_v12 = vld [vmem:[%s3274_s16 + $0x70] sm:$0x3]  ;;  %v4893_v59 = vld [vmem:[%s3274_s16 + $0x78] sm:$0xff]  ;;  %v1373_v55 = vrot.slane %v4848_v9, 2  ;;  %v5144_v63 = vsel %vm804_vm2, %v1365_v22, %v1366_v6 }
  0xc5   : > { %7244 = vst [vmem:[#allocation38_spill] sm:$0xff] %v4837_v58  ;;  %7245 = vst [vmem:[#allocation50_spill] sm:$0xff] %v4844_v26  ;;  %v4890_v43 = vmul.f32 %v4886_v12, %v4791_v13  ;;  %v4897_v54 = vmul.f32 %v4893_v59, %v4791_v13  ;;  %v4900_v16 = vld [vmem:[%s3274_s16 + $0x80] sm:$0xff]  ;;  %v4907_v48 = vld [vmem:[%s3274_s16 + $0x88] sm:$0x3]  ;;  %v1376_v49 = vrot.slane %v4862_v7, 2 }
  0xc6   : > { %7246 = vst [vmem:[#allocation41_spill] sm:$0xff] %v4851_v27  ;;  %7247 = vst [vmem:[#allocation42_spill] sm:$0xff] %v4858_v62  ;;  %v4904_v3 = vmul.f32 %v4900_v16, %v4791_v13  ;;  %v4911_v11 = vmul.f32 %v4907_v48, %v4791_v13  ;;  %v4914_v0 = vld [vmem:[%s3274_s16 + $0x90] sm:$0xff]  ;;  %v4921_v42 = vld [vmem:[%s3274_s16 + $0x98] sm:$0xff]  ;;  %v1378_v14 = vrot.slane %v4869_v61, 2  ;;  %v1380_v34 = vrot.slane %v4876_v52, 2 }
  0xc7   : > { %7248 = vst [vmem:[#allocation55_spill] sm:$0xff] %v4865_v32  ;;  %7249 = vst [vmem:[#allocation46_spill] sm:$0xff] %v4872_v24  ;;  %v4918_v18 = vmul.f32 %v4914_v0, %v4791_v13  ;;  %v4928_v32 = vld [vmem:[%s3274_s16 + $0xa0] sm:$0x3]  ;;  %v4935_v26 = vld [vmem:[%s3274_s16 + $0xa8] sm:$0xff]  ;;  %v1383_v7 = vrot.slane %v4890_v43, 2 }
  0xc8   : > { %7250 = vst [vmem:[#allocation47_spill] sm:$0xff] %v4879_v30  ;;  %7251 = vst [vmem:[#allocation60_spill] sm:$0xff] %v4886_v12  ;;  %v4925_v12 = vmul.f32 %v4921_v42, %v4791_v13  ;;  %v4956_v30 = vld [vmem:[%s3274_s16 + $0xc0] sm:$0xff]  ;;  %v4963_v24 = vld [vmem:[%s3274_s16 + $0xc8] sm:$0xff]  ;;  %v1385_v22 = vrot.slane %v4897_v54, 2 }
  0xc9   : > { %7252 = vst [vmem:[#allocation51_spill] sm:$0xff] %v4893_v59  ;;  %7253 = vst [vmem:[#allocation52_spill] sm:$0xff] %v4900_v16  ;;  %v4942_v16 = vld [vmem:[%s3274_s16 + $0xb0] sm:$0xff]  ;;  %v4949_v59 = vld [vmem:[%s3274_s16 + $0xb8] sm:$0x3] }
  0xca   : > { %7254 = vst [vmem:[#allocation65_spill] sm:$0xff] %v4907_v48  ;;  %7255 = vst [vmem:[#allocation57_spill] sm:$0xff] %v4914_v0  ;;  %v4932_v48 = vmul.f32 %v4928_v32, %v4791_v13  ;;  %v4939_v0 = vmul.f32 %v4935_v26, %v4791_v13  ;;  %v4970_v62 = vld [vmem:[%s3274_s16 + $0xd0] sm:$0x3]  ;;  %v4977_v27 = vld [vmem:[%s3274_s16 + $0xd8] sm:$0xff]  ;;  %v1391_v61 = vrot.slane %v4925_v12, 2 }
  0xcb   : > { %7256 = vst [vmem:[#allocation72_spill] sm:$0xff] %v4921_v42  ;;  %7257 = vst [vmem:[#allocation61_spill] sm:$0xff] %v4928_v32  ;;  %v4946_v42 = vmul.f32 %v4942_v16, %v4791_v13  ;;  %v4953_v32 = vmul.f32 %v4949_v59, %v4791_v13  ;;  %v4984_v58 = vld [vmem:[%s3274_s16 + $0xe0] sm:$0xff]  ;;  %v4991_v2 = vld [vmem:[%s3274_s16 + $0xe8] sm:$0x3] }
  0xcc   : > { %7258 = vst [vmem:[#allocation73_spill] sm:$0xff] %v4935_v26  ;;  %7259 = vst [vmem:[#allocation66_spill] sm:$0xff] %v4942_v16  ;;  %v4960_v26 = vmul.f32 %v4956_v30, %v4791_v13  ;;  %v4967_v16 = vmul.f32 %v4963_v24, %v4791_v13  ;;  %v4998_v1 = vld [vmem:[%s3274_s16 + $0xf0] sm:$0xff]  ;;  %v5005_v35 = vld [vmem:[%s3274_s16 + $0xf8] sm:$0xff]  ;;  %v1395_v52 = vrot.slane %v4939_v0, 2 }
  0xcd   : > { %7260 = vst [vmem:[#allocation67_spill] sm:$0xff] %v4949_v59  ;;  %7261 = vst [vmem:[#allocation74_spill] sm:$0xff] %v4956_v30  ;;  %v4974_v59 = vmul.f32 %v4970_v62, %v4791_v13  ;;  %v4981_v30 = vmul.f32 %v4977_v27, %v4791_v13  ;;  %v5012_v25 = vld [vmem:[%s3274_s16 + $0x100] sm:$0x3]  ;;  %v5019_v33 = vld [vmem:[%s3274_s16 + $0x108] sm:$0xff] }
  0xce   : > { %7262 = vst [vmem:[#allocation40_spill] sm:$0xff] %v4963_v24  ;;  %7263 = vst [vmem:[#allocation43_spill] sm:$0xff] %v4970_v62  ;;  %v4988_v24 = vmul.f32 %v4984_v58, %v4791_v13  ;;  %v4995_v62 = vmul.f32 %v4991_v2, %v4791_v13  ;;  %v5026_v10 = vld [vmem:[%s3274_s16 + $0x110] sm:$0xff]  ;;  %v5033_v57 = vld [vmem:[%s3274_s16 + $0x118] sm:$0x3]  ;;  %v1401_v43 = vrot.slane %v4967_v16, 2 }
  0xcf   : > { %7264 = vst [vmem:[#allocation44_spill] sm:$0xff] %v4977_v27  ;;  %7265 = vst [vmem:[#allocation48_spill] sm:$0xff] %v4984_v58  ;;  %v5002_v27 = vmul.f32 %v4998_v1, %v4791_v13  ;;  %v5009_v58 = vmul.f32 %v5005_v35, %v4791_v13  ;;  %v5040_v19 = vld [vmem:[%s3274_s16 + $0x120] sm:$0xff]  ;;  %v5047_v37 = vld [vmem:[%s3274_s16 + $0x128] sm:$0xff]  ;;  %v1403_v54 = vrot.slane %v4974_v59, 2  ;;  %v1405_v12 = vrot.slane %v4981_v30, 2 }
  0xd0   : > { %7266 = vst [vmem:[#allocation49_spill] sm:$0xff] %v4991_v2  ;;  %7267 = vst [vmem:[#allocation53_spill] sm:$0xff] %v4998_v1  ;;  %v5016_v2 = vmul.f32 %v5012_v25, %v4791_v13  ;;  %v5023_v1 = vmul.f32 %v5019_v33, %v4791_v13  ;;  %v5051_v60 = vmul.f32 %v5047_v37, %v4791_v13  ;;  %v5075_v50 = vld [vmem:[%s3274_s16 + $0x148] sm:$0x3]  ;;  %v5082_v8 = vld [vmem:[%s3274_s16 + $0x150] sm:$0xff] }
  0xd1   : > { %7268 = vst [vmem:[#allocation54_spill] sm:$0xff] %v5005_v35  ;;  %7269 = vst [vmem:[#allocation58_spill] sm:$0xff] %v5012_v25  ;;  %v5030_v35 = vmul.f32 %v5026_v10, %v4791_v13  ;;  %v5037_v25 = vmul.f32 %v5033_v57, %v4791_v13  ;;  %v5089_v31 = vld [vmem:[%s3274_s16 + $0x158] sm:$0xff]  ;;  %v5099_v47 = vld [vmem:[%s3274_s16 + $0x160] sm:$0x3]  ;;  %v1410_v30 = vrot.slane %v5002_v27, 2 }
  0xd2   : > { %7270 = vst [vmem:[#allocation59_spill] sm:$0xff] %v5019_v33  ;;  %7271 = vst [vmem:[#allocation63_spill] sm:$0xff] %v5026_v10  ;;  %v5044_v33 = vmul.f32 %v5040_v19, %v4791_v13  ;;  %v5054_v10 = vld [vmem:[%s3274_s16 + $0x130] sm:$0x3]  ;;  %v5103_v46 = vmul.f32 %v5099_v47, %v4791_v13  ;;  %v7285_v9 = vld [vmem:[#allocation39_spill] sm:$0xff] }
  0xd3   : > { %7272 = vst [vmem:[#allocation64_spill] sm:$0xff] %v5033_v57  ;;  %7273 = vst [vmem:[#allocation68_spill] sm:$0xff] %v5040_v19  ;;  %v5058_v28 = vmul.f32 %v5054_v10, %v4791_v13  ;;  %v5061_v57 = vld [vmem:[%s3274_s16 + $0x138] sm:$0xff]  ;;  %v5068_v19 = vld [vmem:[%s3274_s16 + $0x140] sm:$0xff] }
  0xd4   : > { %7274 = vst [vmem:[#allocation69_spill] sm:$0xff] %v5047_v37  ;;  %7275 = vst [vmem:[#allocation70_spill] sm:$0xff] %v5054_v10  ;;  %v5065_v45 = vmul.f32 %v5061_v57, %v4791_v13  ;;  %v5072_v37 = vmul.f32 %v5068_v19, %v4791_v13  ;;  %v5079_v10 = vmul.f32 %v5075_v50, %v4791_v13  ;;  %v5116_v20 = vld [vmem:[%s3274_s16 + $0x170] sm:$0xff]  ;;  %v7286_v39 = vld [vmem:[#allocation30_spill] sm:$0xff] }
  0xd5   : > { %7276 = vst [vmem:[#allocation71_spill] sm:$0xff] %v5061_v57  ;;  %7277 = vst [vmem:[#allocation56_spill] sm:$0xff] %v5068_v19  ;;  %v5086_v57 = vmul.f32 %v5082_v8, %v4791_v13  ;;  %v5093_v19 = vmul.f32 %v5089_v31, %v4791_v13  ;;  %v5139_v17 = vmul.f32 %v4791_v13, %v7286_v39  ;;  %v1386_v39 = vrot.slane %v4904_v3, 2 }
  0xd6   : > { %7278 = vst [vmem:[#allocation62_spill] sm:$0xff] %v5075_v50  ;;  %7279 = vst [vmem:[#allocation2_spill] sm:$0xff] %v5082_v8  ;;  %v1368_v50 = vrot.slane %v4827_v40, 2  ;;  %v1370_v8 = vrot.slane %v4834_v5, 2  ;;  %v5120_v40 = vmul.f32 %v5116_v20, %v4791_v13  ;;  %v1423_v27 = vrot.slane %v5058_v28, 2 }
  0xd7   : > { %7280 = vst [vmem:[#allocation3_spill] sm:$0xff] %v5089_v31  ;;  %7281 = vst [vmem:[#allocation4_spill] sm:$0xff] %v5099_v47  ;;  %v5109_v31 = vld [vmem:[%s3274_s16 + $0x168] sm:$0xff]  ;;  %v5123_v47 = vld [vmem:[%s3274_s16 + $0x178] sm:$0x3] }
  0xd8   : > { %7282 = vst [vmem:[#allocation16_spill] sm:$0xff] %v5109_v31  ;;  %v5113_v38 = vmul.f32 %v5109_v31, %v4791_v13  ;;  %7283 = vst [vmem:[#allocation20_spill] sm:$0xff] %v5116_v20  ;;  %v5127_v5 = vmul.f32 %v5123_v47, %v4791_v13  ;;  %v5135_v31 = vmul.f32 %v4791_v13, %v7285_v9  ;;  %v1375_v20 = vrot.slane %v4855_v56, 2 }
  0xd9   : > { %7284 = vst [vmem:[#allocation21_spill] sm:$0xff] %v5123_v47  ;;  %v5147_v47 = vsel %vm804_vm2, %v1366_v6, %v1368_v50  ;;  %v5152_v9 = vsel %vm804_vm2, %v1370_v8, %v1371_v51  ;;  %v5155_v13 = vsel %vm804_vm2, %v1371_v51, %v1373_v55  ;;  %v1381_v56 = vrot.slane %v4883_v53, 2 }
  0xda   : > { %v1388_v6 = vrot.slane %v4911_v11, 2  ;;  %v1390_v50 = vrot.slane %v4918_v18, 2  ;;  %v1393_v8 = vrot.slane %v4932_v48, 2  ;;  %v1396_v55 = vrot.slane %v4946_v42, 2 }
  0xdb   : > { %v1398_v51 = vrot.slane %v4953_v32, 2  ;;  %v1400_v53 = vrot.slane %v4960_v26, 2  ;;  %v1377_v3 = vsel %vm804_vm2, %v1375_v20, %v1376_v49  ;;  %v1379_v11 = vsel %vm804_vm2, %v1376_v49, %v1378_v14 }
  0xdc   : > { %v1406_v48 = vrot.slane %v4988_v24, 2  ;;  %v1382_v0 = vsel %vm804_vm2, %v1380_v34, %v1381_v56  ;;  %v1384_v18 = vsel %vm804_vm2, %v1381_v56, %v1383_v7  ;;  %v1387_v32 = vsel %vm804_vm2, %v1385_v22, %v1386_v39 }
  0xdd   : > { %v1408_v26 = vrot.slane %v4995_v62, 2  ;;  %v1389_v16 = vsel %vm804_vm2, %v1386_v39, %v1388_v6  ;;  %v1392_v59 = vsel %vm804_vm2, %v1390_v50, %v1391_v61  ;;  %v1394_v42 = vsel %vm804_vm2, %v1391_v61, %v1393_v8 }
  0xde   : > { %v1397_v14 = vsel %vm804_vm2, %v1395_v52, %v1396_v55  ;;  %v1399_v49 = vsel %vm804_vm2, %v1396_v55, %v1398_v51  ;;  %v1402_v24 = vsel %vm804_vm2, %v1400_v53, %v1401_v43  ;;  %v1404_v34 = vsel %vm804_vm2, %v1401_v43, %v1403_v54 }
  0xdf   : > { %v1407_v20 = vsel %vm804_vm2, %v1405_v12, %v1406_v48  ;;  %v1411_v62 = vrot.slane %v5009_v58, 2  ;;  %v1413_v39 = vrot.slane %v5016_v2, 2  ;;  %v1415_v56 = vrot.slane %v5023_v1, 2 }
  0xe0   : > { %v1409_v7 = vsel %vm804_vm2, %v1406_v48, %v1408_v26  ;;  %v1416_v22 = vrot.slane %v5030_v35, 2  ;;  %v1418_v6 = vrot.slane %v5037_v25, 2  ;;  %v1420_v50 = vrot.slane %v5044_v33, 2 }
  0xe1   : > { %v1421_v61 = vrot.slane %v5051_v60, 2  ;;  %v1425_v8 = vrot.slane %v5065_v45, 2  ;;  %v1426_v58 = vrot.slane %v5072_v37, 2  ;;  %v1428_v2 = vrot.slane %v5079_v10, 2 }
  0xe2   : > { %v1430_v1 = vrot.slane %v5086_v57, 2  ;;  %v1431_v52 = vrot.slane %v5093_v19, 2  ;;  %v1433_v35 = vrot.slane %v5103_v46, 2  ;;  %v1412_v25 = vsel %vm804_vm2, %v1410_v30, %v1411_v62 }
  0xe3   : > { %v1435_v33 = vrot.slane %v5113_v38, 2  ;;  %v1436_v60 = vrot.slane %v5120_v40, 2  ;;  %v1438_v28 = vrot.slane %v5127_v5, 2  ;;  %v1414_v45 = vsel %vm804_vm2, %v1411_v62, %v1413_v39  ;;  %v7288_v62 = vld [vmem:[#allocation5_spill] sm:$0xff] }
  0xe4   : > { %v1440_v37 = vrot.slane %v5131_v21, 2  ;;  %v1441_v10 = vrot.slane %v5135_v31, 2  ;;  %v1443_v57 = vrot.slane %v5139_v17, 2  ;;  %v1417_v19 = vsel %vm804_vm2, %v1415_v56, %v1416_v22 }
  0xe5   : > { %v1419_v46 = vsel %vm804_vm2, %v1416_v22, %v1418_v6  ;;  %v1422_v55 = vsel %vm804_vm2, %v1420_v50, %v1421_v61  ;;  %v1424_v38 = vsel %vm804_vm2, %v1421_v61, %v1423_v27  ;;  %v1427_v40 = vsel %vm804_vm2, %v1425_v8, %v1426_v58 }
  0xe6   : > { %v1429_v5 = vsel %vm804_vm2, %v1426_v58, %v1428_v2  ;;  %v1432_v51 = vsel %vm804_vm2, %v1430_v1, %v1431_v52  ;;  %v1434_v21 = vsel %vm804_vm2, %v1431_v52, %v1433_v35  ;;  %v1437_v31 = vsel %vm804_vm2, %v1435_v33, %v1436_v60  ;;  %v7307_v52 = vld [vmem:[#allocation24_spill] sm:$0xff] }
  0xe7   : > { %v1439_v17 = vsel %vm804_vm2, %v1436_v60, %v1438_v28  ;;  %v5223_v53 = vadd.f32 %v5144_v63, %v4712_v44  ;;  %v5227_v43 = vadd.f32 %v5147_v47, %v4716_v15  ;;  %v1442_v54 = vsel %vm804_vm2, %v1440_v37, %v1441_v10  ;;  %v7287_v63 = vld [vmem:[#allocation34_spill] sm:$0xff]  ;;  %v7311_v60 = vld [vmem:[#allocation27_spill] sm:$0xff] }
  0xe8   : > { %v1444_v12 = vsel %vm804_vm2, %v1441_v10, %v1443_v57  ;;  %v5233_v48 = vadd.f32 %v5152_v9, %v4722_v41  ;;  %v5237_v26 = vadd.f32 %v5155_v13, %v4726_v23  ;;  %v5240_v30 = vadd.f32 %v1377_v3, %v4729_v29  ;;  %v7289_v41 = vld [vmem:[#allocation6_spill] sm:$0xff]  ;;  %v7290_v23 = vld [vmem:[#allocation7_spill] sm:$0xff]  ;;  %v7291_v29 = vld [vmem:[#allocation8_spill] sm:$0xff] }
  0xe9   : > { %v5243_v44 = vadd.f32 %v1379_v11, %v4732_v36  ;;  %v5246_v15 = vadd.f32 %v1382_v0, %v4735_v4  ;;  %v5249_v47 = vadd.f32 %v1384_v18, %v7287_v63  ;;  %v5252_v39 = vadd.f32 %v1387_v32, %v7288_v62  ;;  %v7292_v36 = vld [vmem:[#allocation9_spill] sm:$0xff]  ;;  %v7293_v4 = vld [vmem:[#allocation10_spill] sm:$0xff]  ;;  %v7294_v18 = vld [vmem:[#allocation11_spill] sm:$0xff] }
  0xea   : > { %v5255_v9 = vadd.f32 %v1389_v16, %v7289_v41  ;;  %v5258_v13 = vadd.f32 %v1392_v59, %v7290_v23  ;;  %v5261_v3 = vadd.f32 %v1394_v42, %v7291_v29  ;;  %v5264_v11 = vadd.f32 %v1397_v14, %v7292_v36  ;;  %v7295_v32 = vld [vmem:[#allocation12_spill] sm:$0xff]  ;;  %v7296_v16 = vld [vmem:[#allocation13_spill] sm:$0xff]  ;;  %v7297_v59 = vld [vmem:[#allocation14_spill] sm:$0xff] }
  0xeb   : > { %v5267_v0 = vadd.f32 %v1399_v49, %v7293_v4  ;;  %v5270_v56 = vadd.f32 %v1402_v24, %v7294_v18  ;;  %v5273_v22 = vadd.f32 %v1404_v34, %v7295_v32  ;;  %v5276_v6 = vadd.f32 %v1407_v20, %v7296_v16  ;;  %v7298_v42 = vld [vmem:[#allocation15_spill] sm:$0xff]  ;;  %v7299_v14 = vld [vmem:[#allocation17_spill] sm:$0xff]  ;;  %v7300_v49 = vld [vmem:[#allocation18_spill] sm:$0xff] }
  0xec   : > { %v5279_v50 = vadd.f32 %v1409_v7, %v7297_v59  ;;  %v5282_v61 = vadd.f32 %v1412_v25, %v7298_v42  ;;  %v5285_v27 = vadd.f32 %v1414_v45, %v7299_v14  ;;  %v5288_v8 = vadd.f32 %v1417_v19, %v7300_v49  ;;  %v7301_v24 = vld [vmem:[#allocation19_spill] sm:$0xff]  ;;  %v7303_v34 = vld [vmem:[#allocation22_spill] sm:$0xff]  ;;  %v7313_v45 = vld [vmem:[#allocation28_spill] sm:$0xff] }
  0xed   : > { %v5291_v58 = vadd.f32 %v1419_v46, %v7301_v24  ;;  %v5294_v2 = vadd.f32 %v1422_v55, %v7303_v34  ;;  %v7305_v20 = vld [vmem:[#allocation23_spill] sm:$0xff]  ;;  %v5303_v35 = vadd.f32 %v1427_v40, %v7307_v52  ;;  %v5309_v28 = vadd.f32 %v1432_v51, %v7311_v60  ;;  %v7315_v10 = vld [vmem:[#allocation36_spill] sm:$0xff]  ;;  %v7319_v55 = vld [vmem:[#allocation33_spill] sm:$0xff] }
  0xee   : > { %v5297_v1 = vadd.f32 %v1424_v38, %v7305_v20  ;;  %v3040_v7 = vld [vmem:[%s6675_s1 + $0x8] ss:$0 sm:$0xff]  ;;  %v5312_v37 = vadd.f32 %v1434_v21, %v7313_v45  ;;  %v5315_v57 = vadd.f32 %v1437_v31, %v7315_v10  ;;  %v7317_v19 = vld [vmem:[#allocation32_spill] sm:$0xff]  ;;  %v5321_v38 = vadd.f32 %v1442_v54, %v7319_v55  ;;  %v7321_v40 = vld [vmem:[#allocation45_spill] sm:$0xff] }
  0xef   : > { %7302 = vst [vmem:[#allocation25_spill] sm:$0xff] %v5291_v58  ;;  %7304 = vst [vmem:[#allocation26_spill] sm:$0xff] %v5294_v2  ;;  %v7309_v25 = vld [vmem:[#allocation31_spill] sm:$0xff]  ;;  %v5318_v46 = vadd.f32 %v1439_v17, %v7317_v19  ;;  %v5324_v63 = vadd.f32 %v1444_v12, %v7321_v40  ;;  %v7324_v41 = vld [vmem:[#allocation38_spill] sm:$0xff] }
  0xf0   : > { %7306 = vst [vmem:[#allocation29_spill] sm:$0xff] %v5297_v1  ;;  %7308 = vst [vmem:[#allocation34_spill] sm:$0xff] %v5303_v35  ;;  %v5306_v33 = vadd.f32 %v1429_v5, %v7309_v25  ;;  %v7323_v5 = vld [vmem:[#allocation37_spill] sm:$0xff]  ;;  %v1516_v51 = vmul.f32 %v7324_v41, %v3040_v7  ;;  %v7326_v29 = vld [vmem:[#allocation42_spill] sm:$0xff] }
  0xf1   : > { %7312 = vst [vmem:[#allocation6_spill] sm:$0xff] %v5309_v28  ;;  %7314 = vst [vmem:[#allocation7_spill] sm:$0xff] %v5312_v37  ;;  %v1515_v62 = vmul.f32 %v7323_v5, %v3040_v7  ;;  %v7325_v23 = vld [vmem:[#allocation41_spill] sm:$0xff]  ;;  %v1518_v36 = vmul.f32 %v7326_v29, %v3040_v7  ;;  %v7327_v31 = vld [vmem:[#allocation46_spill] sm:$0xff] }
  0xf2   : > { %7310 = vst [vmem:[#allocation5_spill] sm:$0xff] %v5306_v33  ;;  %7316 = vst [vmem:[#allocation8_spill] sm:$0xff] %v5315_v57  ;;  %v1517_v21 = vmul.f32 %v7325_v23, %v3040_v7  ;;  %v1519_v4 = vmul.f32 %v7327_v31, %v3040_v7  ;;  %v7328_v18 = vld [vmem:[#allocation47_spill] sm:$0xff]  ;;  %v7330_v54 = vld [vmem:[#allocation52_spill] sm:$0xff]  ;;  %v5368_v58 = vadd.f32 %v1516_v51, %v5227_v43 }
  0xf3   : > { %7318 = vst [vmem:[#allocation9_spill] sm:$0xff] %v5318_v46  ;;  %7320 = vst [vmem:[#allocation10_spill] sm:$0xff] %v5321_v38  ;;  %v1520_v17 = vmul.f32 %v7328_v18, %v3040_v7  ;;  %v7329_v32 = vld [vmem:[#allocation51_spill] sm:$0xff]  ;;  %v1522_v59 = vmul.f32 %v7330_v54, %v3040_v7  ;;  %v7331_v42 = vld [vmem:[#allocation57_spill] sm:$0xff] }
  0xf4   : > { %7322 = vst [vmem:[#allocation11_spill] sm:$0xff] %v5324_v63  ;;  %v1521_v16 = vmul.f32 %v7329_v32, %v3040_v7  ;;  %v1523_v12 = vmul.f32 %v7331_v42, %v3040_v7  ;;  %v7332_v14 = vld [vmem:[#allocation72_spill] sm:$0xff]  ;;  %v7333_v24 = vld [vmem:[#allocation73_spill] sm:$0xff]  ;;  %v7334_v20 = vld [vmem:[#allocation66_spill] sm:$0xff] }
  0xf5   : > { %v1524_v49 = vmul.f32 %v7332_v14, %v3040_v7  ;;  %v1525_v34 = vmul.f32 %v7333_v24, %v3040_v7  ;;  %v1526_v52 = vmul.f32 %v7334_v20, %v3040_v7  ;;  %v7335_v25 = vld [vmem:[#allocation74_spill] sm:$0xff]  ;;  %v7336_v45 = vld [vmem:[#allocation40_spill] sm:$0xff]  ;;  %v5343_v32 = vld [vmem:[%s3274_s16 + $0x198] sm:$0xff] }
  0xf6   : > { %v1527_v60 = vmul.f32 %v7335_v25, %v3040_v7  ;;  %v1528_v10 = vmul.f32 %v7336_v45, %v3040_v7  ;;  %v7337_v19 = vld [vmem:[#allocation44_spill] sm:$0xff]  ;;  %7339 = vst [vmem:[#allocation12_spill] sm:$0xff] %v5343_v32  ;;  %v7340_v54 = vld [vmem:[#allocation53_spill] sm:$0xff]  ;;  %v7341_v42 = vld [vmem:[#allocation54_spill] sm:$0xff]  ;;  %v5389_v43 = vadd.f32 %v1523_v12, %v5252_v39 }
  0xf7   : > { %v1529_v55 = vmul.f32 %v7337_v19, %v3040_v7  ;;  %v7338_v40 = vld [vmem:[#allocation48_spill] sm:$0xff]  ;;  %v1531_v31 = vmul.f32 %v7340_v54, %v3040_v7  ;;  %v1532_v29 = vmul.f32 %v7341_v42, %v3040_v7  ;;  %v7342_v14 = vld [vmem:[#allocation59_spill] sm:$0xff]  ;;  %v7345_v63 = vld [vmem:[#allocation69_spill] sm:$0xff] }
  0xf8   : > { %v1530_v18 = vmul.f32 %v7338_v40, %v3040_v7  ;;  %v1533_v23 = vmul.f32 %v7342_v14, %v3040_v7  ;;  %v7343_v41 = vld [vmem:[#allocation63_spill] sm:$0xff]  ;;  %v7344_v5 = vld [vmem:[#allocation68_spill] sm:$0xff]  ;;  %v1536_v25 = vmul.f32 %v7345_v63, %v3040_v7  ;;  %v5354_v57 = vld [vmem:[%s3274_s16 + $0x1a0] sm:$0xff]  ;;  %v1545_v63 = vmul.f32 %v3040_v7, %v5343_v32  ;;  %7357 = vst [vmem:[#allocation17_spill] sm:$0xff] %v5389_v43 }
  0xf9   : > { %v1534_v24 = vmul.f32 %v7343_v41, %v3040_v7  ;;  %v1535_v20 = vmul.f32 %v7344_v5, %v3040_v7  ;;  %v7346_v38 = vld [vmem:[#allocation71_spill] sm:$0xff]  ;;  %v7347_v46 = vld [vmem:[#allocation56_spill] sm:$0xff]  ;;  %7348 = vst [vmem:[#allocation13_spill] sm:$0xff] %v5354_v57  ;;  %v7349_v40 = vld [vmem:[#allocation2_spill] sm:$0xff] }
  0xfa   : > { %v1537_v45 = vmul.f32 %v7346_v38, %v3040_v7  ;;  %v1538_v19 = vmul.f32 %v7347_v46, %v3040_v7  ;;  %v1539_v37 = vmul.f32 %v7349_v40, %v3040_v7  ;;  %v7350_v28 = vld [vmem:[#allocation3_spill] sm:$0xff]  ;;  %v7351_v33 = vld [vmem:[#allocation16_spill] sm:$0xff]  ;;  %v1546_v38 = vmul.f32 %v3040_v7, %v5354_v57  ;;  %v7388_v12 = vld [vmem:[#allocation10_spill] sm:$0xff] }
  0xfb   : > { %v1540_v54 = vmul.f32 %v7350_v28, %v3040_v7  ;;  %v1541_v42 = vmul.f32 %v7351_v33, %v3040_v7  ;;  %v7352_v35 = vld [vmem:[#allocation20_spill] sm:$0xff]  ;;  %v7353_v1 = vld [vmem:[#allocation35_spill] sm:$0xff]  ;;  %v5365_v46 = vadd.f32 %v1515_v62, %v5223_v53  ;;  %v5371_v28 = vadd.f32 %v1517_v21, %v5233_v48 }
  0xfc   : > { %v1542_v14 = vmul.f32 %v7352_v35, %v3040_v7  ;;  %v1543_v41 = vmul.f32 %v3040_v7, %v7353_v1  ;;  %v7354_v2 = vld [vmem:[#allocation39_spill] sm:$0xff]  ;;  %v5374_v33 = vadd.f32 %v1518_v36, %v5237_v26  ;;  %v5377_v1 = vadd.f32 %v1519_v4, %v5240_v30 }
  0xfd   : > { %v1544_v5 = vmul.f32 %v3040_v7, %v7354_v2  ;;  %v5380_v2 = vadd.f32 %v1520_v17, %v5243_v44  ;;  %v5383_v7 = vadd.f32 %v1521_v16, %v5246_v15  ;;  %v5386_v53 = vadd.f32 %v1522_v59, %v5249_v47  ;;  %v7386_v16 = vld [vmem:[#allocation9_spill] sm:$0xff]  ;;  %v7433_v43 = vld [vmem:[#allocation35_spill] sm:$0xff] }
  0xfe   : > { %v5392_v48 = vadd.f32 %v1524_v49, %v5255_v9  ;;  %v5395_v26 = vadd.f32 %v1525_v34, %v5258_v13  ;;  %v5398_v30 = vadd.f32 %v1526_v52, %v5261_v3  ;;  %v5401_v44 = vadd.f32 %v1527_v60, %v5264_v11 }
  0xff   : > { %7355 = vst [vmem:[#allocation14_spill] sm:$0xff] %v5383_v7  ;;  %7356 = vst [vmem:[#allocation15_spill] sm:$0xff] %v5386_v53  ;;  %v5404_v15 = vadd.f32 %v1528_v10, %v5267_v0  ;;  %v5407_v47 = vadd.f32 %v1529_v55, %v5270_v56  ;;  %v5410_v39 = vadd.f32 %v1530_v18, %v5273_v22  ;;  %v7370_v56 = vld [vmem:[#allocation25_spill] sm:$0xff]  ;;  %v7372_v22 = vld [vmem:[#allocation26_spill] sm:$0xff] }
 0x100   : > { %7358 = vst [vmem:[#allocation18_spill] sm:$0xff] %v5392_v48  ;;  %7359 = vst [vmem:[#allocation19_spill] sm:$0xff] %v5395_v26  ;;  %v5413_v9 = vadd.f32 %v1531_v31, %v5276_v6  ;;  %v5416_v13 = vadd.f32 %v1532_v29, %v5279_v50  ;;  %v5419_v3 = vadd.f32 %v1533_v23, %v5282_v61  ;;  %v7374_v6 = vld [vmem:[#allocation29_spill] sm:$0xff]  ;;  %v5439_v50 = vld [vmem:[%s6675_s1 + $0x9] ss:$0 sm:$0xff] }
 0x101   : > { %7360 = vst [vmem:[#allocation22_spill] sm:$0xff] %v5398_v30  ;;  %7361 = vst [vmem:[#allocation23_spill] sm:$0xff] %v5401_v44  ;;  %v5422_v11 = vadd.f32 %v1534_v24, %v5285_v27  ;;  %v5425_v0 = vadd.f32 %v1535_v20, %v5288_v8  ;;  %v5428_v62 = vadd.f32 %v1536_v25, %v7370_v56  ;;  %v7376_v61 = vld [vmem:[#allocation34_spill] sm:$0xff]  ;;  %v7378_v23 = vld [vmem:[#allocation5_spill] sm:$0xff] }
 0x102   : > { %7362 = vst [vmem:[#allocation24_spill] sm:$0xff] %v5404_v15  ;;  %7363 = vst [vmem:[#allocation31_spill] sm:$0xff] %v5407_v47  ;;  %v5431_v51 = vadd.f32 %v1537_v45, %v7372_v22  ;;  %v5434_v21 = vadd.f32 %v1538_v19, %v7374_v6  ;;  %v5442_v27 = vadd.f32 %v1539_v37, %v7376_v61  ;;  %v7380_v29 = vld [vmem:[#allocation6_spill] sm:$0xff]  ;;  %v7382_v31 = vld [vmem:[#allocation7_spill] sm:$0xff] }
 0x103   : > { %7364 = vst [vmem:[#allocation27_spill] sm:$0xff] %v5410_v39  ;;  %7365 = vst [vmem:[#allocation28_spill] sm:$0xff] %v5413_v9  ;;  %v5445_v8 = vadd.f32 %v1540_v54, %v7378_v23  ;;  %v5448_v36 = vadd.f32 %v1541_v42, %v7380_v29  ;;  %v5451_v4 = vadd.f32 %v1542_v14, %v7382_v31  ;;  %v7384_v18 = vld [vmem:[#allocation8_spill] sm:$0xff]  ;;  %v7390_v37 = vld [vmem:[#allocation11_spill] sm:$0xff] }
 0x104   : > { %7366 = vst [vmem:[#allocation36_spill] sm:$0xff] %v5416_v13  ;;  %7367 = vst [vmem:[#allocation32_spill] sm:$0xff] %v5419_v3  ;;  %v5454_v17 = vadd.f32 %v1543_v41, %v7384_v18  ;;  %v5457_v59 = vadd.f32 %v1544_v5, %v7386_v16  ;;  %v5460_v49 = vadd.f32 %v1545_v63, %v7388_v12  ;;  %v7392_v54 = vld [vmem:[#allocation37_spill] sm:$0xff]  ;;  %v7393_v42 = vld [vmem:[#allocation38_spill] sm:$0xff] }
 0x105   : > { %7368 = vst [vmem:[#allocation33_spill] sm:$0xff] %v5422_v11  ;;  %7369 = vst [vmem:[#allocation45_spill] sm:$0xff] %v5425_v0  ;;  %v5463_v24 = vadd.f32 %v1546_v38, %v7390_v37  ;;  %v1584_v34 = vmul.f32 %v7392_v54, %v5439_v50  ;;  %v1585_v20 = vmul.f32 %v7393_v42, %v5439_v50  ;;  %v7394_v14 = vld [vmem:[#allocation50_spill] sm:$0xff]  ;;  %v7395_v41 = vld [vmem:[#allocation41_spill] sm:$0xff] }
 0x106   : > { %7371 = vst [vmem:[#allocation25_spill] sm:$0xff] %v5428_v62  ;;  %7373 = vst [vmem:[#allocation26_spill] sm:$0xff] %v5431_v51  ;;  %v1586_v52 = vmul.f32 %v7394_v14, %v5439_v50  ;;  %v1587_v25 = vmul.f32 %v7395_v41, %v5439_v50  ;;  %v7396_v5 = vld [vmem:[#allocation42_spill] sm:$0xff]  ;;  %v7397_v63 = vld [vmem:[#allocation55_spill] sm:$0xff] }
 0x107   : > { %7375 = vst [vmem:[#allocation29_spill] sm:$0xff] %v5434_v21  ;;  %7377 = vst [vmem:[#allocation34_spill] sm:$0xff] %v5442_v27  ;;  %v1588_v60 = vmul.f32 %v7396_v5, %v5439_v50  ;;  %v1589_v45 = vmul.f32 %v7397_v63, %v5439_v50  ;;  %v7398_v38 = vld [vmem:[#allocation46_spill] sm:$0xff]  ;;  %v7399_v19 = vld [vmem:[#allocation47_spill] sm:$0xff]  ;;  %v1681_v15 = vrot.slane %v1585_v20, 1  ;;  %v5638_v20 = vmul.f32 %v5439_v50, %v5343_v32 }
 0x108   : > { %7379 = vst [vmem:[#allocation5_spill] sm:$0xff] %v5445_v8  ;;  %7381 = vst [vmem:[#allocation6_spill] sm:$0xff] %v5448_v36  ;;  %v5479_v10 = vmul.f32 %v7398_v38, %v5439_v50  ;;  %v5483_v55 = vmul.f32 %v7399_v19, %v5439_v50  ;;  %v7400_v56 = vld [vmem:[#allocation60_spill] sm:$0xff]  ;;  %v7401_v6 = vld [vmem:[#allocation51_spill] sm:$0xff]  ;;  %v1683_v44 = vrot.slane %v1586_v52, 1  ;;  %v1685_v26 = vrot.slane %v1587_v25, 1 }
 0x109   : > { %7383 = vst [vmem:[#allocation7_spill] sm:$0xff] %v5451_v4  ;;  %7385 = vst [vmem:[#allocation8_spill] sm:$0xff] %v5454_v17  ;;  %v5487_v22 = vmul.f32 %v7400_v56, %v5439_v50  ;;  %v5491_v61 = vmul.f32 %v7401_v6, %v5439_v50  ;;  %v7402_v23 = vld [vmem:[#allocation52_spill] sm:$0xff]  ;;  %v7403_v31 = vld [vmem:[#allocation65_spill] sm:$0xff]  ;;  %v1688_v48 = vrot.slane %v1589_v45, 1  ;;  %v5642_v52 = vmul.f32 %v5439_v50, %v5354_v57 }
 0x10a   : > { %7387 = vst [vmem:[#allocation9_spill] sm:$0xff] %v5457_v59  ;;  %7389 = vst [vmem:[#allocation10_spill] sm:$0xff] %v5460_v49  ;;  %v5495_v29 = vmul.f32 %v7402_v23, %v5439_v50  ;;  %v5499_v18 = vmul.f32 %v7403_v31, %v5439_v50  ;;  %v7404_v16 = vld [vmem:[#allocation57_spill] sm:$0xff]  ;;  %v7405_v37 = vld [vmem:[#allocation72_spill] sm:$0xff]  ;;  %v1690_v25 = vrot.slane %v5479_v10, 1 }
 0x10b   : > { %7391 = vst [vmem:[#allocation11_spill] sm:$0xff] %v5463_v24  ;;  %v5503_v12 = vmul.f32 %v7404_v16, %v5439_v50  ;;  %v5507_v56 = vmul.f32 %v7405_v37, %v5439_v50  ;;  %v7406_v19 = vld [vmem:[#allocation61_spill] sm:$0xff]  ;;  %v7408_v63 = vld [vmem:[#allocation66_spill] sm:$0xff]  ;;  %v7409_v5 = vld [vmem:[#allocation67_spill] sm:$0xff]  ;;  %v1693_v45 = vrot.slane %v5487_v22, 1  ;;  %v1695_v32 = vrot.slane %v5491_v61, 1 }
 0x10c   : > { %v5511_v6 = vmul.f32 %v7406_v19, %v5439_v50  ;;  %v7407_v38 = vld [vmem:[#allocation73_spill] sm:$0xff]  ;;  %v5519_v31 = vmul.f32 %v7408_v63, %v5439_v50  ;;  %v5523_v16 = vmul.f32 %v7409_v5, %v5439_v50  ;;  %v7410_v41 = vld [vmem:[#allocation74_spill] sm:$0xff]  ;;  %v7411_v14 = vld [vmem:[#allocation40_spill] sm:$0xff]  ;;  %v1696_v10 = vrot.slane %v5495_v29, 1 }
 0x10d   : > { %v5515_v23 = vmul.f32 %v7407_v38, %v5439_v50  ;;  %v5527_v37 = vmul.f32 %v7410_v41, %v5439_v50  ;;  %v5531_v19 = vmul.f32 %v7411_v14, %v5439_v50  ;;  %v7412_v42 = vld [vmem:[#allocation43_spill] sm:$0xff]  ;;  %v7413_v54 = vld [vmem:[#allocation44_spill] sm:$0xff]  ;;  %v7415_v49 = vld [vmem:[#allocation49_spill] sm:$0xff] }
 0x10e   : > { %v5535_v38 = vmul.f32 %v7412_v42, %v5439_v50  ;;  %v5539_v63 = vmul.f32 %v7413_v54, %v5439_v50  ;;  %v7414_v24 = vld [vmem:[#allocation48_spill] sm:$0xff]  ;;  %v5547_v41 = vmul.f32 %v7415_v49, %v5439_v50  ;;  %v7416_v59 = vld [vmem:[#allocation53_spill] sm:$0xff]  ;;  %v7417_v17 = vld [vmem:[#allocation54_spill] sm:$0xff]  ;;  %v1706_v22 = vrot.slane %v5519_v31, 1 }
 0x10f   : > { %v5543_v5 = vmul.f32 %v7414_v24, %v5439_v50  ;;  %v5551_v14 = vmul.f32 %v7416_v59, %v5439_v50  ;;  %v5555_v42 = vmul.f32 %v7417_v17, %v5439_v50  ;;  %v7418_v54 = vld [vmem:[#allocation58_spill] sm:$0xff]  ;;  %v7419_v24 = vld [vmem:[#allocation59_spill] sm:$0xff]  ;;  %v7421_v59 = vld [vmem:[#allocation64_spill] sm:$0xff]  ;;  %v1710_v61 = vrot.slane %v5527_v37, 1 }
 0x110   : > { %v5559_v4 = vmul.f32 %v7418_v54, %v5439_v50  ;;  %v5563_v36 = vmul.f32 %v7419_v24, %v5439_v50  ;;  %v7420_v49 = vld [vmem:[#allocation63_spill] sm:$0xff]  ;;  %v5571_v27 = vmul.f32 %v7421_v59, %v5439_v50  ;;  %v7422_v21 = vld [vmem:[#allocation68_spill] sm:$0xff]  ;;  %v7423_v51 = vld [vmem:[#allocation69_spill] sm:$0xff]  ;;  %v1715_v29 = vrot.slane %v5539_v63, 1 }
 0x111   : > { %v5567_v8 = vmul.f32 %v7420_v49, %v5439_v50  ;;  %v5575_v17 = vmul.f32 %v7422_v21, %v5439_v50  ;;  %v5579_v54 = vmul.f32 %v7423_v51, %v5439_v50  ;;  %v7424_v62 = vld [vmem:[#allocation70_spill] sm:$0xff]  ;;  %v7425_v0 = vld [vmem:[#allocation71_spill] sm:$0xff]  ;;  %v7426_v11 = vld [vmem:[#allocation56_spill] sm:$0xff]  ;;  %v5599_v51 = vmul.f32 %v7349_v40, %v5439_v50 }
 0x112   : > { %v5583_v24 = vmul.f32 %v7424_v62, %v5439_v50  ;;  %v5587_v49 = vmul.f32 %v7425_v0, %v5439_v50  ;;  %v5591_v59 = vmul.f32 %v7426_v11, %v5439_v50  ;;  %v7427_v3 = vld [vmem:[#allocation62_spill] sm:$0xff]  ;;  %v7428_v13 = vld [vmem:[#allocation3_spill] sm:$0xff]  ;;  %v7429_v9 = vld [vmem:[#allocation4_spill] sm:$0xff]  ;;  %v1680_v40 = vrot.slane %v1584_v34, 1 }
 0x113   : > { %v5595_v21 = vmul.f32 %v7427_v3, %v5439_v50  ;;  %v5603_v62 = vmul.f32 %v7428_v13, %v5439_v50  ;;  %v5607_v0 = vmul.f32 %v7429_v9, %v5439_v50  ;;  %v7430_v39 = vld [vmem:[#allocation16_spill] sm:$0xff]  ;;  %v5614_v47 = vld [vmem:[%s3274_s16 + $0x1a8] sm:$0x3]  ;;  %v5618_v3 = vmul.f32 %v7352_v35, %v5439_v50  ;;  %v7432_v13 = vld [vmem:[#allocation21_spill] sm:$0xff] }
 0x114   : > { %v5611_v11 = vmul.f32 %v7430_v39, %v5439_v50  ;;  %7431 = vst [vmem:[#allocation75_spill] sm:$0xff] %v5614_v47  ;;  %v5622_v30 = vmul.f32 %v7432_v13, %v5439_v50  ;;  %v1686_v9 = vrot.slane %v1588_v60, 1  ;;  %v5626_v39 = vmul.f32 %v5439_v50, %v7433_v43  ;;  %v7434_v53 = vld [vmem:[#allocation39_spill] sm:$0xff]  ;;  %v7435_v35 = vld [vmem:[#allocation30_spill] sm:$0xff] }
 0x115   : > { %v5630_v7 = vmul.f32 %v5439_v50, %v7434_v53  ;;  %v5634_v34 = vmul.f32 %v5439_v50, %v7435_v35  ;;  %v5646_v43 = vmul.f32 %v5439_v50, %v5614_v47  ;;  %v1691_v53 = vrot.slane %v5483_v55, 1 }
 0x116   : > { %v5651_v60 = vsel %vm558_vm1, %v1680_v40, %v1681_v15  ;;  %v5654_v35 = vsel %vm558_vm1, %v1681_v15, %v1683_v44  ;;  %v5659_v57 = vsel %vm558_vm1, %v1685_v26, %v1686_v9  ;;  %v5662_v50 = vsel %vm558_vm1, %v1686_v9, %v1688_v48 }
 0x117   : > { %v1698_v55 = vrot.slane %v5499_v18, 1  ;;  %v1700_v40 = vrot.slane %v5503_v12, 1  ;;  %v1701_v47 = vrot.slane %v5507_v56, 1  ;;  %v1703_v44 = vrot.slane %v5511_v6, 1 }
 0x118   : > { %v1705_v15 = vrot.slane %v5515_v23, 1  ;;  %v1708_v26 = vrot.slane %v5523_v16, 1  ;;  %v1711_v48 = vrot.slane %v5531_v19, 1  ;;  %v1713_v9 = vrot.slane %v5535_v38, 1 }
 0x119   : > { %v1716_v18 = vrot.slane %v5543_v5, 1  ;;  %v1718_v56 = vrot.slane %v5547_v41, 1  ;;  %v1692_v6 = vsel %vm558_vm1, %v1690_v25, %v1691_v53  ;;  %v1694_v23 = vsel %vm558_vm1, %v1691_v53, %v1693_v45 }
 0x11a   : > { %v1720_v31 = vrot.slane %v5551_v14, 1  ;;  %v1721_v16 = vrot.slane %v5555_v42, 1  ;;  %v1697_v12 = vsel %vm558_vm1, %v1695_v32, %v1696_v10  ;;  %v1699_v19 = vsel %vm558_vm1, %v1696_v10, %v1698_v55 }
 0x11b   : > { %v1702_v38 = vsel %vm558_vm1, %v1700_v40, %v1701_v47  ;;  %v1723_v63 = vrot.slane %v5559_v4, 1  ;;  %v1704_v5 = vsel %vm558_vm1, %v1701_v47, %v1703_v44  ;;  %v1707_v41 = vsel %vm558_vm1, %v1705_v15, %v1706_v22 }
 0x11c   : > { %v1709_v37 = vsel %vm558_vm1, %v1706_v22, %v1708_v26  ;;  %v1712_v25 = vsel %vm558_vm1, %v1710_v61, %v1711_v48  ;;  %v1714_v14 = vsel %vm558_vm1, %v1711_v48, %v1713_v9  ;;  %v1717_v42 = vsel %vm558_vm1, %v1715_v29, %v1716_v18 }
 0x11d   : > { %v1719_v32 = vsel %vm558_vm1, %v1716_v18, %v1718_v56  ;;  %v1725_v53 = vrot.slane %v5563_v36, 1  ;;  %v1722_v45 = vsel %vm558_vm1, %v1720_v31, %v1721_v16  ;;  %v1726_v4 = vrot.slane %v5567_v8, 1 }
 0x11e   : > { %v1728_v47 = vrot.slane %v5571_v27, 1  ;;  %v1730_v10 = vrot.slane %v5575_v17, 1  ;;  %v1724_v55 = vsel %vm558_vm1, %v1721_v16, %v1723_v63  ;;  %v1731_v40 = vrot.slane %v5579_v54, 1 }
 0x11f   : > { %v1733_v44 = vrot.slane %v5583_v24, 1  ;;  %v1735_v15 = vrot.slane %v5587_v49, 1  ;;  %v1736_v22 = vrot.slane %v5591_v59, 1  ;;  %v1738_v36 = vrot.slane %v5595_v21, 1 }
 0x120   : > { %v1740_v26 = vrot.slane %v5599_v51, 1  ;;  %v1741_v8 = vrot.slane %v5603_v62, 1  ;;  %v1743_v27 = vrot.slane %v5607_v0, 1  ;;  %v1745_v17 = vrot.slane %v5611_v11, 1 }
 0x121   : > { %v1746_v61 = vrot.slane %v5618_v3, 1  ;;  %v1748_v54 = vrot.slane %v5622_v30, 1  ;;  %v1727_v24 = vsel %vm558_vm1, %v1725_v53, %v1726_v4  ;;  %v1750_v49 = vrot.slane %v5626_v39, 1 }
 0x122   : > { %v1751_v59 = vrot.slane %v5630_v7, 1  ;;  %v1753_v21 = vrot.slane %v5634_v34, 1  ;;  %v1729_v51 = vsel %vm558_vm1, %v1726_v4, %v1728_v47  ;;  %v1755_v62 = vrot.slane %v5638_v20, 1  ;;  %v7440_v47 = vld [vmem:[#allocation17_spill] sm:$0xff] }
 0x123   : > { %v1756_v0 = vrot.slane %v5642_v52, 1  ;;  %v1758_v11 = vrot.slane %v5646_v43, 1  ;;  %v1732_v3 = vsel %vm558_vm1, %v1730_v10, %v1731_v40  ;;  %v1734_v30 = vsel %vm558_vm1, %v1731_v40, %v1733_v44 }
 0x124   : > { %v1737_v48 = vsel %vm558_vm1, %v1735_v15, %v1736_v22  ;;  %v1739_v39 = vsel %vm558_vm1, %v1736_v22, %v1738_v36  ;;  %v1742_v7 = vsel %vm558_vm1, %v1740_v26, %v1741_v8  ;;  %v1744_v34 = vsel %vm558_vm1, %v1741_v8, %v1743_v27 }
 0x125   : > { %v1747_v9 = vsel %vm558_vm1, %v1745_v17, %v1746_v61  ;;  %v1749_v20 = vsel %vm558_vm1, %v1746_v61, %v1748_v54  ;;  %v1752_v52 = vsel %vm558_vm1, %v1750_v49, %v1751_v59  ;;  %v1754_v43 = vsel %vm558_vm1, %v1751_v59, %v1753_v21  ;;  %v7474_v59 = vld [vmem:[#allocation5_spill] sm:$0xff] }
 0x126   : > { %v5730_v29 = vadd.f32 %v5651_v60, %v5365_v46  ;;  %v5734_v18 = vadd.f32 %v5654_v35, %v5368_v58  ;;  %v1757_v56 = vsel %vm558_vm1, %v1755_v62, %v1756_v0  ;;  %v1759_v31 = vsel %vm558_vm1, %v1756_v0, %v1758_v11  ;;  %v7436_v58 = vld [vmem:[#allocation14_spill] sm:$0xff]  ;;  %v7438_v35 = vld [vmem:[#allocation15_spill] sm:$0xff] }
 0x127   : > { %v5740_v16 = vadd.f32 %v5659_v57, %v5371_v28  ;;  %v5744_v63 = vadd.f32 %v5662_v50, %v5374_v33  ;;  %v5747_v53 = vadd.f32 %v1692_v6, %v5377_v1  ;;  %v5750_v46 = vadd.f32 %v1694_v23, %v5380_v2  ;;  %v7442_v28 = vld [vmem:[#allocation18_spill] sm:$0xff]  ;;  %v7444_v33 = vld [vmem:[#allocation19_spill] sm:$0xff] }
 0x128   : > { %v5753_v60 = vadd.f32 %v1697_v12, %v7436_v58  ;;  %v5756_v4 = vadd.f32 %v1699_v19, %v7438_v35  ;;  %v5759_v10 = vadd.f32 %v1702_v38, %v7440_v47  ;;  %v5762_v57 = vadd.f32 %v1704_v5, %v7442_v28  ;;  %v7446_v1 = vld [vmem:[#allocation22_spill] sm:$0xff]  ;;  %v7448_v2 = vld [vmem:[#allocation23_spill] sm:$0xff]  ;;  %v7450_v12 = vld [vmem:[#allocation24_spill] sm:$0xff] }
 0x129   : > { %v5765_v50 = vadd.f32 %v1707_v41, %v7444_v33  ;;  %v5768_v6 = vadd.f32 %v1709_v37, %v7446_v1  ;;  %v5771_v23 = vadd.f32 %v1712_v25, %v7448_v2  ;;  %v5774_v40 = vadd.f32 %v1714_v14, %v7450_v12  ;;  %v7452_v19 = vld [vmem:[#allocation31_spill] sm:$0xff]  ;;  %v7456_v5 = vld [vmem:[#allocation28_spill] sm:$0xff]  ;;  %v7462_v25 = vld [vmem:[#allocation33_spill] sm:$0xff] }
 0x12a   : > { %7437 = vst [vmem:[#allocation21_spill] sm:$0xff] %v5753_v60  ;;  %7439 = vst [vmem:[#allocation35_spill] sm:$0xff] %v5756_v4  ;;  %v5777_v44 = vadd.f32 %v1717_v42, %v7452_v19  ;;  %v7454_v38 = vld [vmem:[#allocation27_spill] sm:$0xff]  ;;  %v5783_v22 = vadd.f32 %v1722_v45, %v7456_v5  ;;  %v7458_v41 = vld [vmem:[#allocation36_spill] sm:$0xff]  ;;  %v5792_v8 = vadd.f32 %v1729_v51, %v7462_v25 }
 0x12b   : > { %7441 = vst [vmem:[#allocation39_spill] sm:$0xff] %v5759_v10  ;;  %7443 = vst [vmem:[#allocation30_spill] sm:$0xff] %v5762_v57  ;;  %v5780_v15 = vadd.f32 %v1719_v32, %v7454_v38  ;;  %v5786_v36 = vadd.f32 %v1724_v55, %v7458_v41  ;;  %v7460_v37 = vld [vmem:[#allocation32_spill] sm:$0xff]  ;;  %v7464_v14 = vld [vmem:[#allocation45_spill] sm:$0xff]  ;;  %v5815_v21 = vadd.f32 %v1744_v34, %v7474_v59 }
 0x12c   : > { %7445 = vst [vmem:[#allocation14_spill] sm:$0xff] %v5765_v50  ;;  %7447 = vst [vmem:[#allocation15_spill] sm:$0xff] %v5768_v6  ;;  %v5789_v26 = vadd.f32 %v1727_v24, %v7460_v37  ;;  %v5795_v27 = vadd.f32 %v1732_v3, %v7464_v14  ;;  %v7466_v42 = vld [vmem:[#allocation25_spill] sm:$0xff]  ;;  %v7468_v32 = vld [vmem:[#allocation26_spill] sm:$0xff] }
 0x12d   : > { %7449 = vst [vmem:[#allocation17_spill] sm:$0xff] %v5771_v23  ;;  %7451 = vst [vmem:[#allocation18_spill] sm:$0xff] %v5774_v40  ;;  %v5798_v17 = vadd.f32 %v1734_v30, %v7466_v42  ;;  %v5801_v61 = vadd.f32 %v1737_v48, %v7468_v32  ;;  %v7470_v45 = vld [vmem:[#allocation29_spill] sm:$0xff]  ;;  %v5809_v55 = vld [vmem:[%s6675_s1 + $0xa] ss:$0 sm:$0xff] }
 0x12e   : > { %7453 = vst [vmem:[#allocation19_spill] sm:$0xff] %v5777_v44  ;;  %7455 = vst [vmem:[#allocation22_spill] sm:$0xff] %v5780_v15  ;;  %v5804_v54 = vadd.f32 %v1739_v39, %v7470_v45  ;;  %v7472_v24 = vld [vmem:[#allocation34_spill] sm:$0xff]  ;;  %v7478_v0 = vld [vmem:[#allocation7_spill] sm:$0xff] }
 0x12f   : > { %7457 = vst [vmem:[#allocation23_spill] sm:$0xff] %v5783_v22  ;;  %7459 = vst [vmem:[#allocation24_spill] sm:$0xff] %v5786_v36  ;;  %v5812_v49 = vadd.f32 %v1742_v7, %v7472_v24  ;;  %v7476_v51 = vld [vmem:[#allocation6_spill] sm:$0xff]  ;;  %v5821_v11 = vadd.f32 %v1749_v20, %v7478_v0  ;;  %v7480_v3 = vld [vmem:[#allocation8_spill] sm:$0xff] }
 0x130   : > { %7461 = vst [vmem:[#allocation31_spill] sm:$0xff] %v5789_v26  ;;  %7463 = vst [vmem:[#allocation27_spill] sm:$0xff] %v5792_v8  ;;  %v5818_v62 = vadd.f32 %v1747_v9, %v7476_v51  ;;  %v5824_v30 = vadd.f32 %v1752_v52, %v7480_v3  ;;  %v7482_v48 = vld [vmem:[#allocation9_spill] sm:$0xff]  ;;  %v7484_v58 = vld [vmem:[#allocation10_spill] sm:$0xff] }
 0x131   : > { %7465 = vst [vmem:[#allocation28_spill] sm:$0xff] %v5795_v27  ;;  %7467 = vst [vmem:[#allocation36_spill] sm:$0xff] %v5798_v17  ;;  %v5827_v39 = vadd.f32 %v1754_v43, %v7482_v48  ;;  %v5830_v35 = vadd.f32 %v1757_v56, %v7484_v58  ;;  %v7486_v7 = vld [vmem:[#allocation11_spill] sm:$0xff]  ;;  %v7488_v34 = vld [vmem:[#allocation37_spill] sm:$0xff] }
 0x132   : > { %7469 = vst [vmem:[#allocation32_spill] sm:$0xff] %v5801_v61  ;;  %7471 = vst [vmem:[#allocation33_spill] sm:$0xff] %v5804_v54  ;;  %v5833_v47 = vadd.f32 %v1759_v31, %v7486_v7  ;;  %v5837_v28 = vmul.f32 %v7488_v34, %v5809_v55  ;;  %v7489_v9 = vld [vmem:[#allocation38_spill] sm:$0xff]  ;;  %v7491_v43 = vld [vmem:[#allocation41_spill] sm:$0xff] }
 0x133   : > { %7473 = vst [vmem:[#allocation45_spill] sm:$0xff] %v5812_v49  ;;  %7475 = vst [vmem:[#allocation25_spill] sm:$0xff] %v5815_v21  ;;  %v5841_v20 = vmul.f32 %v7489_v9, %v5809_v55  ;;  %v7490_v52 = vld [vmem:[#allocation50_spill] sm:$0xff]  ;;  %v5849_v1 = vmul.f32 %v7491_v43, %v5809_v55  ;;  %v7493_v2 = vld [vmem:[#allocation55_spill] sm:$0xff] }
 0x134   : > { %7477 = vst [vmem:[#allocation26_spill] sm:$0xff] %v5818_v62  ;;  %7479 = vst [vmem:[#allocation29_spill] sm:$0xff] %v5821_v11  ;;  %v5845_v33 = vmul.f32 %v7490_v52, %v5809_v55  ;;  %v7492_v56 = vld [vmem:[#allocation42_spill] sm:$0xff]  ;;  %v5857_v12 = vmul.f32 %v7493_v2, %v5809_v55  ;;  %v7495_v5 = vld [vmem:[#allocation47_spill] sm:$0xff]  ;;  %v1925_v40 = vrot.slane %v5837_v28, 2 }
 0x135   : > { %7481 = vst [vmem:[#allocation34_spill] sm:$0xff] %v5824_v30  ;;  %7483 = vst [vmem:[#allocation5_spill] sm:$0xff] %v5827_v39  ;;  %v5853_v31 = vmul.f32 %v7492_v56, %v5809_v55  ;;  %v7494_v19 = vld [vmem:[#allocation46_spill] sm:$0xff]  ;;  %v5865_v41 = vmul.f32 %v7495_v5, %v5809_v55  ;;  %v7496_v37 = vld [vmem:[#allocation60_spill] sm:$0xff] }
 0x136   : > { %7485 = vst [vmem:[#allocation6_spill] sm:$0xff] %v5830_v35  ;;  %7487 = vst [vmem:[#allocation7_spill] sm:$0xff] %v5833_v47  ;;  %v5861_v38 = vmul.f32 %v7494_v19, %v5809_v55  ;;  %v5869_v25 = vmul.f32 %v7496_v37, %v5809_v55  ;;  %v7497_v14 = vld [vmem:[#allocation51_spill] sm:$0xff]  ;;  %v7498_v32 = vld [vmem:[#allocation52_spill] sm:$0xff]  ;;  %v1928_v23 = vrot.slane %v5845_v33, 2 }
 0x137   : > { %v5873_v42 = vmul.f32 %v7497_v14, %v5809_v55  ;;  %v5877_v45 = vmul.f32 %v7498_v32, %v5809_v55  ;;  %v7499_v24 = vld [vmem:[#allocation65_spill] sm:$0xff]  ;;  %v7501_v3 = vld [vmem:[#allocation72_spill] sm:$0xff]  ;;  %v7504_v52 = vld [vmem:[#allocation66_spill] sm:$0xff]  ;;  %v1931_v6 = vrot.slane %v5853_v31, 2 }
 0x138   : > { %v5881_v59 = vmul.f32 %v7499_v24, %v5809_v55  ;;  %v7500_v51 = vld [vmem:[#allocation57_spill] sm:$0xff]  ;;  %v5889_v48 = vmul.f32 %v7501_v3, %v5809_v55  ;;  %v5901_v43 = vmul.f32 %v7504_v52, %v5809_v55  ;;  %v7505_v56 = vld [vmem:[#allocation67_spill] sm:$0xff]  ;;  %v7506_v19 = vld [vmem:[#allocation74_spill] sm:$0xff]  ;;  %v1935_v50 = vrot.slane %v5861_v38, 2 }
 0x139   : > { %v5885_v0 = vmul.f32 %v7500_v51, %v5809_v55  ;;  %v7502_v58 = vld [vmem:[#allocation61_spill] sm:$0xff]  ;;  %v5905_v2 = vmul.f32 %v7505_v56, %v5809_v55  ;;  %v5909_v5 = vmul.f32 %v7506_v19, %v5809_v55  ;;  %v7507_v37 = vld [vmem:[#allocation40_spill] sm:$0xff]  ;;  %v7508_v32 = vld [vmem:[#allocation43_spill] sm:$0xff]  ;;  %v1938_v28 = vrot.slane %v5869_v25, 2 }
 0x13a   : > { %v5893_v7 = vmul.f32 %v7502_v58, %v5809_v55  ;;  %v7503_v34 = vld [vmem:[#allocation73_spill] sm:$0xff]  ;;  %v5913_v14 = vmul.f32 %v7507_v37, %v5809_v55  ;;  %v5917_v24 = vmul.f32 %v7508_v32, %v5809_v55  ;;  %v7509_v51 = vld [vmem:[#allocation44_spill] sm:$0xff]  ;;  %v7513_v47 = vld [vmem:[#allocation54_spill] sm:$0xff]  ;;  %v1941_v33 = vrot.slane %v5877_v45, 2 }
 0x13b   : > { %v5897_v9 = vmul.f32 %v7503_v34, %v5809_v55  ;;  %v5921_v3 = vmul.f32 %v7509_v51, %v5809_v55  ;;  %v7510_v58 = vld [vmem:[#allocation48_spill] sm:$0xff]  ;;  %v7511_v52 = vld [vmem:[#allocation49_spill] sm:$0xff]  ;;  %v5937_v32 = vmul.f32 %v7513_v47, %v5809_v55  ;;  %v7514_v35 = vld [vmem:[#allocation58_spill] sm:$0xff]  ;;  %v1943_v31 = vrot.slane %v5881_v59, 2 }
 0x13c   : > { %v5925_v34 = vmul.f32 %v7510_v58, %v5809_v55  ;;  %v5929_v56 = vmul.f32 %v7511_v52, %v5809_v55  ;;  %v7512_v19 = vld [vmem:[#allocation53_spill] sm:$0xff]  ;;  %v5941_v51 = vmul.f32 %v7514_v35, %v5809_v55  ;;  %v7515_v39 = vld [vmem:[#allocation59_spill] sm:$0xff]  ;;  %v7518_v47 = vld [vmem:[#allocation68_spill] sm:$0xff]  ;;  %v1946_v38 = vrot.slane %v5889_v48, 2 }
 0x13d   : > { %v5933_v37 = vmul.f32 %v7512_v19, %v5809_v55  ;;  %v5945_v58 = vmul.f32 %v7515_v39, %v5809_v55  ;;  %v7516_v52 = vld [vmem:[#allocation63_spill] sm:$0xff]  ;;  %v7517_v19 = vld [vmem:[#allocation64_spill] sm:$0xff]  ;;  %v5957_v62 = vmul.f32 %v7518_v47, %v5809_v55  ;;  %v7519_v35 = vld [vmem:[#allocation69_spill] sm:$0xff]  ;;  %v1948_v45 = vrot.slane %v5893_v7, 2 }
 0x13e   : > { %v5949_v30 = vmul.f32 %v7516_v52, %v5809_v55  ;;  %v5953_v11 = vmul.f32 %v7517_v19, %v5809_v55  ;;  %v5961_v21 = vmul.f32 %v7519_v35, %v5809_v55  ;;  %v7520_v39 = vld [vmem:[#allocation70_spill] sm:$0xff]  ;;  %v7521_v52 = vld [vmem:[#allocation71_spill] sm:$0xff]  ;;  %v7522_v61 = vld [vmem:[#allocation56_spill] sm:$0xff] }
 0x13f   : > { %v5965_v49 = vmul.f32 %v7520_v39, %v5809_v55  ;;  %v5969_v54 = vmul.f32 %v7521_v52, %v5809_v55  ;;  %v5973_v19 = vmul.f32 %v7522_v61, %v5809_v55  ;;  %v7523_v17 = vld [vmem:[#allocation62_spill] sm:$0xff]  ;;  %v7525_v8 = vld [vmem:[#allocation3_spill] sm:$0xff]  ;;  %v7526_v26 = vld [vmem:[#allocation4_spill] sm:$0xff]  ;;  %v6064_v7 = vsel %vm804_vm2, %v1946_v38, %v1948_v45 }
 0x140   : > { %v5977_v47 = vmul.f32 %v7523_v17, %v5809_v55  ;;  %v7524_v27 = vld [vmem:[#allocation2_spill] sm:$0xff]  ;;  %v5985_v39 = vmul.f32 %v7525_v8, %v5809_v55  ;;  %v5989_v52 = vmul.f32 %v7526_v26, %v5809_v55  ;;  %v7527_v36 = vld [vmem:[#allocation16_spill] sm:$0xff]  ;;  %v3195_v44 = vld [vmem:[%s3274_s16 + $0x188] sm:$0xff] }
 0x141   : > { %v5981_v35 = vmul.f32 %v7524_v27, %v5809_v55  ;;  %v5993_v61 = vmul.f32 %v7527_v36, %v5809_v55  ;;  %v7528_v17 = vld [vmem:[#allocation20_spill] sm:$0xff]  ;;  %v6001_v27 = vmul.f32 %v7432_v13, %v5809_v55  ;;  %v3194_v15 = vld [vmem:[%s3274_s16 + $0x180] sm:$0xff]  ;;  %v6009_v26 = vmul.f32 %v3195_v44, %v5809_v55  ;;  %v7531_v4 = vld [vmem:[#allocation75_spill] sm:$0xff] }
 0x142   : > { %v5997_v22 = vmul.f32 %v7528_v17, %v5809_v55  ;;  %v6005_v8 = vmul.f32 %v3194_v15, %v5809_v55  ;;  %v1926_v36 = vrot.slane %v5841_v20, 2  ;;  %v1930_v17 = vrot.slane %v5849_v1, 2  ;;  %v3196_v57 = vld [vmem:[%s3274_s16 + $0x190] sm:$0x3] }
 0x143   : > { %v1933_v13 = vrot.slane %v5857_v12, 2  ;;  %v1936_v15 = vrot.slane %v5865_v41, 2  ;;  %v6021_v44 = vmul.f32 %v3196_v57, %v5809_v55  ;;  %v1940_v20 = vrot.slane %v5873_v42, 2  ;;  %v7529_v10 = vld [vmem:[#allocation12_spill] sm:$0xff]  ;;  %v7530_v41 = vld [vmem:[#allocation13_spill] sm:$0xff] }
 0x144   : > { %v6028_v1 = vmul.f32 %v5809_v55, %v7529_v10  ;;  %v1945_v12 = vrot.slane %v5885_v0, 2  ;;  %v6035_v57 = vmul.f32 %v5809_v55, %v7530_v41  ;;  %v6039_v25 = vmul.f32 %v5809_v55, %v7531_v4 }
 0x145   : > { %v1927_v42 = vsel %vm804_vm2, %v1925_v40, %v1926_v36  ;;  %v1929_v10 = vsel %vm804_vm2, %v1926_v36, %v1928_v23  ;;  %v1932_v59 = vsel %vm804_vm2, %v1930_v17, %v1931_v6  ;;  %v1934_v0 = vsel %vm804_vm2, %v1931_v6, %v1933_v13 }
 0x146   : > { %v1937_v48 = vsel %vm804_vm2, %v1935_v50, %v1936_v15  ;;  %v6048_v60 = vsel %vm804_vm2, %v1936_v15, %v1938_v28  ;;  %v6051_v41 = vsel %vm804_vm2, %v1940_v20, %v1941_v33  ;;  %v1950_v4 = vrot.slane %v5897_v9, 2 }
 0x147   : > { %v1951_v40 = vrot.slane %v5901_v43, 2  ;;  %v6056_v55 = vsel %vm804_vm2, %v1941_v33, %v1943_v31  ;;  %v6059_v23 = vsel %vm804_vm2, %v1945_v12, %v1946_v38  ;;  %v1953_v6 = vrot.slane %v5905_v2, 2 }
 0x148   : > { %v1955_v50 = vrot.slane %v5909_v5, 2  ;;  %v1956_v36 = vrot.slane %v5913_v14, 2  ;;  %v1958_v17 = vrot.slane %v5917_v24, 2  ;;  %v1960_v9 = vrot.slane %v5921_v3, 2 }
 0x149   : > { %v1961_v43 = vrot.slane %v5925_v34, 2  ;;  %v1963_v13 = vrot.slane %v5929_v56, 2  ;;  %v1965_v15 = vrot.slane %v5933_v37, 2  ;;  %v1966_v28 = vrot.slane %v5937_v32, 2 }
 0x14a   : > { %v1968_v2 = vrot.slane %v5941_v51, 2  ;;  %v1970_v5 = vrot.slane %v5945_v58, 2  ;;  %v1971_v20 = vrot.slane %v5949_v30, 2  ;;  %v1973_v14 = vrot.slane %v5953_v11, 2 }
 0x14b   : > { %v1952_v24 = vsel %vm804_vm2, %v1950_v4, %v1951_v40  ;;  %v1975_v3 = vrot.slane %v5957_v62, 2  ;;  %v1976_v34 = vrot.slane %v5961_v21, 2  ;;  %v1978_v56 = vrot.slane %v5965_v49, 2 }
 0x14c   : > { %v1954_v37 = vsel %vm804_vm2, %v1951_v40, %v1953_v6  ;;  %v1957_v32 = vsel %vm804_vm2, %v1955_v50, %v1956_v36  ;;  %v1980_v51 = vrot.slane %v5969_v54, 2  ;;  %v1981_v58 = vrot.slane %v5973_v19, 2 }
 0x14d   : > { %v1959_v30 = vsel %vm804_vm2, %v1956_v36, %v1958_v17  ;;  %v1962_v11 = vsel %vm804_vm2, %v1960_v9, %v1961_v43  ;;  %v1964_v33 = vsel %vm804_vm2, %v1961_v43, %v1963_v13  ;;  %v1967_v62 = vsel %vm804_vm2, %v1965_v15, %v1966_v28  ;;  %v7532_v13 = vld [vmem:[#allocation21_spill] sm:$0xff] }
 0x14e   : > { %v1969_v21 = vsel %vm804_vm2, %v1966_v28, %v1968_v2  ;;  %v1972_v49 = vsel %vm804_vm2, %v1970_v5, %v1971_v20  ;;  %v1974_v31 = vsel %vm804_vm2, %v1971_v20, %v1973_v14  ;;  %v1983_v12 = vrot.slane %v5977_v47, 2  ;;  %v7533_v28 = vld [vmem:[#allocation35_spill] sm:$0xff] }
 0x14f   : > { %v1977_v54 = vsel %vm804_vm2, %v1975_v3, %v1976_v34  ;;  %v1979_v19 = vsel %vm804_vm2, %v1976_v34, %v1978_v56  ;;  %v1985_v38 = vrot.slane %v5981_v35, 2  ;;  %v1986_v45 = vrot.slane %v5985_v39, 2  ;;  %v6108_v35 = vld [vmem:[%s6676_s2] ss:$0 sm:$0xff]  ;;  %v7534_v14 = vld [vmem:[#allocation39_spill] sm:$0xff] }
 0x150   : > { %v1982_v4 = vsel %vm804_vm2, %v1980_v51, %v1981_v58  ;;  %v2037_v40 = vadd.f32 %v1927_v42, %v5730_v29  ;;  %v2038_v6 = vadd.f32 %v1929_v10, %v5734_v18  ;;  %v2039_v50 = vadd.f32 %v1932_v59, %v5740_v16  ;;  %v7535_v34 = vld [vmem:[#allocation30_spill] sm:$0xff] }
 0x151   : > { %v1988_v36 = vrot.slane %v5989_v52, 2  ;;  %v1990_v47 = vrot.slane %v5993_v61, 2  ;;  %v1991_v17 = vrot.slane %v5997_v22, 2  ;;  %v1993_v9 = vrot.slane %v6001_v27, 2  ;;  %v7536_v51 = vld [vmem:[#allocation14_spill] sm:$0xff] }
 0x152   : > { %v1995_v39 = vrot.slane %v6005_v8, 2  ;;  %v1996_v29 = vrot.slane %v6009_v26, 2  ;;  %v1998_v18 = vrot.slane %v6021_v44, 2  ;;  %v2040_v16 = vadd.f32 %v1934_v0, %v5744_v63 }
 0x153   : > { %v1984_v52 = vsel %vm804_vm2, %v1981_v58, %v1983_v12  ;;  %v2000_v61 = vrot.slane %v6028_v1, 2  ;;  %v2001_v22 = vrot.slane %v6035_v57, 2  ;;  %v2003_v27 = vrot.slane %v6039_v25, 2  ;;  %v7537_v58 = vld [vmem:[#allocation15_spill] sm:$0xff] }
 0x154   : > { %v2041_v42 = vadd.f32 %v1937_v48, %v5747_v53  ;;  %v6120_v10 = vadd.f32 %v6108_v35, %v2037_v40  ;;  %v6123_v8 = vadd.f32 %v6108_v35, %v2038_v6  ;;  %v6126_v26 = vadd.f32 %v6108_v35, %v2039_v50 }
 0x155   : > { %v1987_v63 = vsel %vm804_vm2, %v1985_v38, %v1986_v45  ;;  %v1989_v44 = vsel %vm804_vm2, %v1986_v45, %v1988_v36  ;;  %v1992_v1 = vsel %vm804_vm2, %v1990_v47, %v1991_v17  ;;  %v1994_v57 = vsel %vm804_vm2, %v1991_v17, %v1993_v9  ;;  %v7539_v45 = vld [vmem:[#allocation18_spill] sm:$0xff]  ;;  %v7540_v36 = vld [vmem:[#allocation19_spill] sm:$0xff] }
 0x156   : > { %v1997_v25 = vsel %vm804_vm2, %v1995_v39, %v1996_v29  ;;  %v1999_v53 = vsel %vm804_vm2, %v1996_v29, %v1998_v18  ;;  %v2042_v59 = vadd.f32 %v6048_v60, %v5750_v46  ;;  %v6137_v0 = vadd.f32 %v6108_v35, %v2040_v16  ;;  %v7541_v17 = vld [vmem:[#allocation22_spill] sm:$0xff]  ;;  %v7542_v9 = vld [vmem:[#allocation23_spill] sm:$0xff]  ;;  %v7543_v29 = vld [vmem:[#allocation24_spill] sm:$0xff] }
 0x157   : > { %v2002_v48 = vsel %vm804_vm2, %v2000_v61, %v2001_v22  ;;  %v6141_v43 = vsel %vm804_vm2, %v2001_v22, %v2003_v27  ;;  %v2043_v15 = vadd.f32 %v6051_v41, %v7532_v13  ;;  %v2044_v2 = vadd.f32 %v6056_v55, %v7533_v28  ;;  %v7538_v55 = vld [vmem:[#allocation17_spill] sm:$0xff]  ;;  %v7544_v16 = vld [vmem:[#allocation31_spill] sm:$0xff]  ;;  %v7546_v22 = vld [vmem:[#allocation28_spill] sm:$0xff] }
 0x158   : > { %v6148_v5 = vadd.f32 %v6108_v35, %v2041_v42  ;;  %v2108_v20 = vadd.f32 3.0, %v6120_v10  ;;  %v2109_v46 = vadd.f32 3.0, %v6123_v8  ;;  %v2110_v60 = vadd.f32 3.0, %v6126_v26  ;;  %v7547_v27 = vld [vmem:[#allocation36_spill] sm:$0xff] }
 0x159   : > { %v2045_v3 = vadd.f32 %v6059_v23, %v7534_v14  ;;  %v2046_v56 = vadd.f32 %v6064_v7, %v7535_v34  ;;  %v2047_v41 = vadd.f32 %v1952_v24, %v7536_v51  ;;  %v2048_v12 = vadd.f32 %v1954_v37, %v7537_v58  ;;  %v7551_v51 = vld [vmem:[#allocation25_spill] sm:$0xff] }
 0x15a   : > { %v2049_v38 = vadd.f32 %v1957_v32, %v7538_v55  ;;  %v2050_v40 = vadd.f32 %v1959_v30, %v7539_v45  ;;  %v6162_v6 = vadd.f32 %v6108_v35, %v2042_v59  ;;  %v2111_v50 = vadd.f32 3.0, %v6137_v0 }
 0x15b   : > { %v2051_v47 = vadd.f32 %v1962_v11, %v7540_v36  ;;  %v6167_v23 = vadd.f32 %v1964_v33, %v7541_v17  ;;  %v6170_v7 = vadd.f32 %v1967_v62, %v7542_v9  ;;  %v6173_v24 = vadd.f32 %v6108_v35, %v2043_v15  ;;  %v7545_v11 = vld [vmem:[#allocation27_spill] sm:$0xff]  ;;  %v7554_v9 = vld [vmem:[#allocation34_spill] sm:$0xff] }
 0x15c   : > { %v2112_v37 = vadd.f32 3.0, %v6148_v5  ;;  %v2140_v32 = vmax.f32 %v2108_v20, 0.0  ;;  %v2141_v30 = vmax.f32 %v2109_v46, 0.0  ;;  %v2142_v39 = vmax.f32 %v2110_v60, 0.0 }
 0x15d   : > { %v6177_v18 = vadd.f32 %v1969_v21, %v7543_v29  ;;  %v6180_v61 = vadd.f32 %v1972_v49, %v7544_v16  ;;  %v6183_v33 = vadd.f32 %v1974_v31, %v7545_v11  ;;  %v6186_v62 = vadd.f32 %v1977_v54, %v7546_v22  ;;  %v7548_v21 = vld [vmem:[#allocation32_spill] sm:$0xff]  ;;  %v7549_v49 = vld [vmem:[#allocation33_spill] sm:$0xff]  ;;  %v7556_v16 = vld [vmem:[#allocation6_spill] sm:$0xff] }
 0x15e   : > { %v6189_v42 = vadd.f32 %v1979_v19, %v7547_v27  ;;  %v6192_v59 = vadd.f32 %v6108_v35, %v2044_v2  ;;  %v2113_v13 = vadd.f32 3.0, %v6162_v6  ;;  %v2143_v15 = vmax.f32 %v2111_v50, 0.0  ;;  %v7550_v2 = vld [vmem:[#allocation45_spill] sm:$0xff] }
 0x15f   : > { %v6196_v28 = vadd.f32 %v1982_v4, %v7548_v21  ;;  %v6199_v20 = vadd.f32 %v1984_v52, %v7549_v49  ;;  %v6202_v31 = vadd.f32 %v6108_v35, %v2045_v3  ;;  %v2114_v54 = vadd.f32 3.0, %v6173_v24  ;;  %v7552_v4 = vld [vmem:[#allocation26_spill] sm:$0xff]  ;;  %v7553_v52 = vld [vmem:[#allocation29_spill] sm:$0xff] }
 0x160   : > { %v2144_v46 = vmax.f32 %v2112_v37, 0.0  ;;  %v2172_v19 = vmin.f32 %v2140_v32, 6.0  ;;  %v2173_v60 = vmin.f32 %v2141_v30, 6.0  ;;  %v2174_v14 = vmin.f32 %v2142_v39, 6.0  ;;  %v7555_v39 = vld [vmem:[#allocation5_spill] sm:$0xff] }
 0x161   : > { %v6206_v34 = vadd.f32 %v1987_v63, %v7550_v2  ;;  %v6209_v58 = vadd.f32 %v1989_v44, %v7551_v51  ;;  %v6212_v55 = vadd.f32 %v1992_v1, %v7552_v4  ;;  %v6215_v45 = vadd.f32 %v1994_v57, %v7553_v52 }
 0x162   : > { %v6218_v3 = vadd.f32 %v6108_v35, %v2046_v56  ;;  %v2115_v50 = vadd.f32 3.0, %v6192_v59  ;;  %v2145_v36 = vmax.f32 %v2113_v13, 0.0  ;;  %v2175_v17 = vmin.f32 %v2143_v15, 6.0  ;;  %v7557_v13 = vld [vmem:[#allocation7_spill] sm:$0xff] }
 0x163   : > { %v6222_v37 = vadd.f32 %v1997_v25, %v7554_v9  ;;  %v6225_v63 = vadd.f32 %v6108_v35, %v2047_v41  ;;  %v2116_v44 = vadd.f32 3.0, %v6202_v31  ;;  %v2146_v1 = vmax.f32 %v2114_v54, 0.0 }
 0x164   : > { %v2176_v32 = vmin.f32 %v2144_v46, 6.0  ;;  %v2204_v57 = vmul.f32 %v2172_v19, %v6120_v10  ;;  %v2205_v30 = vmul.f32 %v2173_v60, %v6123_v8  ;;  %v2206_v56 = vmul.f32 %v2174_v14, %v6126_v26 }
 0x165   : > { %v6232_v29 = vadd.f32 %v1999_v53, %v7555_v39  ;;  %v6235_v11 = vadd.f32 %v2002_v48, %v7556_v16  ;;  %v6238_v25 = vadd.f32 %v6108_v35, %v2048_v12  ;;  %v6241_v41 = vadd.f32 %v6108_v35, %v2049_v38 }
 0x166   : > { %v2117_v22 = vadd.f32 3.0, %v6218_v3  ;;  %v2147_v27 = vmax.f32 %v2115_v50, 0.0  ;;  %v2177_v10 = vmin.f32 %v2145_v36, 6.0  ;;  %v2207_v8 = vmul.f32 %v2175_v17, %v6137_v0 }
 0x167   : > { %v6247_v26 = vadd.f32 %v6141_v43, %v7557_v13  ;;  %v2118_v53 = vadd.f32 3.0, %v6225_v63  ;;  %v2148_v48 = vmax.f32 %v2116_v44, 0.0  ;;  %v2178_v15 = vmin.f32 %v2146_v1, 6.0 }
 0x168   : > { %v2208_v12 = vmul.f32 %v2176_v32, %v6148_v5  ;;  %v6251_v21 = vmul.f32 0.16666667, %v2204_v57  ;;  %v6253_v38 = vmul.f32 0.16666667, %v2205_v30  ;;  %v6255_v49 = vmul.f32 0.16666667, %v2206_v56 }
 0x169   : > { %v6258_v54 = vadd.f32 %v6108_v35, %v2050_v40  ;;  %v6261_v0 = vadd.f32 %v6108_v35, %v2051_v47  ;;  %v2119_v43 = vadd.f32 3.0, %v6238_v25  ;;  %v2120_v46 = vadd.f32 3.0, %v6241_v41 }
 0x16a   : > { %v2149_v19 = vmax.f32 %v2117_v22, 0.0  ;;  %v2179_v60 = vmin.f32 %v2147_v27, 6.0  ;;  %v2209_v5 = vmul.f32 %v2177_v10, %v6162_v6  ;;  %v6266_v14 = vmul.f32 0.16666667, %v2207_v8 }
 0x16b   : > { %v2150_v2 = vmax.f32 %v2118_v53, 0.0  ;;  %v2180_v51 = vmin.f32 %v2148_v48, 6.0  ;;  %v2210_v4 = vmul.f32 %v2178_v15, %v6173_v24  ;;  %v6269_v40 = vmul.f32 0.16666667, %v2208_v12 }
 0x16c   : > { %v2270_v47 = vsel %vm2269_vm3, %v6251_v21, 0.0  ;;  %v2271_v52 = vsel %vm2269_vm3, %v6253_v38, 0.0  ;;  %v2273_v50 = vsel %vm2269_vm3, %v6255_v49, 0.0  ;;  %v6279_v6 = vadd.f32 %v6108_v35, %v6167_v23 }
 0x16d   : > { %v2121_v36 = vadd.f32 3.0, %v6258_v54  ;;  %v2151_v17 = vmax.f32 %v2119_v43, 0.0  ;;  %v2272_v24 = vadd.f32 %v2271_v52, %v2270_v47  ;;  %v2181_v9 = vmin.f32 %v2149_v19, 6.0 }
 0x16e   : > { %v2211_v44 = vmul.f32 %v2179_v60, %v6192_v59  ;;  %v6283_v1 = vmul.f32 0.16666667, %v2209_v5  ;;  %v2275_v32 = vsel %vm2269_vm3, %v6266_v14, 0.0  ;;  %v6289_v57 = vadd.f32 %v6108_v35, %v6170_v7 }
 0x16f   : > { %v2122_v30 = vadd.f32 3.0, %v6261_v0  ;;  %v2152_v23 = vmax.f32 %v2120_v46, 0.0  ;;  %v2274_v56 = vadd.f32 %v2273_v50, %v2272_v24  ;;  %v2182_v39 = vmin.f32 %v2150_v2, 6.0 }
 0x170   : > { %v2212_v16 = vmul.f32 %v2180_v51, %v6202_v31  ;;  %v6293_v22 = vmul.f32 0.16666667, %v2210_v4  ;;  %v2277_v59 = vsel %vm2269_vm3, %v6269_v40, 0.0  ;;  %v6299_v27 = vadd.f32 %v6108_v35, %v6177_v18 }
 0x171   : > { %v2123_v10 = vadd.f32 3.0, %v6279_v6  ;;  %v2153_v7 = vmax.f32 %v2121_v36, 0.0  ;;  %v2276_v8 = vadd.f32 %v2275_v32, %v2274_v56  ;;  %v2183_v13 = vmin.f32 %v2151_v17, 6.0 }
 0x172   : > { %v2213_v53 = vmul.f32 %v2181_v9, %v6218_v3  ;;  %v6303_v48 = vmul.f32 0.16666667, %v2211_v44  ;;  %v2279_v31 = vsel %vm2269_vm3, %v6283_v1, 0.0  ;;  %v6309_v15 = vadd.f32 %v6108_v35, %v6180_v61 }
 0x173   : > { %v2124_v12 = vadd.f32 3.0, %v6289_v57  ;;  %v2154_v18 = vmax.f32 %v2122_v30, 0.0  ;;  %v2278_v43 = vadd.f32 %v2277_v59, %v2276_v8  ;;  %v2184_v46 = vmin.f32 %v2152_v23, 6.0 }
 0x174   : > { %v2214_v19 = vmul.f32 %v2182_v39, %v6225_v63  ;;  %v6313_v60 = vmul.f32 0.16666667, %v2212_v16  ;;  %v2281_v3 = vsel %vm2269_vm3, %v6293_v22, 0.0  ;;  %v6319_v5 = vadd.f32 %v6108_v35, %v6183_v33 }
 0x175   : > { %v2125_v2 = vadd.f32 3.0, %v6299_v27  ;;  %v2155_v61 = vmax.f32 %v2123_v10, 0.0  ;;  %v2280_v51 = vadd.f32 %v2279_v31, %v2278_v43  ;;  %v2185_v4 = vmin.f32 %v2153_v7, 6.0 }
 0x176   : > { %v2215_v47 = vmul.f32 %v2183_v13, %v6238_v25  ;;  %v6323_v52 = vmul.f32 0.16666667, %v2213_v53  ;;  %v2283_v63 = vsel %vm2269_vm3, %v6303_v48, 0.0  ;;  %v6329_v50 = vadd.f32 %v6108_v35, %v6186_v62 }
 0x177   : > { %v2126_v36 = vadd.f32 3.0, %v6309_v15  ;;  %v2156_v33 = vmax.f32 %v2124_v12, 0.0  ;;  %v2282_v17 = vadd.f32 %v2281_v3, %v2280_v51  ;;  %v2186_v24 = vmin.f32 %v2154_v18, 6.0 }
 0x178   : > { %v2216_v9 = vmul.f32 %v2184_v46, %v6241_v41  ;;  %v6333_v44 = vmul.f32 0.16666667, %v2214_v19  ;;  %v2285_v25 = vsel %vm2269_vm3, %v6313_v60, 0.0  ;;  %v6339_v32 = vadd.f32 %v6108_v35, %v6189_v42 }
 0x179   : > { %v2127_v30 = vadd.f32 3.0, %v6319_v5  ;;  %v2157_v62 = vmax.f32 %v2125_v2, 0.0  ;;  %v2284_v23 = vadd.f32 %v2283_v63, %v2282_v17  ;;  %v2187_v56 = vmin.f32 %v2155_v61, 6.0 }
 0x17a   : > { %v2217_v39 = vmul.f32 %v2185_v4, %v6258_v54  ;;  %v6343_v16 = vmul.f32 0.16666667, %v2215_v47  ;;  %v2287_v41 = vsel %vm2269_vm3, %v6323_v52, 0.0  ;;  %v6349_v59 = vadd.f32 %v6108_v35, %v6196_v28 }
 0x17b   : > { %v2128_v10 = vadd.f32 3.0, %v6329_v50  ;;  %v2158_v42 = vmax.f32 %v2126_v36, 0.0  ;;  %v2286_v7 = vadd.f32 %v2285_v25, %v2284_v23  ;;  %v2188_v8 = vmin.f32 %v2156_v33, 6.0 }
 0x17c   : > { %v2218_v13 = vmul.f32 %v2186_v24, %v6261_v0  ;;  %v6353_v53 = vmul.f32 0.16666667, %v2216_v9  ;;  %v2289_v54 = vsel %vm2269_vm3, %v6333_v44, 0.0  ;;  %v6359_v31 = vadd.f32 %v6108_v35, %v6199_v20 }
 0x17d   : > { %v2129_v12 = vadd.f32 3.0, %v6339_v32  ;;  %v2159_v28 = vmax.f32 %v2127_v30, 0.0  ;;  %v2288_v18 = vadd.f32 %v2287_v41, %v2286_v7  ;;  %v2189_v43 = vmin.f32 %v2157_v62, 6.0 }
 0x17e   : > { %v2219_v46 = vmul.f32 %v2187_v56, %v6279_v6  ;;  %v6363_v19 = vmul.f32 0.16666667, %v2217_v39  ;;  %v2291_v0 = vsel %vm2269_vm3, %v6343_v16, 0.0  ;;  %v6369_v3 = vadd.f32 %v6108_v35, %v6206_v34 }
 0x17f   : > { %v2130_v2 = vadd.f32 3.0, %v6349_v59  ;;  %v2160_v20 = vmax.f32 %v2128_v10, 0.0  ;;  %v2290_v61 = vadd.f32 %v2289_v54, %v2288_v18  ;;  %v2190_v51 = vmin.f32 %v2158_v42, 6.0 }
 0x180   : > { %v2220_v4 = vmul.f32 %v2188_v8, %v6289_v57  ;;  %v6373_v47 = vmul.f32 0.16666667, %v2218_v13  ;;  %v2293_v6 = vsel %vm2269_vm3, %v6353_v53, 0.0  ;;  %v6379_v63 = vadd.f32 %v6108_v35, %v6209_v58 }
 0x181   : > { %v2131_v36 = vadd.f32 3.0, %v6359_v31  ;;  %v2161_v34 = vmax.f32 %v2129_v12, 0.0  ;;  %v2292_v33 = vadd.f32 %v2291_v0, %v2290_v61  ;;  %v2191_v17 = vmin.f32 %v2159_v28, 6.0 }
 0x182   : > { %v2221_v24 = vmul.f32 %v2189_v43, %v6299_v27  ;;  %v6383_v9 = vmul.f32 0.16666667, %v2219_v46  ;;  %v2295_v57 = vsel %vm2269_vm3, %v6363_v19, 0.0  ;;  %v6389_v25 = vadd.f32 %v6108_v35, %v6212_v55 }
 0x183   : > { %v2132_v30 = vadd.f32 3.0, %v6369_v3  ;;  %v2162_v58 = vmax.f32 %v2130_v2, 0.0  ;;  %v2294_v62 = vadd.f32 %v2293_v6, %v2292_v33  ;;  %v2192_v23 = vmin.f32 %v2160_v20, 6.0 }
 0x184   : > { %v2222_v56 = vmul.f32 %v2190_v51, %v6309_v15  ;;  %v6393_v39 = vmul.f32 0.16666667, %v2220_v4  ;;  %v2297_v27 = vsel %vm2269_vm3, %v6373_v47, 0.0  ;;  %v6399_v41 = vadd.f32 %v6108_v35, %v6215_v45 }
 0x185   : > { %v2133_v10 = vadd.f32 3.0, %v6379_v63  ;;  %v2163_v55 = vmax.f32 %v2131_v36, 0.0  ;;  %v2296_v42 = vadd.f32 %v2295_v57, %v2294_v62  ;;  %v2193_v7 = vmin.f32 %v2161_v34, 6.0 }
 0x186   : > { %v2223_v8 = vmul.f32 %v2191_v17, %v6319_v5  ;;  %v6403_v13 = vmul.f32 0.16666667, %v2221_v24  ;;  %v2299_v15 = vsel %vm2269_vm3, %v6383_v9, 0.0  ;;  %v2104_v54 = vadd.f32 %v6108_v35, %v6222_v37 }
 0x187   : > { %v2134_v12 = vadd.f32 3.0, %v6389_v25  ;;  %v2164_v28 = vmax.f32 %v2132_v30, 0.0  ;;  %v2298_v45 = vadd.f32 %v2297_v27, %v2296_v42  ;;  %v2194_v18 = vmin.f32 %v2162_v58, 6.0 }
 0x188   : > { %v2224_v43 = vmul.f32 %v2192_v23, %v6329_v50  ;;  %v6411_v46 = vmul.f32 0.16666667, %v2222_v56  ;;  %v2301_v5 = vsel %vm2269_vm3, %v6393_v39, 0.0  ;;  %v2105_v0 = vadd.f32 %v6108_v35, %v6232_v29 }
 0x189   : > { %v2135_v2 = vadd.f32 3.0, %v6399_v41  ;;  %v2165_v20 = vmax.f32 %v2133_v10, 0.0  ;;  %v2300_v61 = vadd.f32 %v2299_v15, %v2298_v45  ;;  %v2195_v37 = vmin.f32 %v2163_v55, 6.0 }
 0x18a   : > { %v2225_v51 = vmul.f32 %v2193_v7, %v6339_v32  ;;  %v6419_v4 = vmul.f32 0.16666667, %v2223_v8  ;;  %v2303_v50 = vsel %vm2269_vm3, %v6403_v13, 0.0  ;;  %v2106_v6 = vadd.f32 %v6108_v35, %v6235_v11 }
 0x18b   : > { %v2136_v36 = vadd.f32 3.0, %v2104_v54  ;;  %v2166_v34 = vmax.f32 %v2134_v12, 0.0  ;;  %v2302_v33 = vadd.f32 %v2301_v5, %v2300_v61  ;;  %v2196_v17 = vmin.f32 %v2164_v28, 6.0 }
 0x18c   : > { %v2226_v29 = vmul.f32 %v2194_v18, %v6349_v59  ;;  %v6426_v24 = vmul.f32 0.16666667, %v2224_v43  ;;  %v2305_v57 = vsel %vm2269_vm3, %v6411_v46, 0.0  ;;  %v2107_v32 = vadd.f32 %v6108_v35, %v6247_v26 }
 0x18d   : > { %v2137_v30 = vadd.f32 3.0, %v2105_v0  ;;  %v2167_v58 = vmax.f32 %v2135_v2, 0.0  ;;  %v2304_v62 = vadd.f32 %v2303_v50, %v2302_v33  ;;  %v2197_v23 = vmin.f32 %v2165_v20, 6.0 }
 0x18e   : > { %v2227_v11 = vmul.f32 %v2195_v37, %v6359_v31  ;;  %v6433_v56 = vmul.f32 0.16666667, %v2225_v51  ;;  %v2307_v27 = vsel %vm2269_vm3, %v6419_v4, 0.0  ;;  %v2138_v59 = vadd.f32 3.0, %v2106_v6 }
 0x18f   : > { %v2168_v10 = vmax.f32 %v2136_v36, 0.0  ;;  %v2306_v55 = vadd.f32 %v2305_v57, %v2304_v62  ;;  %v2198_v42 = vmin.f32 %v2166_v34, 6.0  ;;  %v2228_v7 = vmul.f32 %v2196_v17, %v6369_v3 }
 0x190   : > { %v6438_v8 = vmul.f32 0.16666667, %v2226_v29  ;;  %v2309_v35 = vsel %vm2269_vm3, %v6426_v24, 0.0  ;;  %v2139_v26 = vadd.f32 3.0, %v2107_v32  ;;  %v2169_v15 = vmax.f32 %v2137_v30, 0.0 }
 0x191   : > { %v2308_v12 = vadd.f32 %v2307_v27, %v2306_v55  ;;  %v2199_v31 = vmin.f32 %v2167_v58, 6.0  ;;  %v2229_v28 = vmul.f32 %v2197_v23, %v6379_v63  ;;  %v6443_v45 = vmul.f32 0.16666667, %v2227_v11 }
 0x192   : > { %v2311_v18 = vsel %vm2269_vm3, %v6433_v56, 0.0  ;;  %v2170_v43 = vmax.f32 %v2138_v59, 0.0  ;;  %v2200_v2 = vmin.f32 %v2168_v10, 6.0  ;;  %v2230_v3 = vmul.f32 %v2198_v42, %v6389_v25 }
 0x193   : > { %v2310_v5 = vadd.f32 %v2309_v35, %v2308_v12  ;;  %v6448_v20 = vmul.f32 0.16666667, %v2228_v7  ;;  %v2313_v61 = vsel %vm2269_vm3, %v6438_v8, 0.0  ;;  %v2171_v37 = vmax.f32 %v2139_v26, 0.0 }
 0x194   : > { %v2201_v50 = vmin.f32 %v2169_v15, 6.0  ;;  %v2231_v63 = vmul.f32 %v2199_v31, %v6399_v41  ;;  %v6453_v36 = vmul.f32 0.16666667, %v2229_v28  ;;  %v2315_v34 = vsel %vm2269_vm3, %v6443_v45, 0.0 }
 0x195   : > { %v2312_v51 = vadd.f32 %v2311_v18, %v2310_v5  ;;  %v2202_v17 = vmin.f32 %v2170_v43, 6.0  ;;  %v2232_v29 = vmul.f32 %v2200_v2, %v2104_v54  ;;  %v6457_v57 = vmul.f32 0.16666667, %v2230_v3 }
 0x196   : > { %v2317_v25 = vsel %vm2269_vm3, %v6448_v20, 0.0  ;;  %v2203_v58 = vmin.f32 %v2171_v37, 6.0  ;;  %v2233_v62 = vmul.f32 %v2201_v50, %v2105_v0  ;;  %v6461_v23 = vmul.f32 0.16666667, %v2231_v63 }
 0x197   : > { %v2314_v33 = vadd.f32 %v2313_v61, %v2312_v51  ;;  %v2319_v41 = vsel %vm2269_vm3, %v6453_v36, 0.0  ;;  %v2234_v27 = vmul.f32 %v2202_v17, %v2106_v6  ;;  %v6465_v59 = vmul.f32 0.16666667, %v2232_v29 }
 0x198   : > { %v2321_v54 = vsel %vm2269_vm3, %v6457_v57, 0.0  ;;  %v2235_v55 = vmul.f32 %v2203_v58, %v2107_v32  ;;  %v6469_v42 = vmul.f32 0.16666667, %v2233_v62  ;;  %v2323_v7 = vsel %vm2269_vm3, %v6461_v23, 0.0  ;;  %v2553_v58 = vld [vmem:[%s6681_s7] sm:$0xf] }
 0x199   : > { %v2316_v30 = vadd.f32 %v2315_v34, %v2314_v33  ;;  %v6473_v35 = vmul.f32 0.16666667, %v2234_v27  ;;  %v2325_v26 = vsel %vm2269_vm3, %v6465_v59, 0.0  ;;  %v2417_v34 = vld [vmem:[%s6679_s5] sm:$0x3]  ;;  %3136 = vmatprep.subr.msk.bf16.mxu0 %vm2609_vm6, %v2553_v58  ;;  %v2611_v62 = vsel %vm2609_vm6, %v2553_v58, 0 }
 0x19a   : > { %v6477_v6 = vmul.f32 0.16666667, %v2235_v55  ;;  %v2327_v12 = vsel %vm2269_vm3, %v6469_v42, 0.0  ;;  %3096 = vmatpush3.msk.msra.mxu1 %vm2423_vm4, %v2417_v34  ;;  %v2342_v33 = vld [vmem:[%s6678_s4] sm:$0x1] }
 0x19b   : > { %v2318_v11 = vadd.f32 %v2317_v25, %v2316_v30  ;;  %v2329_v32 = vsel %vm2269_vm3, %v6473_v35, 0.0  ;;  %3137 = vmatprep.subr.msk.bf16.mxu1 %vm2609_vm6, %v2553_v58 }
 0x19c   : > { %v2331_v18 = vsel %vm2269_vm3, %v6477_v6, 0.0 }
 0x19d   : > { %v2320_v10 = vadd.f32 %v2319_v41, %v2318_v11  ;;  %v2418_v41 = vld [vmem:[%s6680_s6] sm:$0x1]  ;;  %v2501_v11 = vlaneseq }
 0x19f   : > { %v2322_v0 = vadd.f32 %v2321_v54, %v2320_v10 }
 0x1a1   : > { %v2324_v15 = vadd.f32 %v2323_v7, %v2322_v0  ;;  %v2502_v7 = vshrl.u32 %v2501_v11, 7 }
 0x1a3   : > { %v2326_v31 = vadd.f32 %v2325_v26, %v2324_v15  ;;  %v2503_v15 = vsub.s32 0, %v2502_v7 }
 0x1a5   : > { %v2328_v28 = vadd.f32 %v2327_v12, %v2326_v31 }
 0x1a7   : > { %v2330_v43 = vadd.f32 %v2329_v32, %v2328_v28 }
 0x1a9   : > { %v2332_v5 = vadd.f32 %v2331_v18, %v2330_v43 }
 0x1ab   : > { %v2333_v2 = vrot.slane %v2332_v5, 4 }
 0x1ad   : > { %v2334_v3 = vadd.f32 %v2333_v2, %v2332_v5 }
 0x1af   : > { %v2335_v61 = vrot.slane %v2334_v3, 2 }
 0x1b1   : > { %v2336_v37 = vadd.f32 %v2335_v61, %v2334_v3 }
 0x1b3   : > { %v2337_v51 = vrot.slane %v2336_v37, 1 }
 0x1b5   : > { %v2338_v50 = vadd.f32 %v2337_v51, %v2336_v37 }
 0x1b7   : > { %v2340_v63 = vmul.f32 0.00390625, %v2338_v50 }
 0x1b9   : > { %3093 = vmatmul.mubr.msk.f32.vlgmr.msra.gmra.mrb[0].mxu0 %vm2269_vm3, %v2340_v63 }
 0x1ba   : > { %3101 = vmatpush3.bf16.msra.mxu0 %v2611_v62 }
 0x28c   : > { %v2412_v17 = vpop.f32.mrb[0].mxu0 }
 0x28d   : > { %v2413_v29 = vadd.f32 %v2412_v17, %v2342_v33  ;;  %v3094_v25 = vpop.f32.mrb[1].mxu0 }
 0x28f   : > { %v2416_v30 = vmax.f32 %v2413_v29, 0.0 }
 0x291   : > { %3098 = vmatmul.mubr.msk.f32.vlgmr.msra.gmra.mrb[0].mxu1 %vm2419_vm5, %v2416_v30 }
 0x292   : > { %3135 = vmatpush3.bf16.msra.mxu1 %v2611_v62 }
 0x364   : > { %v2493_v27 = vpop.f32.mrb[0].mxu1 }
 0x365   : > { %v2494_v54 = vadd.f32 %v2493_v27, %v2418_v41  ;;  %v3099_v10 = vpop.f32.mrb[1].mxu1 }
 0x367   : > { %v2497_v55 = vadd.f32 3.0, %v2494_v54 }
 0x369   : > { %v2498_v0 = vmax.f32 %v2497_v55, 0.0 }
 0x36b   : > { %v2499_v26 = vmin.f32 %v2498_v0, 6.0 }
 0x36d   : > { %v2500_v12 = vmul.f32 0.16666667, %v2499_v26 }
 0x36f   : > { %v2504_v31 = vrot.slane %v2500_v12, %v2503_v15 }
 0x371   : > { %v2505_v32 = vmul.f32 %v2504_v31, %v6251_v21  ;;  %v2506_v28 = vmul.f32 %v2504_v31, %v6253_v38  ;;  %v2521_v18 = vmul.f32 %v2504_v31, %v6393_v39  ;;  %v2522_v43 = vmul.f32 %v2504_v31, %v6403_v13 }
 0x372   : > { %v2507_v5 = vmul.f32 %v2504_v31, %v6255_v49  ;;  %v2508_v2 = vmul.f32 %v2504_v31, %v6266_v14  ;;  %v2523_v3 = vmul.f32 %v2504_v31, %v6411_v46  ;;  %v2524_v61 = vmul.f32 %v2504_v31, %v6419_v4 }
 0x373   : > { %v2537_v37 = vpack.c.bf16 %v2506_v28, %v2505_v32  ;;  %v2545_v51 = vpack.c.bf16 %v2522_v43, %v2521_v18  ;;  %v2509_v50 = vmul.f32 %v2504_v31, %v6269_v40  ;;  %v2510_v21 = vmul.f32 %v2504_v31, %v6283_v1 }
 0x374   : > { %v2538_v63 = vpack.c.bf16 %v2508_v2, %v2507_v5  ;;  %v2546_v38 = vpack.c.bf16 %v2524_v61, %v2523_v3  ;;  %v2525_v39 = vmul.f32 %v2504_v31, %v6426_v24  ;;  %v2526_v13 = vmul.f32 %v2504_v31, %v6433_v56 }
 0x375   : > { %3102 = vmatprep.mubr.msk.bf16.mxu0 %vm2269_vm3, %v2537_v37  ;;  %3118 = vmatprep.mubr.msk.bf16.mxu1 %vm2269_vm3, %v2545_v51  ;;  %v2539_v49 = vpack.c.bf16 %v2510_v21, %v2509_v50  ;;  %v2511_v40 = vmul.f32 %v2504_v31, %v6293_v22  ;;  %v2512_v1 = vmul.f32 %v2504_v31, %v6303_v48 }
 0x376   : > { %3103 = vmatmul.mubr.msk.bf16.vlgmr.msra.gmra.mrb[4].mxu0 %vm2269_vm3, %v2538_v63  ;;  %3119 = vmatmul.mubr.msk.bf16.vlgmr.msra.gmra.mrb[4].mxu1 %vm2269_vm3, %v2546_v38  ;;  %v2547_v14 = vpack.c.bf16 %v2526_v13, %v2525_v39  ;;  %v2527_v46 = vmul.f32 %v2504_v31, %v6438_v8  ;;  %v2528_v4 = vmul.f32 %v2504_v31, %v6443_v45 }
 0x377   : > { %3106 = vmatprep.mubr.msk.bf16.mxu0 %vm2269_vm3, %v2539_v49  ;;  %v2513_v24 = vmul.f32 %v2504_v31, %v6313_v60  ;;  %v2514_v56 = vmul.f32 %v2504_v31, %v6323_v52  ;;  %v2529_v34 = vmul.f32 %v2504_v31, %v6448_v20  ;;  %v2530_v33 = vmul.f32 %v2504_v31, %v6453_v36 }
 0x378   : > { %3122 = vmatprep.mubr.msk.bf16.mxu1 %vm2269_vm3, %v2547_v14  ;;  %v2540_v17 = vpack.c.bf16 %v2512_v1, %v2511_v40  ;;  %v2548_v29 = vpack.c.bf16 %v2528_v4, %v2527_v46  ;;  %v2515_v22 = vmul.f32 %v2504_v31, %v6333_v44  ;;  %v2516_v48 = vmul.f32 %v2504_v31, %v6343_v16 }
 0x379   : > { %v2541_v25 = vpack.c.bf16 %v2514_v56, %v2513_v24  ;;  %v2549_v30 = vpack.c.bf16 %v2530_v33, %v2529_v34  ;;  %v2531_v60 = vmul.f32 %v2504_v31, %v6457_v57  ;;  %v2532_v52 = vmul.f32 %v2504_v31, %v6461_v23 }
 0x37a   : > { %v2517_v8 = vmul.f32 %v2504_v31, %v6353_v53  ;;  %v2518_v45 = vmul.f32 %v2504_v31, %v6363_v19  ;;  %v2533_v20 = vmul.f32 %v2504_v31, %v6465_v59  ;;  %v2534_v36 = vmul.f32 %v2504_v31, %v6469_v42  ;;  %v6549_v59 = vld [vmem:[%s6682_s8] ss:$0 sm:$0xff] }
 0x37b   : > { %v2542_v58 = vpack.c.bf16 %v2516_v48, %v2515_v22  ;;  %v2550_v62 = vpack.c.bf16 %v2532_v52, %v2531_v60  ;;  %v2519_v44 = vmul.f32 %v2504_v31, %v6373_v47  ;;  %v2520_v16 = vmul.f32 %v2504_v31, %v6383_v9 }
 0x37c   : > { %v2543_v41 = vpack.c.bf16 %v2518_v45, %v2517_v8  ;;  %v2551_v11 = vpack.c.bf16 %v2534_v36, %v2533_v20  ;;  %v2535_v53 = vmul.f32 %v2504_v31, %v6473_v35  ;;  %v2536_v19 = vmul.f32 %v2504_v31, %v6477_v6 }
 0x37d   : > { %v2544_v57 = vpack.c.bf16 %v2520_v16, %v2519_v44 }
 0x37e   : > { %3107 = vmatmul.mubr.msk.bf16.gmra.mrb[8].mxu0 %vm2269_vm3, %v2540_v17  ;;  %3123 = vmatmul.mubr.msk.bf16.gmra.mrb[8].mxu1 %vm2269_vm3, %v2548_v29  ;;  %v2552_v23 = vpack.c.bf16 %v2536_v19, %v2535_v53 }
 0x37f   : > { %3110 = vmatprep.mubr.msk.bf16.mxu0 %vm2269_vm3, %v2541_v25  ;;  %3126 = vmatprep.mubr.msk.bf16.mxu1 %vm2269_vm3, %v2549_v30 }
 0x386   : > { %3111 = vmatmul.mubr.msk.bf16.gmra.mrb[12].mxu0 %vm2269_vm3, %v2542_v58  ;;  %3127 = vmatmul.mubr.msk.bf16.gmra.mrb[12].mxu1 %vm2269_vm3, %v2550_v62 }
 0x387   : > { %3114 = vmatprep.mubr.msk.bf16.mxu0 %vm2269_vm3, %v2543_v41  ;;  %3130 = vmatprep.mubr.msk.bf16.mxu1 %vm2269_vm3, %v2551_v11 }
 0x38e   : > { %3115 = vmatmul.mubr.msk.bf16.gmra.mrb[16].mxu0 %vm2269_vm3, %v2544_v57  ;;  %3131 = vmatmul.mubr.msk.bf16.gmra.mrb[16].mxu1 %vm2269_vm3, %v2552_v23 }
 0x449   : > { %v3104_v42 = vpop.f32.mrb[4].mxu0  ;;  %v3120_v27 = vpop.f32.mrb[4].mxu1 }
 0x44a   : > { %v2656_v47 = vadd.f32 %v3104_v42, %v6549_v59  ;;  %v2720_v9 = vadd.f32 %v3120_v27, %v6549_v59  ;;  %v2647_v35 = vpop.f32.mrb[5].mxu0  ;;  %v2711_v54 = vpop.f32.mrb[5].mxu1 }
 0x44b   : > { %v2648_v6 = vadd.f32 %v6549_v59, %v2647_v35  ;;  %v2712_v10 = vadd.f32 %v6549_v59, %v2711_v54  ;;  %v3105_v55 = vpop.f32.mrb[6].mxu0  ;;  %v3121_v7 = vpop.f32.mrb[6].mxu1 }
 0x44c   : > { %v2776_v0 = vadd.f32 3.0, %v2656_v47  ;;  %v2792_v26 = vadd.f32 3.0, %v2720_v9  ;;  %v2659_v15 = vadd.f32 %v3105_v55, %v6549_v59  ;;  %v2723_v12 = vadd.f32 %v3121_v7, %v6549_v59  ;;  %v2650_v31 = vpop.f32.mrb[7].mxu0  ;;  %v2714_v32 = vpop.f32.mrb[7].mxu1 }
 0x44d   : > { %v2774_v28 = vadd.f32 3.0, %v2648_v6  ;;  %v2790_v18 = vadd.f32 3.0, %v2712_v10  ;;  %v2651_v43 = vadd.f32 %v6549_v59, %v2650_v31  ;;  %v2715_v5 = vadd.f32 %v6549_v59, %v2714_v32 }
 0x44e   : > { %v2808_v2 = vmax.f32 %v2776_v0, 0.0  ;;  %v2824_v3 = vmax.f32 %v2792_v26, 0.0  ;;  %v2777_v61 = vadd.f32 3.0, %v2659_v15  ;;  %v2793_v37 = vadd.f32 3.0, %v2723_v12 }
 0x44f   : > { %v2806_v51 = vmax.f32 %v2774_v28, 0.0  ;;  %v2822_v50 = vmax.f32 %v2790_v18, 0.0  ;;  %v2775_v21 = vadd.f32 3.0, %v2651_v43  ;;  %v2791_v63 = vadd.f32 3.0, %v2715_v5 }
 0x450   : > { %v2840_v38 = vmin.f32 %v2808_v2, 6.0  ;;  %v2856_v39 = vmin.f32 %v2824_v3, 6.0  ;;  %v2809_v13 = vmax.f32 %v2777_v61, 0.0  ;;  %v2825_v49 = vmax.f32 %v2793_v37, 0.0 }
 0x451   : > { %v2838_v14 = vmin.f32 %v2806_v51, 6.0  ;;  %v2854_v40 = vmin.f32 %v2822_v50, 6.0  ;;  %v2807_v1 = vmax.f32 %v2775_v21, 0.0  ;;  %v2823_v46 = vmax.f32 %v2791_v63, 0.0  ;;  %v3108_v4 = vpop.f32.mrb[8].mxu0  ;;  %v3124_v24 = vpop.f32.mrb[8].mxu1 }
 0x452   : > { %v2872_v56 = vmul.f32 %v2840_v38, %v2656_v47  ;;  %v2888_v34 = vmul.f32 %v2856_v39, %v2720_v9  ;;  %v2841_v33 = vmin.f32 %v2809_v13, 6.0  ;;  %v2857_v17 = vmin.f32 %v2825_v49, 6.0  ;;  %v2663_v29 = vpop.f32.mrb[9].mxu0  ;;  %v2727_v25 = vpop.f32.mrb[9].mxu1 }
 0x453   : > { %v2870_v30 = vmul.f32 %v2838_v14, %v2648_v6  ;;  %v2886_v22 = vmul.f32 %v2854_v40, %v2712_v10  ;;  %v2839_v48 = vmin.f32 %v2807_v1, 6.0  ;;  %v2855_v60 = vmin.f32 %v2823_v46, 6.0  ;;  %v3109_v52 = vpop.f32.mrb[10].mxu0  ;;  %v3125_v8 = vpop.f32.mrb[10].mxu1 }
 0x454   : > { %v2904_v45 = vmul.f32 0.16666667, %v2872_v56  ;;  %v2920_v20 = vmul.f32 0.16666667, %v2888_v34  ;;  %v2873_v36 = vmul.f32 %v2841_v33, %v2659_v15  ;;  %v2889_v58 = vmul.f32 %v2857_v17, %v2723_v12  ;;  %v2666_v62 = vpop.f32.mrb[11].mxu0  ;;  %v2730_v41 = vpop.f32.mrb[11].mxu1 }
 0x455   : > { %v2902_v11 = vmul.f32 0.16666667, %v2870_v30  ;;  %v2918_v44 = vmul.f32 0.16666667, %v2886_v22  ;;  %v2871_v16 = vmul.f32 %v2839_v48, %v2651_v43  ;;  %v2887_v53 = vmul.f32 %v2855_v60, %v2715_v5 }
 0x456   : > { %2937 = vst.msk [vmem:[%s6563_s10 + $0x10] sm:$0xff] %vm2934_vm7, %v2904_v45  ;;  %2953 = vst.msk [vmem:[%s6563_s10 + $0x90] sm:$0xff] %vm2934_vm7, %v2920_v20  ;;  %v2905_v19 = vmul.f32 0.16666667, %v2873_v36  ;;  %v2921_v57 = vmul.f32 0.16666667, %v2889_v58  ;;  %v2672_v23 = vadd.f32 %v3108_v4, %v6549_v59  ;;  %v2736_v42 = vadd.f32 %v3124_v24, %v6549_v59 }
 0x457   : > { %2935 = vst.msk [vmem:[%s6563_s10] sm:$0xff] %vm2934_vm7, %v2902_v11  ;;  %2951 = vst.msk [vmem:[%s6563_s10 + $0x80] sm:$0xff] %vm2934_vm7, %v2918_v44  ;;  %v2903_v27 = vmul.f32 0.16666667, %v2871_v16  ;;  %v2919_v47 = vmul.f32 0.16666667, %v2887_v53  ;;  %v2664_v9 = vadd.f32 %v6549_v59, %v2663_v29  ;;  %v2728_v35 = vadd.f32 %v6549_v59, %v2727_v25 }
 0x458   : > { %2938 = vst.msk [vmem:[%s6563_s10 + $0x18] sm:$0xff] %vm2934_vm7, %v2905_v19  ;;  %2954 = vst.msk [vmem:[%s6563_s10 + $0x98] sm:$0xff] %vm2934_vm7, %v2921_v57  ;;  %v2780_v54 = vadd.f32 3.0, %v2672_v23  ;;  %v2796_v6 = vadd.f32 3.0, %v2736_v42  ;;  %v2675_v10 = vadd.f32 %v3109_v52, %v6549_v59  ;;  %v2739_v55 = vadd.f32 %v3125_v8, %v6549_v59 }
 0x459   : > { %2936 = vst.msk [vmem:[%s6563_s10 + $0x8] sm:$0xff] %vm2934_vm7, %v2903_v27  ;;  %2952 = vst.msk [vmem:[%s6563_s10 + $0x88] sm:$0xff] %vm2934_vm7, %v2919_v47  ;;  %v2778_v7 = vadd.f32 3.0, %v2664_v9  ;;  %v2794_v0 = vadd.f32 3.0, %v2728_v35  ;;  %v2667_v26 = vadd.f32 %v6549_v59, %v2666_v62  ;;  %v2731_v15 = vadd.f32 %v6549_v59, %v2730_v41  ;;  %v3112_v12 = vpop.f32.mrb[12].mxu0  ;;  %v3128_v31 = vpop.f32.mrb[12].mxu1 }
 0x45a   : > { %v2812_v32 = vmax.f32 %v2780_v54, 0.0  ;;  %v2828_v28 = vmax.f32 %v2796_v6, 0.0  ;;  %v2781_v18 = vadd.f32 3.0, %v2675_v10  ;;  %v2797_v43 = vadd.f32 3.0, %v2739_v55  ;;  %v2679_v5 = vpop.f32.mrb[13].mxu0  ;;  %v2743_v2 = vpop.f32.mrb[13].mxu1 }
 0x45b   : > { %v2810_v3 = vmax.f32 %v2778_v7, 0.0  ;;  %v2826_v61 = vmax.f32 %v2794_v0, 0.0  ;;  %v2779_v37 = vadd.f32 3.0, %v2667_v26  ;;  %v2795_v51 = vadd.f32 3.0, %v2731_v15  ;;  %v3113_v50 = vpop.f32.mrb[14].mxu0  ;;  %v3129_v21 = vpop.f32.mrb[14].mxu1 }
 0x45c   : > { %v2844_v63 = vmin.f32 %v2812_v32, 6.0  ;;  %v2860_v38 = vmin.f32 %v2828_v28, 6.0  ;;  %v2813_v39 = vmax.f32 %v2781_v18, 0.0  ;;  %v2829_v13 = vmax.f32 %v2797_v43, 0.0  ;;  %v2682_v49 = vpop.f32.mrb[15].mxu0  ;;  %v2746_v14 = vpop.f32.mrb[15].mxu1 }
 0x45d   : > { %v2842_v40 = vmin.f32 %v2810_v3, 6.0  ;;  %v2858_v1 = vmin.f32 %v2826_v61, 6.0  ;;  %v2811_v46 = vmax.f32 %v2779_v37, 0.0  ;;  %v2827_v4 = vmax.f32 %v2795_v51, 0.0 }
 0x45e   : > { %v2876_v24 = vmul.f32 %v2844_v63, %v2672_v23  ;;  %v2892_v56 = vmul.f32 %v2860_v38, %v2736_v42  ;;  %v2845_v34 = vmin.f32 %v2813_v39, 6.0  ;;  %v2861_v33 = vmin.f32 %v2829_v13, 6.0 }
 0x45f   : > { %v2874_v17 = vmul.f32 %v2842_v40, %v2664_v9  ;;  %v2890_v29 = vmul.f32 %v2858_v1, %v2728_v35  ;;  %v2843_v25 = vmin.f32 %v2811_v46, 6.0  ;;  %v2859_v30 = vmin.f32 %v2827_v4, 6.0 }
 0x460   : > { %v2908_v22 = vmul.f32 0.16666667, %v2876_v24  ;;  %v2924_v48 = vmul.f32 0.16666667, %v2892_v56  ;;  %v2877_v60 = vmul.f32 %v2845_v34, %v2675_v10  ;;  %v2893_v52 = vmul.f32 %v2861_v33, %v2739_v55 }
 0x461   : > { %v2906_v8 = vmul.f32 0.16666667, %v2874_v17  ;;  %v2922_v45 = vmul.f32 0.16666667, %v2890_v29  ;;  %v2875_v20 = vmul.f32 %v2843_v25, %v2667_v26  ;;  %v2891_v36 = vmul.f32 %v2859_v30, %v2731_v15  ;;  %v6589_v58 = vpop.f32.mrb[16].mxu0  ;;  %v6591_v62 = vpop.f32.mrb[16].mxu1 }
 0x462   : > { %2941 = vst.msk [vmem:[%s6563_s10 + $0x30] sm:$0xff] %vm2934_vm7, %v2908_v22  ;;  %2957 = vst.msk [vmem:[%s6563_s10 + $0xb0] sm:$0xff] %vm2934_vm7, %v2924_v48  ;;  %v2909_v41 = vmul.f32 0.16666667, %v2877_v60  ;;  %v2925_v11 = vmul.f32 0.16666667, %v2893_v52  ;;  %v2688_v44 = vadd.f32 %v3112_v12, %v6549_v59  ;;  %v2752_v16 = vadd.f32 %v3128_v31, %v6549_v59 }
 0x463   : > { %v6599_v53 = vpop.f32.mrb[17].mxu0  ;;  %v6601_v19 = vpop.f32.mrb[17].mxu1  ;;  %2939 = vst.msk [vmem:[%s6563_s10 + $0x20] sm:$0xff] %vm2934_vm7, %v2906_v8  ;;  %2955 = vst.msk [vmem:[%s6563_s10 + $0xa0] sm:$0xff] %vm2934_vm7, %v2922_v45  ;;  %v2907_v57 = vmul.f32 0.16666667, %v2875_v20  ;;  %v2680_v42 = vadd.f32 %v6549_v59, %v2679_v5  ;;  %v2744_v27 = vadd.f32 %v6549_v59, %v2743_v2  ;;  %v2691_v6 = vadd.f32 %v3113_v50, %v6549_v59 }
 0x464   : > { %v2923_v23 = vmul.f32 0.16666667, %v2891_v36  ;;  %v6609_v47 = vpop.f32.mrb[18].mxu0  ;;  %v6611_v9 = vpop.f32.mrb[18].mxu1  ;;  %2942 = vst.msk [vmem:[%s6563_s10 + $0x38] sm:$0xff] %vm2934_vm7, %v2909_v41  ;;  %2958 = vst.msk [vmem:[%s6563_s10 + $0xb8] sm:$0xff] %vm2934_vm7, %v2925_v11  ;;  %v2755_v10 = vadd.f32 %v3129_v21, %v6549_v59  ;;  %v2683_v15 = vadd.f32 %v6549_v59, %v2682_v49  ;;  %v2747_v12 = vadd.f32 %v6549_v59, %v2746_v14 }
 0x465   : > { %v2784_v35 = vadd.f32 3.0, %v2688_v44  ;;  %v2800_v54 = vadd.f32 3.0, %v2752_v16  ;;  %v2698_v55 = vpop.f32.mrb[19].mxu0  ;;  %v2762_v7 = vpop.f32.mrb[19].mxu1  ;;  %2940 = vst.msk [vmem:[%s6563_s10 + $0x28] sm:$0xff] %vm2934_vm7, %v2907_v57  ;;  %v2782_v0 = vadd.f32 3.0, %v2680_v42  ;;  %v2704_v52 = vadd.f32 %v6589_v58, %v6549_v59 }
 0x466   : > { %2956 = vst.msk [vmem:[%s6563_s10 + $0xa8] sm:$0xff] %vm2934_vm7, %v2923_v23  ;;  %v2798_v26 = vadd.f32 3.0, %v2744_v27  ;;  %v2785_v28 = vadd.f32 3.0, %v2691_v6  ;;  %v2801_v18 = vadd.f32 3.0, %v2755_v10  ;;  %v2783_v2 = vadd.f32 3.0, %v2683_v15 }
 0x467   : > { %v2816_v31 = vmax.f32 %v2784_v35, 0.0  ;;  %v2832_v32 = vmax.f32 %v2800_v54, 0.0  ;;  %v2814_v43 = vmax.f32 %v2782_v0, 0.0  ;;  %v2799_v3 = vadd.f32 3.0, %v2747_v12 }
 0x468   : > { %v2830_v5 = vmax.f32 %v2798_v26, 0.0  ;;  %v2817_v51 = vmax.f32 %v2785_v28, 0.0  ;;  %v2833_v50 = vmax.f32 %v2801_v18, 0.0  ;;  %v2815_v38 = vmax.f32 %v2783_v2, 0.0 }
 0x469   : > { %v2848_v61 = vmin.f32 %v2816_v31, 6.0  ;;  %v2864_v37 = vmin.f32 %v2832_v32, 6.0  ;;  %v2846_v21 = vmin.f32 %v2814_v43, 6.0  ;;  %v2831_v39 = vmax.f32 %v2799_v3, 0.0 }
 0x46a   : > { %v2862_v63 = vmin.f32 %v2830_v5, 6.0  ;;  %v2849_v14 = vmin.f32 %v2817_v51, 6.0  ;;  %v2865_v40 = vmin.f32 %v2833_v50, 6.0  ;;  %v2847_v4 = vmin.f32 %v2815_v38, 6.0 }
 0x46b   : > { %v2880_v13 = vmul.f32 %v2848_v61, %v2688_v44  ;;  %v2896_v49 = vmul.f32 %v2864_v37, %v2752_v16  ;;  %v2878_v1 = vmul.f32 %v2846_v21, %v2680_v42  ;;  %v2863_v24 = vmin.f32 %v2831_v39, 6.0 }
 0x46c   : > { %v2894_v46 = vmul.f32 %v2862_v63, %v2744_v27  ;;  %v2881_v33 = vmul.f32 %v2849_v14, %v2691_v6  ;;  %v2897_v17 = vmul.f32 %v2865_v40, %v2755_v10  ;;  %v2879_v30 = vmul.f32 %v2847_v4, %v2683_v15 }
 0x46d   : > { %v2912_v56 = vmul.f32 0.16666667, %v2880_v13  ;;  %v2928_v34 = vmul.f32 0.16666667, %v2896_v49  ;;  %v2910_v29 = vmul.f32 0.16666667, %v2878_v1  ;;  %v2895_v22 = vmul.f32 %v2863_v24, %v2747_v12 }
 0x46e   : > { %v2926_v25 = vmul.f32 0.16666667, %v2894_v46  ;;  %v2913_v48 = vmul.f32 0.16666667, %v2881_v33  ;;  %v2929_v60 = vmul.f32 0.16666667, %v2897_v17  ;;  %v2768_v8 = vadd.f32 %v6591_v62, %v6549_v59 }
 0x46f   : > { %2945 = vst.msk [vmem:[%s6563_s10 + $0x50] sm:$0xff] %vm2934_vm7, %v2912_v56  ;;  %2961 = vst.msk [vmem:[%s6563_s10 + $0xd0] sm:$0xff] %vm2934_vm7, %v2928_v34  ;;  %v2911_v45 = vmul.f32 0.16666667, %v2879_v30  ;;  %v2927_v20 = vmul.f32 0.16666667, %v2895_v22  ;;  %v2696_v36 = vadd.f32 %v6549_v59, %v6599_v53  ;;  %v2760_v41 = vadd.f32 %v6549_v59, %v6601_v19 }
 0x470   : > { %2943 = vst.msk [vmem:[%s6563_s10 + $0x40] sm:$0xff] %vm2934_vm7, %v2910_v29  ;;  %2959 = vst.msk [vmem:[%s6563_s10 + $0xc0] sm:$0xff] %vm2934_vm7, %v2926_v25  ;;  %v2788_v58 = vadd.f32 3.0, %v2704_v52  ;;  %v2804_v11 = vadd.f32 3.0, %v2768_v8  ;;  %v2707_v62 = vadd.f32 %v6609_v47, %v6549_v59  ;;  %v2771_v44 = vadd.f32 %v6611_v9, %v6549_v59 }
 0x471   : > { %2946 = vst.msk [vmem:[%s6563_s10 + $0x58] sm:$0xff] %vm2934_vm7, %v2913_v48  ;;  %2962 = vst.msk [vmem:[%s6563_s10 + $0xd8] sm:$0xff] %vm2934_vm7, %v2929_v60  ;;  %v2786_v16 = vadd.f32 3.0, %v2696_v36  ;;  %v2802_v53 = vadd.f32 3.0, %v2760_v41  ;;  %v2699_v19 = vadd.f32 %v6549_v59, %v2698_v55  ;;  %v2763_v57 = vadd.f32 %v6549_v59, %v2762_v7 }
 0x472   : > { %2944 = vst.msk [vmem:[%s6563_s10 + $0x48] sm:$0xff] %vm2934_vm7, %v2911_v45  ;;  %2960 = vst.msk [vmem:[%s6563_s10 + $0xc8] sm:$0xff] %vm2934_vm7, %v2927_v20  ;;  %v2820_v23 = vmax.f32 %v2788_v58, 0.0  ;;  %v2836_v42 = vmax.f32 %v2804_v11, 0.0  ;;  %v2789_v27 = vadd.f32 3.0, %v2707_v62  ;;  %v2805_v35 = vadd.f32 3.0, %v2771_v44 }
 0x473   : > { %v2818_v54 = vmax.f32 %v2786_v16, 0.0  ;;  %v2834_v6 = vmax.f32 %v2802_v53, 0.0  ;;  %v2787_v47 = vadd.f32 3.0, %v2699_v19  ;;  %v2803_v10 = vadd.f32 3.0, %v2763_v57 }
 0x474   : > { %v2852_v0 = vmin.f32 %v2820_v23, 6.0  ;;  %v2868_v9 = vmin.f32 %v2836_v42, 6.0  ;;  %v2821_v26 = vmax.f32 %v2789_v27, 0.0  ;;  %v2837_v15 = vmax.f32 %v2805_v35, 0.0 }
 0x475   : > { %v2850_v12 = vmin.f32 %v2818_v54, 6.0  ;;  %v2866_v31 = vmin.f32 %v2834_v6, 6.0  ;;  %v2819_v32 = vmax.f32 %v2787_v47, 0.0  ;;  %v2835_v28 = vmax.f32 %v2803_v10, 0.0 }
 0x476   : > { %v2884_v18 = vmul.f32 %v2852_v0, %v2704_v52  ;;  %v2900_v55 = vmul.f32 %v2868_v9, %v2768_v8  ;;  %v2853_v59 = vmin.f32 %v2821_v26, 6.0  ;;  %v2869_v7 = vmin.f32 %v2837_v15, 6.0 }
 0x477   : > { %v2882_v43 = vmul.f32 %v2850_v12, %v2696_v36  ;;  %v2898_v5 = vmul.f32 %v2866_v31, %v2760_v41  ;;  %v2851_v2 = vmin.f32 %v2819_v32, 6.0  ;;  %v2867_v3 = vmin.f32 %v2835_v28, 6.0 }
 0x478   : > { %v2916_v61 = vmul.f32 0.16666667, %v2884_v18  ;;  %v2932_v37 = vmul.f32 0.16666667, %v2900_v55  ;;  %v2885_v51 = vmul.f32 %v2853_v59, %v2707_v62  ;;  %v2901_v50 = vmul.f32 %v2869_v7, %v2771_v44 }
 0x479   : > { %v2914_v21 = vmul.f32 0.16666667, %v2882_v43  ;;  %v2930_v63 = vmul.f32 0.16666667, %v2898_v5  ;;  %v2883_v38 = vmul.f32 %v2851_v2, %v2699_v19  ;;  %v2899_v39 = vmul.f32 %v2867_v3, %v2763_v57 }
 0x47a   : > { %2949 = vst.msk [vmem:[%s6563_s10 + $0x70] sm:$0xff] %vm2934_vm7, %v2916_v61  ;;  %2965 = vst.msk [vmem:[%s6563_s10 + $0xf0] sm:$0xff] %vm2934_vm7, %v2932_v37  ;;  %v2917_v13 = vmul.f32 0.16666667, %v2885_v51  ;;  %v2933_v49 = vmul.f32 0.16666667, %v2901_v50 }
 0x47b   : > { %2947 = vst.msk [vmem:[%s6563_s10 + $0x60] sm:$0xff] %vm2934_vm7, %v2914_v21  ;;  %2963 = vst.msk [vmem:[%s6563_s10 + $0xe0] sm:$0xff] %vm2934_vm7, %v2930_v63  ;;  %v2915_v14 = vmul.f32 0.16666667, %v2883_v38  ;;  %v2931_v40 = vmul.f32 0.16666667, %v2899_v39 }
 0x47c   : > { %2950 = vst.msk [vmem:[%s6563_s10 + $0x78] sm:$0xff] %vm2934_vm7, %v2917_v13  ;;  %2966 = vst.msk [vmem:[%s6563_s10 + $0xf8] sm:$0xff] %vm2934_vm7, %v2933_v49 }
 0x47d   : > { %2948 = vst.msk [vmem:[%s6563_s10 + $0x68] sm:$0xff] %vm2934_vm7, %v2915_v14  ;;  %2964 = vst.msk [vmem:[%s6563_s10 + $0xe8] sm:$0xff] %vm2934_vm7, %v2931_v40 }
 0x47e PF: > { %s19_s30 = sadd.s32 1, %s3203_s30  }
 0x47f   : > { %p16_p4 = scmp.ge.s32.totalorder %s19_s30, 4  }
 0x481   :  { %18 = sbr.rel (!%p16_p4) target bundleno = 1 (0x1), region = 88 }

</bundles_post_ra>
